<compile_context>
chip_gen: v7x
topology: tpu7x:2x2x1
jax: 0.10.0
libtpu: 0.0.40
codegen_flags: <defaults>
</compile_context>

<pallas_src>
import functools
import math

import numpy as np
import jax
import jax.numpy as jnp
from jax import lax
from jax.experimental import pallas as pl
from jax.experimental.pallas import tpu as pltpu

MXU_DTYPE = jnp.bfloat16     # dtype fed to the MXU (accumulation stays f32)


# ----------------------------------------------------------------------------
# Pallas kernel: one grid step == C independent chunks of the recurrent loop.
# ----------------------------------------------------------------------------
def _recurrent_attn_block_kernel(q_ref, k_ref, v_ref,
                                 wq2_ref, wo_ref,
                                 qcs_ref, qsc_ref, qb_ref,
                                 bias_ref, bo_ref,
                                 o_ref, attn_ref, *, n_head):
    B, CB, N = q_ref.shape          # CB = chunks_per_block * chunk_size
    D = N // n_head
    f32 = jnp.float32

    # ---- fused rotary-folded Q projection: ONE (B*CB, N) x (N, 2N) MXU pass --
    xq = q_ref[...].reshape(B * CB, N).astype(MXU_DTYPE)
    q2 = jnp.dot(xq, wq2_ref[...], preferred_element_type=f32).reshape(B, CB, 2 * N)
    # rotary + positional_scaling + SDPA scale + rotated query bias, pre-folded;
    # the [:N] / [N:] cuts are free 128-aligned lane-boundary slices.
    q = (q2[:, :, :N] * qcs_ref[...] + q2[:, :, N:] * qsc_ref[...]
         + qb_ref[...]).astype(MXU_DTYPE)

    k = k_ref[...]                  # (B, Sk, N) bf16, rotary-folded, hoisted out of grid
    v = v_ref[...]                  # (B, Sk, N) bf16, hoisted out of grid
    bias = bias_ref[...]            # (CB, Sk) additive causal bias (0 / -1e30)

    # ---- attention: batched over batch; heads = short static lane-slice loop -
    for h in range(n_head):
        sl = slice(h * D, (h + 1) * D)
        s = jnp.einsum('bqd,bkd->bqk', q[:, :, sl], k[:, :, sl],
                       preferred_element_type=f32)
        s = s + bias
        m = jnp.max(s, axis=-1, keepdims=True)
        p = jnp.exp(s - m)
        p = p * pl.reciprocal(jnp.sum(p, axis=-1, keepdims=True), approx=True)
        ah = jnp.einsum('bqk,bkd->bqd', p.astype(MXU_DTYPE), v[:, :, sl],
                        preferred_element_type=f32)
        attn_ref[:, sl] = ah.reshape(B * CB, D).astype(MXU_DTYPE)   # bf16 scratch

    # ---- output projection over the full lane width --------------------------
    out = jnp.dot(attn_ref[...], wo_ref[...], preferred_element_type=f32) + bo_ref[...]
    o_ref[...] = out.reshape(B, CB, N).astype(o_ref.dtype)


# ----------------------------------------------------------------------------
# Parameter initialization (shapes per the module __init__; values exercise
# the rotary folding — thetas non-zero, rotation_matrix not identity).
# ----------------------------------------------------------------------------
def init_params(key, n_state, n_head, base, max_rel_dist):
    h_dim = n_state // n_head
    num_rotations = h_dim // 2
    ks = jax.random.split(key, 10)
    bound = 1.0 / math.sqrt(n_state)
    unif = lambda k, shp: jax.random.uniform(k, shp, jnp.float32, -bound, bound)
    return dict(
        Wq=unif(ks[0], (n_state, n_state)), bq=unif(ks[1], (n_state,)),
        Wk=unif(ks[2], (n_state, n_state)),                      # key: no bias
        Wv=unif(ks[3], (n_state, n_state)), bv=unif(ks[4], (n_state,)),
        Wo=unif(ks[5], (n_state, n_state)), bo=unif(ks[6], (n_state,)),
        positional_scaling=jnp.full((1,), 0.9, jnp.float32),
        thetas=jax.random.uniform(ks[7], (num_rotations,), jnp.float32, -0.3, 0.3),
        rotation_pairs=jax.random.uniform(ks[8], (num_rotations, 2), jnp.float32) * h_dim,
        theta_scale=jnp.ones((1,), jnp.float32),
        rotation_matrix=(jnp.eye(h_dim, dtype=jnp.float32)
                         + 0.05 * jax.random.normal(ks[9], (h_dim, h_dim), jnp.float32)),
        num_rotations_scale=jnp.ones((1,), jnp.float32),
        inv_freq=1.0 / (base ** (jnp.arange(0, h_dim, 2, dtype=jnp.float32) / h_dim)),
        rel_pos_bias=jnp.zeros((2 * max_rel_dist - 1, n_head), jnp.float32),  # dead: qk discarded
    )


# ----------------------------------------------------------------------------
# Host-side (parameter-only) folding of the rotary embedding + SDPA scale.
# ----------------------------------------------------------------------------
def _build_R(params, h_dim):
    """Givens-rotation product @ rotation_matrix, PyTorch assignment order."""
    thetas = np.asarray(params['thetas'], np.float64)
    pairs = np.asarray(params['rotation_pairs'], np.float64)
    theta_scale = float(np.asarray(params['theta_scale']).reshape(-1)[0])
    nrs = float(np.asarray(params['num_rotations_scale']).reshape(-1)[0])
    num_rot = int(thetas.shape[0] * nrs)
    R = np.eye(h_dim)
    for kk in range(num_rot):
        i, j = int(pairs[kk, 0]), int(pairs[kk, 1])
        th = float(thetas[kk]) * theta_scale
        G = np.eye(h_dim)
        G[i, i] = math.cos(th)
        G[i, j] = -math.sin(th)
        G[j, i] = math.sin(th)
        G[j, j] = math.cos(th)
        R = R @ G
    return R @ np.asarray(params['rotation_matrix'], np.float64)


def _fold_operands(params, *, n_head, h_dim, chunk):
    """Fold rotary matrices into Wq/Wk, build per-position cs/sc/bias tables."""
    half = h_dim // 2
    R = _build_R(params, h_dim)                                        # (D, D)

    E = np.zeros((h_dim, half)); E[np.arange(0, h_dim, 2), np.arange(half)] = 1.0
    O = np.zeros((h_dim, half)); O[np.arange(1, h_dim, 2), np.arange(half)] = 1.0
    RE = np.kron(np.eye(n_head), R @ np.concatenate([E, E], axis=1))   # (N, N)
    RO = np.kron(np.eye(n_head), R @ np.concatenate([O, O], axis=1))   # (N, N)

    inv_freq = np.asarray(params['inv_freq'], np.float64)
    ang = np.arange(chunk, dtype=np.float64)[:, None] * inv_freq[None, :]
    cs = np.tile(np.concatenate([np.cos(ang), np.sin(ang)], axis=1), (1, n_head))   # (chunk, N)
    sc = np.tile(np.concatenate([-np.sin(ang), np.cos(ang)], axis=1), (1, n_head))

    ps = float(np.asarray(params['positional_scaling']).reshape(-1)[0])
    sdpa = 1.0 / math.sqrt(h_dim)        # SDPA default softmax scale (folded into q side)

    WqT = np.asarray(params['Wq'], np.float64).T
    WkT = np.asarray(params['Wk'], np.float64).T
    bq = np.asarray(params['bq'], np.float64)[None, :]

    qcs, qsc = cs * ps * sdpa, sc * ps * sdpa
    kcs, ksc = cs * ps, sc * ps
    qbias = (bq @ RE) * qcs + (bq @ RO) * qsc                          # (chunk, N)

    # upper-left-aligned causal additive bias, per chunk (positions restart at 0)
    causal = np.where(np.tril(np.ones((chunk, chunk), dtype=bool)), 0.0, -1e30)

    f32 = np.float32
    return dict(
        WQ2=np.concatenate([WqT @ RE, WqT @ RO], axis=1).astype(f32),  # fused WQE|WQO (N, 2N)
        WKE=(WkT @ RE).astype(f32), WKO=(WkT @ RO).astype(f32),
        WV=np.asarray(params['Wv'], np.float64).T.astype(f32),
        WO=np.asarray(params['Wo'], np.float64).T.astype(f32),
        qcs=qcs.astype(f32), qsc=qsc.astype(f32), qbias=qbias.astype(f32),
        kcs=kcs.astype(f32), ksc=ksc.astype(f32),
        bv=np.asarray(params['bv'], np.float64)[None, :].astype(f32),
        bo=np.asarray(params['bo'], np.float64)[None, :].astype(f32),
        causal=causal.astype(f32),
    )


def _pick_chunks_per_block(num_chunks, batch, chunk_size, target_rows=256):
    """Largest divisor C of num_chunks with batch*C*chunk_size near the MXU row
    target (256 on v6e/v7x) while keeping the grid length >= 2 when possible."""
    cap = max(1, -(-target_rows // (batch * chunk_size)))   # ceil div
    best = 1
    for c in range(1, num_chunks + 1):
        if num_chunks % c or c > cap:
            continue
        if num_chunks // c >= 2 or num_chunks == 1:
            best = c
    return best


# ----------------------------------------------------------------------------
# Wrapper: chunk loop mapped onto a parallel Pallas grid (C chunks per step).
# ----------------------------------------------------------------------------
def recurrent_attention(query, key, value, params, *, n_head, chunk_size,
                        chunks_per_block=None):
    B, S, N = query.shape
    D = N // n_head
    assert N % n_head == 0 and D % 2 == 0
    assert chunk_size > 1                        # SDPA is_causal needs n_ctx > 1
    assert S % chunk_size == 0 and chunk_size % 8 == 0
    # TODO(synk): ragged final chunk (seq_len % chunk_size != 0) needs a padded trailing block.
    num_chunks = S // chunk_size

    if chunks_per_block is None:
        chunks_per_block = _pick_chunks_per_block(num_chunks, B, chunk_size)
    assert num_chunks % chunks_per_block == 0
    CB = chunks_per_block * chunk_size           # query rows per grid step (per batch)
    num_blocks = num_chunks // chunks_per_block  # grid length (>= 2 when possible: v7x 2 TCs)

    ops = _fold_operands(params, n_head=n_head, h_dim=D, chunk=chunk_size)

    # ---- K/V prefix hoisted out of the grid ----------------------------------
    # Every chunk attends to the same fixed key[:, :chunk_size] prefix, so the
    # rotary-folded K and the V projection are computed ONCE here (f32 XLA
    # matmuls), not recomputed every grid step inside the kernel.
    hp = jax.lax.Precision.HIGHEST
    kp = key[:, :chunk_size, :].astype(jnp.float32).reshape(B * chunk_size, N)
    ke = jnp.dot(kp, jnp.asarray(ops['WKE']), precision=hp).reshape(B, chunk_size, N)
    ko = jnp.dot(kp, jnp.asarray(ops['WKO']), precision=hp).reshape(B, chunk_size, N)
    k_pre = (ke * jnp.asarray(ops['kcs']) + ko * jnp.asarray(ops['ksc'])).astype(MXU_DTYPE)
    v_pre = ((jnp.dot(kp, jnp.asarray(ops['WV']), precision=hp) + jnp.asarray(ops['bv']))
             .reshape(B, chunk_size, N).astype(MXU_DTYPE))

    # ---- per-position tables tiled over the C chunks in a block --------------
    tile_c = lambda a: jnp.asarray(np.tile(a, (chunks_per_block, 1)))
    qcs_t, qsc_t, qb_t = tile_c(ops['qcs']), tile_c(ops['qsc']), tile_c(ops['qbias'])
    bias_t = tile_c(ops['causal'])                                     # (CB, chunk_size)

    wq2 = jnp.asarray(ops['WQ2'], MXU_DTYPE)
    wo = jnp.asarray(ops['WO'], MXU_DTYPE)
    bo = jnp.asarray(ops['bo'])

    kernel = functools.partial(_recurrent_attn_block_kernel, n_head=n_head)

    qo_spec = pl.BlockSpec((B, CB, N), lambda g: (0, g, 0))
    kv_spec = pl.BlockSpec((B, chunk_size, N), lambda g: (0, 0, 0))
    tab_spec = pl.BlockSpec((CB, N), lambda g: (0, 0))

    out = pl.pallas_call(
        kernel,
        out_shape=jax.ShapeDtypeStruct((B, S, N), jnp.float32),
        grid=(num_blocks,),
        in_specs=[
            qo_spec,                                           # query block (C chunks)
            kv_spec, kv_spec,                                  # precomputed K, V prefix (bf16)
            pl.BlockSpec((N, 2 * N), lambda g: (0, 0)),        # fused WQE|WQO
            pl.BlockSpec((N, N), lambda g: (0, 0)),            # WO
            tab_spec, tab_spec, tab_spec,                      # qcs, qsc, qbias (tiled)
            pl.BlockSpec((CB, chunk_size), lambda g: (0, 0)),  # causal additive bias
            pl.BlockSpec((1, N), lambda g: (0, 0)),            # bo
        ],
        out_specs=qo_spec,
        scratch_shapes=[pltpu.VMEM((B * CB, N), MXU_DTYPE)],   # bf16 head-assembly scratch
        compiler_params=pltpu.CompilerParams(
            dimension_semantics=("parallel",),    # chunk blocks independent (v7x: both TCs)
            vmem_limit_bytes=32 * 1024 * 1024,    # re-derived vs v7x's 64 MiB physical VMEM
        ),
    )(query, k_pre, v_pre, wq2, wo, qcs_t, qsc_t, qb_t, bias_t, bo)

    kv_cache = {'k': key, 'v': value}
    return out, kv_cache


# ----------------------------------------------------------------------------
# Pure numpy reference (literal transcription of the PyTorch forward).
# ----------------------------------------------------------------------------
def _rot_np(x, R, inv_freq, n_head, h_dim):
    B_, S_, N_ = x.shape
    x4 = x.reshape(B_, S_, n_head, h_dim) @ R
    ang = np.arange(S_)[:, None] * inv_freq[None, :]
    sin = np.sin(ang)[None, :, None, :]
    cos = np.cos(ang)[None, :, None, :]
    x1, x2 = x4[..., 0::2], x4[..., 1::2]
    y = np.concatenate([x1 * cos - x2 * sin, x1 * sin + x2 * cos], axis=-1)
    return y.reshape(B_, S_, N_)


def reference_forward(query, key, value, p, *, n_head, chunk_size):
    del value                         # only toggles "mask is not None" => is_causal=True
    B, S, N = query.shape
    D = N // n_head
    R = _build_R(p, D)
    ps = float(np.asarray(p['positional_scaling']).reshape(-1)[0])
    inv_freq = np.asarray(p['inv_freq'], np.float64)
    out = np.zeros_like(query)
    kv_k = key.copy()                 # kv_cache['k'] = key_global.clone()
    for i in range(0, S, chunk_size):
        end = min(S, i + chunk_size)
        xq = query[:, i:end, :]
        xk = kv_k[:, :end, :]
        q = xq @ np.asarray(p['Wq']).T + np.asarray(p['bq'])
        k = xk @ np.asarray(p['Wk']).T
        v = xk @ np.asarray(p['Wv']).T + np.asarray(p['bv'])   # xa = key prefix!
        q = _rot_np(q, R, inv_freq, n_head, D) * ps
        k = _rot_np(k, R, inv_freq, n_head, D) * ps
        L, Sk = q.shape[1], k.shape[1]
        q4 = q.reshape(B, L, n_head, D).transpose(0, 2, 1, 3)
        k4 = k.reshape(B, Sk, n_head, D).transpose(0, 2, 1, 3)
        v4 = v.reshape(B, Sk, n_head, D).transpose(0, 2, 1, 3)
        s = (q4 @ k4.transpose(0, 1, 3, 2)) / math.sqrt(D)
        mask = np.tril(np.ones((L, Sk), dtype=bool))           # upper-left causal (SDPA)
        s = np.where(mask, s, -np.inf)
        s = s - s.max(axis=-1, keepdims=True)
        w = np.exp(s); w = w / w.sum(axis=-1, keepdims=True)
        a = (w @ v4).transpose(0, 2, 1, 3).reshape(B, L, N)
        out[:, i:end, :] = a @ np.asarray(p['Wo']).T + np.asarray(p['bo'])
    return out


if __name__ == "__main__":
    # h_dim = 32 (even), lane-dense n_state; S/chunk = 16 chunks so the grid is
    # blocked into 2 steps of 8 chunks each (M = B*C*chunk = 256 MXU rows).
    B, S, n_state, n_head = 2, 256, 128, 4
    chunk_size, max_rel_dist, base = 16, 32, 10000.0

    root = jax.random.PRNGKey(0)
    kq, kk, kv, kp = jax.random.split(root, 4)
    query = jax.random.normal(kq, (B, S, n_state), jnp.float32)
    key_t = jax.random.normal(kk, (B, S, n_state), jnp.float32)
    value = jax.random.normal(kv, (B, S, n_state), jnp.float32)
    params = init_params(kp, n_state, n_head, base, max_rel_dist)

    out, kv_cache = recurrent_attention(query, key_t, value, params,
                                        n_head=n_head, chunk_size=chunk_size)
    out = jax.block_until_ready(out)

    params_np = {k: np.asarray(v) for k, v in params.items()}
    ref = reference_forward(np.asarray(query), np.asarray(key_t), np.asarray(value),
                            params_np, n_head=n_head, chunk_size=chunk_size)
    # tolerance sized for bf16 MXU inputs (f32 accumulation) vs float64/float32 reference
    np.testing.assert_allclose(np.asarray(out), ref, atol=5e-2, rtol=5e-2)
    print("KERNEL_OK")
</pallas_src>

<mosaic_0001>
module attributes {stable_mosaic.version = 11 : i64} {
  func.func @_recurrent_attn_block_kernel(%arg0: i32, %arg1: memref<2x128x128xf32, #tpu.memory_space<vmem>>, %arg2: memref<2x16x128xbf16, #tpu.memory_space<vmem>>, %arg3: memref<2x16x128xbf16, #tpu.memory_space<vmem>>, %arg4: memref<128x256xbf16, #tpu.memory_space<vmem>>, %arg5: memref<128x128xbf16, #tpu.memory_space<vmem>>, %arg6: memref<128x128xf32, #tpu.memory_space<vmem>>, %arg7: memref<128x128xf32, #tpu.memory_space<vmem>>, %arg8: memref<128x128xf32, #tpu.memory_space<vmem>>, %arg9: memref<128x16xf32, #tpu.memory_space<vmem>>, %arg10: memref<1x128xf32, #tpu.memory_space<vmem>>, %arg11: memref<2x128x128xf32, #tpu.memory_space<vmem>>, %arg12: memref<256x128xbf16, #tpu.memory_space<vmem>>) attributes {dimension_semantics = [#tpu.dimension_semantics<parallel>], iteration_bounds = array<i64: 2>, scalar_prefetch = 0 : i64, scratch_operands = 1 : i64, tpu.core_type = #tpu.core_type<tc>, window_params = [{transform_indices = @transform_0, window_bounds = array<i64: 2, 128, 128>}, {pipeline_mode = #tpu.pipeline_mode<synchronous>, transform_indices = @transform_1, window_bounds = array<i64: 2, 16, 128>}, {pipeline_mode = #tpu.pipeline_mode<synchronous>, transform_indices = @transform_2, window_bounds = array<i64: 2, 16, 128>}, {pipeline_mode = #tpu.pipeline_mode<synchronous>, transform_indices = @transform_3, window_bounds = array<i64: 128, 256>}, {pipeline_mode = #tpu.pipeline_mode<synchronous>, transform_indices = @transform_4, window_bounds = array<i64: 128, 128>}, {pipeline_mode = #tpu.pipeline_mode<synchronous>, transform_indices = @transform_5, window_bounds = array<i64: 128, 128>}, {pipeline_mode = #tpu.pipeline_mode<synchronous>, transform_indices = @transform_6, window_bounds = array<i64: 128, 128>}, {pipeline_mode = #tpu.pipeline_mode<synchronous>, transform_indices = @transform_7, window_bounds = array<i64: 128, 128>}, {pipeline_mode = #tpu.pipeline_mode<synchronous>, transform_indices = @transform_8, window_bounds = array<i64: 128, 16>}, {pipeline_mode = #tpu.pipeline_mode<synchronous>, transform_indices = @transform_9, window_bounds = array<i64: 1, 128>}, {transform_indices = @transform_10, window_bounds = array<i64: 2, 128, 128>}]} {
    %c0 = arith.constant 0 : index
    %c0_0 = arith.constant 0 : index
    %c0_1 = arith.constant 0 : index
    %0 = vector.load %arg1[%c0, %c0_0, %c0_1] : memref<2x128x128xf32, #tpu.memory_space<vmem>>, vector<2x128x128xf32>
    %1 = vector.shape_cast %0 : vector<2x128x128xf32> to vector<256x128xf32>
    %2 = arith.truncf %1 : vector<256x128xf32> to vector<256x128xbf16>
    %c0_2 = arith.constant 0 : index
    %c0_3 = arith.constant 0 : index
    %3 = vector.load %arg4[%c0_2, %c0_3] : memref<128x256xbf16, #tpu.memory_space<vmem>>, vector<128x256xbf16>
    %cst = arith.constant dense<0.000000e+00> : vector<256x256xf32>
    %4 = tpu.matmul %2, %3, %cst {dimension_numbers = #tpu.dot_dimension_numbers<[1], [0], [0], [1], [0, 0, 1, 1], [], []>} : vector<256x128xbf16>, vector<128x256xbf16>, vector<256x256xf32> -> vector<256x256xf32>
    %5 = vector.shape_cast %4 : vector<256x256xf32> to vector<2x128x256xf32>
    %6 = vector.extract_strided_slice %5 {offsets = [0, 0, 0], sizes = [2, 128, 128], strides = [1, 1, 1]} : vector<2x128x256xf32> to vector<2x128x128xf32>
    %c0_4 = arith.constant 0 : index
    %c0_5 = arith.constant 0 : index
    %7 = vector.load %arg6[%c0_4, %c0_5] : memref<128x128xf32, #tpu.memory_space<vmem>>, vector<128x128xf32>
    %8 = vector.shape_cast %7 : vector<128x128xf32> to vector<1x128x128xf32>
    %9 = vector.broadcast %8 : vector<1x128x128xf32> to vector<2x128x128xf32>
    %10 = arith.mulf %6, %9 : vector<2x128x128xf32>
    %11 = vector.extract_strided_slice %5 {offsets = [0, 0, 128], sizes = [2, 128, 128], strides = [1, 1, 1]} : vector<2x128x256xf32> to vector<2x128x128xf32>
    %c0_6 = arith.constant 0 : index
    %c0_7 = arith.constant 0 : index
    %12 = vector.load %arg7[%c0_6, %c0_7] : memref<128x128xf32, #tpu.memory_space<vmem>>, vector<128x128xf32>
    %13 = vector.shape_cast %12 : vector<128x128xf32> to vector<1x128x128xf32>
    %14 = vector.broadcast %13 : vector<1x128x128xf32> to vector<2x128x128xf32>
    %15 = arith.mulf %11, %14 : vector<2x128x128xf32>
    %16 = arith.addf %10, %15 : vector<2x128x128xf32>
    %c0_8 = arith.constant 0 : index
    %c0_9 = arith.constant 0 : index
    %17 = vector.load %arg8[%c0_8, %c0_9] : memref<128x128xf32, #tpu.memory_space<vmem>>, vector<128x128xf32>
    %18 = vector.shape_cast %17 : vector<128x128xf32> to vector<1x128x128xf32>
    %19 = vector.broadcast %18 : vector<1x128x128xf32> to vector<2x128x128xf32>
    %20 = arith.addf %16, %19 : vector<2x128x128xf32>
    %21 = arith.truncf %20 : vector<2x128x128xf32> to vector<2x128x128xbf16>
    %c0_10 = arith.constant 0 : index
    %c0_11 = arith.constant 0 : index
    %c0_12 = arith.constant 0 : index
    %22 = vector.load %arg2[%c0_10, %c0_11, %c0_12] : memref<2x16x128xbf16, #tpu.memory_space<vmem>>, vector<2x16x128xbf16>
    %c0_13 = arith.constant 0 : index
    %c0_14 = arith.constant 0 : index
    %c0_15 = arith.constant 0 : index
    %23 = vector.load %arg3[%c0_13, %c0_14, %c0_15] : memref<2x16x128xbf16, #tpu.memory_space<vmem>>, vector<2x16x128xbf16>
    %c0_16 = arith.constant 0 : index
    %c0_17 = arith.constant 0 : index
    %24 = vector.load %arg9[%c0_16, %c0_17] : memref<128x16xf32, #tpu.memory_space<vmem>>, vector<128x16xf32>
    %25 = vector.extract_strided_slice %21 {offsets = [0, 0, 0], sizes = [2, 128, 32], strides = [1, 1, 1]} : vector<2x128x128xbf16> to vector<2x128x32xbf16>
    %26 = vector.extract_strided_slice %22 {offsets = [0, 0, 0], sizes = [2, 16, 32], strides = [1, 1, 1]} : vector<2x16x128xbf16> to vector<2x16x32xbf16>
    "tpu.trace_start"() <{level = 10 : i32, message = "bqd,bkd->bqk"}> : () -> ()
    %cst_18 = arith.constant dense<0.000000e+00> : vector<2x128x16xf32>
    %27 = tpu.matmul %25, %26, %cst_18 {dimension_numbers = #tpu.dot_dimension_numbers<[2], [2], [1], [1], [0, 0, 0, 1, 1, 1], [0], [0]>} : vector<2x128x32xbf16>, vector<2x16x32xbf16>, vector<2x128x16xf32> -> vector<2x128x16xf32>
    "tpu.trace_stop"() : () -> ()
    %28 = vector.shape_cast %24 : vector<128x16xf32> to vector<1x128x16xf32>
    %29 = vector.broadcast %28 : vector<1x128x16xf32> to vector<2x128x16xf32>
    %30 = arith.addf %27, %29 : vector<2x128x16xf32>
    %cst_19 = arith.constant dense<0xFF800000> : vector<2x128xf32>
    %31 = vector.multi_reduction <maximumf>, %30, %cst_19 [2] : vector<2x128x16xf32> to vector<2x128xf32>
    %32 = vector.shape_cast %31 : vector<2x128xf32> to vector<2x128x1xf32>
    %33 = vector.broadcast %32 : vector<2x128x1xf32> to vector<2x128x16xf32>
    %34 = arith.subf %30, %33 : vector<2x128x16xf32>
    %35 = math.exp %34 : vector<2x128x16xf32>
    %cst_20 = arith.constant dense<0.000000e+00> : vector<2x128xf32>
    %36 = vector.multi_reduction <add>, %35, %cst_20 [2] : vector<2x128x16xf32> to vector<2x128xf32>
    %37 = vector.shape_cast %36 : vector<2x128xf32> to vector<2x128x1xf32>
    %38 = tpu.reciprocal %37 {approx = true} : vector<2x128x1xf32> -> vector<2x128x1xf32>
    %39 = vector.broadcast %38 : vector<2x128x1xf32> to vector<2x128x16xf32>
    %40 = arith.mulf %35, %39 : vector<2x128x16xf32>
    %41 = arith.truncf %40 : vector<2x128x16xf32> to vector<2x128x16xbf16>
    %42 = vector.extract_strided_slice %23 {offsets = [0, 0, 0], sizes = [2, 16, 32], strides = [1, 1, 1]} : vector<2x16x128xbf16> to vector<2x16x32xbf16>
    "tpu.trace_start"() <{level = 10 : i32, message = "bqk,bkd->bqd"}> : () -> ()
    %cst_21 = arith.constant dense<0.000000e+00> : vector<2x128x32xf32>
    %43 = tpu.matmul %41, %42, %cst_21 {dimension_numbers = #tpu.dot_dimension_numbers<[2], [1], [1], [2], [0, 0, 0, 1, 1, 2], [0], [0]>} : vector<2x128x16xbf16>, vector<2x16x32xbf16>, vector<2x128x32xf32> -> vector<2x128x32xf32>
    "tpu.trace_stop"() : () -> ()
    %44 = vector.shape_cast %43 : vector<2x128x32xf32> to vector<256x32xf32>
    %45 = arith.truncf %44 : vector<256x32xf32> to vector<256x32xbf16>
    %c0_22 = arith.constant 0 : index
    %c0_23 = arith.constant 0 : index
    %46 = vector.load %arg12[%c0_22, %c0_23] : memref<256x128xbf16, #tpu.memory_space<vmem>>, vector<256x32xbf16>
    tpu.vector_store %arg12[%c0_22, %c0_23], %45 {strides = array<i32>} : memref<256x128xbf16, #tpu.memory_space<vmem>>, vector<256x32xbf16>,
    %47 = vector.extract_strided_slice %21 {offsets = [0, 0, 32], sizes = [2, 128, 32], strides = [1, 1, 1]} : vector<2x128x128xbf16> to vector<2x128x32xbf16>
    %48 = vector.extract_strided_slice %22 {offsets = [0, 0, 32], sizes = [2, 16, 32], strides = [1, 1, 1]} : vector<2x16x128xbf16> to vector<2x16x32xbf16>
    "tpu.trace_start"() <{level = 10 : i32, message = "bqd,bkd->bqk"}> : () -> ()
    %cst_24 = arith.constant dense<0.000000e+00> : vector<2x128x16xf32>
    %49 = tpu.matmul %47, %48, %cst_24 {dimension_numbers = #tpu.dot_dimension_numbers<[2], [2], [1], [1], [0, 0, 0, 1, 1, 1], [0], [0]>} : vector<2x128x32xbf16>, vector<2x16x32xbf16>, vector<2x128x16xf32> -> vector<2x128x16xf32>
    "tpu.trace_stop"() : () -> ()
    %50 = vector.shape_cast %24 : vector<128x16xf32> to vector<1x128x16xf32>
    %51 = vector.broadcast %50 : vector<1x128x16xf32> to vector<2x128x16xf32>
    %52 = arith.addf %49, %51 : vector<2x128x16xf32>
    %cst_25 = arith.constant dense<0xFF800000> : vector<2x128xf32>
    %53 = vector.multi_reduction <maximumf>, %52, %cst_25 [2] : vector<2x128x16xf32> to vector<2x128xf32>
    %54 = vector.shape_cast %53 : vector<2x128xf32> to vector<2x128x1xf32>
    %55 = vector.broadcast %54 : vector<2x128x1xf32> to vector<2x128x16xf32>
    %56 = arith.subf %52, %55 : vector<2x128x16xf32>
    %57 = math.exp %56 : vector<2x128x16xf32>
    %cst_26 = arith.constant dense<0.000000e+00> : vector<2x128xf32>
    %58 = vector.multi_reduction <add>, %57, %cst_26 [2] : vector<2x128x16xf32> to vector<2x128xf32>
    %59 = vector.shape_cast %58 : vector<2x128xf32> to vector<2x128x1xf32>
    %60 = tpu.reciprocal %59 {approx = true} : vector<2x128x1xf32> -> vector<2x128x1xf32>
    %61 = vector.broadcast %60 : vector<2x128x1xf32> to vector<2x128x16xf32>
    %62 = arith.mulf %57, %61 : vector<2x128x16xf32>
    %63 = arith.truncf %62 : vector<2x128x16xf32> to vector<2x128x16xbf16>
    %64 = vector.extract_strided_slice %23 {offsets = [0, 0, 32], sizes = [2, 16, 32], strides = [1, 1, 1]} : vector<2x16x128xbf16> to vector<2x16x32xbf16>
    "tpu.trace_start"() <{level = 10 : i32, message = "bqk,bkd->bqd"}> : () -> ()
    %cst_27 = arith.constant dense<0.000000e+00> : vector<2x128x32xf32>
    %65 = tpu.matmul %63, %64, %cst_27 {dimension_numbers = #tpu.dot_dimension_numbers<[2], [1], [1], [2], [0, 0, 0, 1, 1, 2], [0], [0]>} : vector<2x128x16xbf16>, vector<2x16x32xbf16>, vector<2x128x32xf32> -> vector<2x128x32xf32>
    "tpu.trace_stop"() : () -> ()
    %66 = vector.shape_cast %65 : vector<2x128x32xf32> to vector<256x32xf32>
    %67 = arith.truncf %66 : vector<256x32xf32> to vector<256x32xbf16>
    %c0_28 = arith.constant 0 : index
    %c32 = arith.constant 32 : index
    %68 = vector.load %arg12[%c0_28, %c32] : memref<256x128xbf16, #tpu.memory_space<vmem>>, vector<256x32xbf16>
    tpu.vector_store %arg12[%c0_28, %c32], %67 {strides = array<i32>} : memref<256x128xbf16, #tpu.memory_space<vmem>>, vector<256x32xbf16>,
    %69 = vector.extract_strided_slice %21 {offsets = [0, 0, 64], sizes = [2, 128, 32], strides = [1, 1, 1]} : vector<2x128x128xbf16> to vector<2x128x32xbf16>
    %70 = vector.extract_strided_slice %22 {offsets = [0, 0, 64], sizes = [2, 16, 32], strides = [1, 1, 1]} : vector<2x16x128xbf16> to vector<2x16x32xbf16>
    "tpu.trace_start"() <{level = 10 : i32, message = "bqd,bkd->bqk"}> : () -> ()
    %cst_29 = arith.constant dense<0.000000e+00> : vector<2x128x16xf32>
    %71 = tpu.matmul %69, %70, %cst_29 {dimension_numbers = #tpu.dot_dimension_numbers<[2], [2], [1], [1], [0, 0, 0, 1, 1, 1], [0], [0]>} : vector<2x128x32xbf16>, vector<2x16x32xbf16>, vector<2x128x16xf32> -> vector<2x128x16xf32>
    "tpu.trace_stop"() : () -> ()
    %72 = vector.shape_cast %24 : vector<128x16xf32> to vector<1x128x16xf32>
    %73 = vector.broadcast %72 : vector<1x128x16xf32> to vector<2x128x16xf32>
    %74 = arith.addf %71, %73 : vector<2x128x16xf32>
    %cst_30 = arith.constant dense<0xFF800000> : vector<2x128xf32>
    %75 = vector.multi_reduction <maximumf>, %74, %cst_30 [2] : vector<2x128x16xf32> to vector<2x128xf32>
    %76 = vector.shape_cast %75 : vector<2x128xf32> to vector<2x128x1xf32>
    %77 = vector.broadcast %76 : vector<2x128x1xf32> to vector<2x128x16xf32>
    %78 = arith.subf %74, %77 : vector<2x128x16xf32>
    %79 = math.exp %78 : vector<2x128x16xf32>
    %cst_31 = arith.constant dense<0.000000e+00> : vector<2x128xf32>
    %80 = vector.multi_reduction <add>, %79, %cst_31 [2] : vector<2x128x16xf32> to vector<2x128xf32>
    %81 = vector.shape_cast %80 : vector<2x128xf32> to vector<2x128x1xf32>
    %82 = tpu.reciprocal %81 {approx = true} : vector<2x128x1xf32> -> vector<2x128x1xf32>
    %83 = vector.broadcast %82 : vector<2x128x1xf32> to vector<2x128x16xf32>
    %84 = arith.mulf %79, %83 : vector<2x128x16xf32>
    %85 = arith.truncf %84 : vector<2x128x16xf32> to vector<2x128x16xbf16>
    %86 = vector.extract_strided_slice %23 {offsets = [0, 0, 64], sizes = [2, 16, 32], strides = [1, 1, 1]} : vector<2x16x128xbf16> to vector<2x16x32xbf16>
    "tpu.trace_start"() <{level = 10 : i32, message = "bqk,bkd->bqd"}> : () -> ()
    %cst_32 = arith.constant dense<0.000000e+00> : vector<2x128x32xf32>
    %87 = tpu.matmul %85, %86, %cst_32 {dimension_numbers = #tpu.dot_dimension_numbers<[2], [1], [1], [2], [0, 0, 0, 1, 1, 2], [0], [0]>} : vector<2x128x16xbf16>, vector<2x16x32xbf16>, vector<2x128x32xf32> -> vector<2x128x32xf32>
    "tpu.trace_stop"() : () -> ()
    %88 = vector.shape_cast %87 : vector<2x128x32xf32> to vector<256x32xf32>
    %89 = arith.truncf %88 : vector<256x32xf32> to vector<256x32xbf16>
    %c0_33 = arith.constant 0 : index
    %c64 = arith.constant 64 : index
    %90 = vector.load %arg12[%c0_33, %c64] : memref<256x128xbf16, #tpu.memory_space<vmem>>, vector<256x32xbf16>
    tpu.vector_store %arg12[%c0_33, %c64], %89 {strides = array<i32>} : memref<256x128xbf16, #tpu.memory_space<vmem>>, vector<256x32xbf16>,
    %91 = vector.extract_strided_slice %21 {offsets = [0, 0, 96], sizes = [2, 128, 32], strides = [1, 1, 1]} : vector<2x128x128xbf16> to vector<2x128x32xbf16>
    %92 = vector.extract_strided_slice %22 {offsets = [0, 0, 96], sizes = [2, 16, 32], strides = [1, 1, 1]} : vector<2x16x128xbf16> to vector<2x16x32xbf16>
    "tpu.trace_start"() <{level = 10 : i32, message = "bqd,bkd->bqk"}> : () -> ()
    %cst_34 = arith.constant dense<0.000000e+00> : vector<2x128x16xf32>
    %93 = tpu.matmul %91, %92, %cst_34 {dimension_numbers = #tpu.dot_dimension_numbers<[2], [2], [1], [1], [0, 0, 0, 1, 1, 1], [0], [0]>} : vector<2x128x32xbf16>, vector<2x16x32xbf16>, vector<2x128x16xf32> -> vector<2x128x16xf32>
    "tpu.trace_stop"() : () -> ()
    %94 = vector.shape_cast %24 : vector<128x16xf32> to vector<1x128x16xf32>
    %95 = vector.broadcast %94 : vector<1x128x16xf32> to vector<2x128x16xf32>
    %96 = arith.addf %93, %95 : vector<2x128x16xf32>
    %cst_35 = arith.constant dense<0xFF800000> : vector<2x128xf32>
    %97 = vector.multi_reduction <maximumf>, %96, %cst_35 [2] : vector<2x128x16xf32> to vector<2x128xf32>
    %98 = vector.shape_cast %97 : vector<2x128xf32> to vector<2x128x1xf32>
    %99 = vector.broadcast %98 : vector<2x128x1xf32> to vector<2x128x16xf32>
    %100 = arith.subf %96, %99 : vector<2x128x16xf32>
    %101 = math.exp %100 : vector<2x128x16xf32>
    %cst_36 = arith.constant dense<0.000000e+00> : vector<2x128xf32>
    %102 = vector.multi_reduction <add>, %101, %cst_36 [2] : vector<2x128x16xf32> to vector<2x128xf32>
    %103 = vector.shape_cast %102 : vector<2x128xf32> to vector<2x128x1xf32>
    %104 = tpu.reciprocal %103 {approx = true} : vector<2x128x1xf32> -> vector<2x128x1xf32>
    %105 = vector.broadcast %104 : vector<2x128x1xf32> to vector<2x128x16xf32>
    %106 = arith.mulf %101, %105 : vector<2x128x16xf32>
    %107 = arith.truncf %106 : vector<2x128x16xf32> to vector<2x128x16xbf16>
    %108 = vector.extract_strided_slice %23 {offsets = [0, 0, 96], sizes = [2, 16, 32], strides = [1, 1, 1]} : vector<2x16x128xbf16> to vector<2x16x32xbf16>
    "tpu.trace_start"() <{level = 10 : i32, message = "bqk,bkd->bqd"}> : () -> ()
    %cst_37 = arith.constant dense<0.000000e+00> : vector<2x128x32xf32>
    %109 = tpu.matmul %107, %108, %cst_37 {dimension_numbers = #tpu.dot_dimension_numbers<[2], [1], [1], [2], [0, 0, 0, 1, 1, 2], [0], [0]>} : vector<2x128x16xbf16>, vector<2x16x32xbf16>, vector<2x128x32xf32> -> vector<2x128x32xf32>
    "tpu.trace_stop"() : () -> ()
    %110 = vector.shape_cast %109 : vector<2x128x32xf32> to vector<256x32xf32>
    %111 = arith.truncf %110 : vector<256x32xf32> to vector<256x32xbf16>
    %c0_38 = arith.constant 0 : index
    %c96 = arith.constant 96 : index
    %112 = vector.load %arg12[%c0_38, %c96] : memref<256x128xbf16, #tpu.memory_space<vmem>>, vector<256x32xbf16>
    tpu.vector_store %arg12[%c0_38, %c96], %111 {strides = array<i32>} : memref<256x128xbf16, #tpu.memory_space<vmem>>, vector<256x32xbf16>,
    %c0_39 = arith.constant 0 : index
    %c0_40 = arith.constant 0 : index
    %113 = vector.load %arg12[%c0_39, %c0_40] : memref<256x128xbf16, #tpu.memory_space<vmem>>, vector<256x128xbf16>
    %c0_41 = arith.constant 0 : index
    %c0_42 = arith.constant 0 : index
    %114 = vector.load %arg5[%c0_41, %c0_42] : memref<128x128xbf16, #tpu.memory_space<vmem>>, vector<128x128xbf16>
    %cst_43 = arith.constant dense<0.000000e+00> : vector<256x128xf32>
    %115 = tpu.matmul %113, %114, %cst_43 {dimension_numbers = #tpu.dot_dimension_numbers<[1], [0], [0], [1], [0, 0, 1, 1], [], []>} : vector<256x128xbf16>, vector<128x128xbf16>, vector<256x128xf32> -> vector<256x128xf32>
    %c0_44 = arith.constant 0 : index
    %c0_45 = arith.constant 0 : index
    %116 = vector.load %arg10[%c0_44, %c0_45] : memref<1x128xf32, #tpu.memory_space<vmem>>, vector<1x128xf32>
    %117 = vector.broadcast %116 : vector<1x128xf32> to vector<256x128xf32>
    %118 = arith.addf %115, %117 : vector<256x128xf32>
    %119 = vector.shape_cast %118 : vector<256x128xf32> to vector<2x128x128xf32>
    %c0_46 = arith.constant 0 : index
    %c0_47 = arith.constant 0 : index
    %c0_48 = arith.constant 0 : index
    %120 = vector.load %arg11[%c0_46, %c0_47, %c0_48] : memref<2x128x128xf32, #tpu.memory_space<vmem>>, vector<2x128x128xf32>
    tpu.vector_store %arg11[%c0_46, %c0_47, %c0_48], %119 {strides = array<i32>} : memref<2x128x128xf32, #tpu.memory_space<vmem>>, vector<2x128x128xf32>,
    return
  }
  func.func @transform_0(%arg0: i32) -> (i32, i32, i32) {
    %c0_i32 = arith.constant 0 : i32
    %c0_i32_0 = arith.constant 0 : i32
    %c0_i32_1 = arith.constant 0 : i32
    return %c0_i32, %arg0, %c0_i32_0 : i32, i32, i32
  }
  func.func @transform_1(%arg0: i32) -> (i32, i32, i32) {
    %c0_i32 = arith.constant 0 : i32
    %c0_i32_0 = arith.constant 0 : i32
    %c0_i32_1 = arith.constant 0 : i32
    %c0_i32_2 = arith.constant 0 : i32
    return %c0_i32, %c0_i32_0, %c0_i32_1 : i32, i32, i32
  }
  func.func @transform_2(%arg0: i32) -> (i32, i32, i32) {
    %c0_i32 = arith.constant 0 : i32
    %c0_i32_0 = arith.constant 0 : i32
    %c0_i32_1 = arith.constant 0 : i32
    %c0_i32_2 = arith.constant 0 : i32
    return %c0_i32, %c0_i32_0, %c0_i32_1 : i32, i32, i32
  }
  func.func @transform_3(%arg0: i32) -> (i32, i32) {
    %c0_i32 = arith.constant 0 : i32
    %c0_i32_0 = arith.constant 0 : i32
    %c0_i32_1 = arith.constant 0 : i32
    return %c0_i32, %c0_i32_0 : i32, i32
  }
  func.func @transform_4(%arg0: i32) -> (i32, i32) {
    %c0_i32 = arith.constant 0 : i32
    %c0_i32_0 = arith.constant 0 : i32
    %c0_i32_1 = arith.constant 0 : i32
    return %c0_i32, %c0_i32_0 : i32, i32
  }
  func.func @transform_5(%arg0: i32) -> (i32, i32) {
    %c0_i32 = arith.constant 0 : i32
    %c0_i32_0 = arith.constant 0 : i32
    %c0_i32_1 = arith.constant 0 : i32
    return %c0_i32, %c0_i32_0 : i32, i32
  }
  func.func @transform_6(%arg0: i32) -> (i32, i32) {
    %c0_i32 = arith.constant 0 : i32
    %c0_i32_0 = arith.constant 0 : i32
    %c0_i32_1 = arith.constant 0 : i32
    return %c0_i32, %c0_i32_0 : i32, i32
  }
  func.func @transform_7(%arg0: i32) -> (i32, i32) {
    %c0_i32 = arith.constant 0 : i32
    %c0_i32_0 = arith.constant 0 : i32
    %c0_i32_1 = arith.constant 0 : i32
    return %c0_i32, %c0_i32_0 : i32, i32
  }
  func.func @transform_8(%arg0: i32) -> (i32, i32) {
    %c0_i32 = arith.constant 0 : i32
    %c0_i32_0 = arith.constant 0 : i32
    %c0_i32_1 = arith.constant 0 : i32
    return %c0_i32, %c0_i32_0 : i32, i32
  }
  func.func @transform_9(%arg0: i32) -> (i32, i32) {
    %c0_i32 = arith.constant 0 : i32
    %c0_i32_0 = arith.constant 0 : i32
    %c0_i32_1 = arith.constant 0 : i32
    return %c0_i32, %c0_i32_0 : i32, i32
  }
  func.func @transform_10(%arg0: i32) -> (i32, i32, i32) {
    %c0_i32 = arith.constant 0 : i32
    %c0_i32_0 = arith.constant 0 : i32
    %c0_i32_1 = arith.constant 0 : i32
    return %c0_i32, %arg0, %c0_i32_0 : i32, i32, i32
  }
}

</mosaic_0001>

<bundles_post_ra>
// kernel: tpu_custom_call.1
= control target key start
LH: loop header
LB: loop body
LE: loop exit
PB: predicated region body
PF: predicated region fallthrough
CT: control target
= control target key end

     0   :  { %s10328_s0 = inlined_call_operand.hbm [shape: f32[2,256,128], index: 0, kind: input, shape index: {}]   ;;  %s10329_s1 = inlined_call_operand.vmem [shape: bf16[2,16,128], index: 1, kind: input, shape index: {}]   ;;  %s10330_s2 = inlined_call_operand.hbm [shape: bf16[2,16,128], index: 2, kind: input, shape index: {}]   ;;  %s10331_s3 = inlined_call_operand.vmem [shape: bf16[128,256], index: 3, kind: input, shape index: {}]   ;;  %s10332_s4 = inlined_call_operand.hbm [shape: bf16[128,128], index: 4, kind: input, shape index: {}]   ;;  %s10333_s5 = inlined_call_operand.hbm [shape: f32[128,128], index: 5, kind: input, shape index: {}]   ;;  %s10334_s6 = inlined_call_operand.hbm [shape: f32[128,128], index: 6, kind: input, shape index: {}]   ;;  %s10335_s7 = inlined_call_operand.hbm [shape: f32[128,128], index: 7, kind: input, shape index: {}]   ;;  %s10336_s8 = inlined_call_operand.vmem [shape: f32[128,16], index: 8, kind: input, shape index: {}]   ;;  %s10337_s9 = inlined_call_operand.vmem [shape: f32[1,128], index: 9, kind: input, shape index: {}]   ;;  %s10338_s10 = inlined_call_operand.hbm [shape: f32[2,256,128], index: 10, kind: output, shape index: {}]  }
   0x1   :  { %10435 = sst [smem:[#allocation83_spill]] %s10329_s1 }
   0x2   :  { %10436 = sst [smem:[#allocation84_spill]] %s10330_s2 }
   0x3   :  { %10437 = sst [smem:[#allocation85_spill]] %s10336_s8 }
   0x4   :  { %10438 = sst [smem:[#allocation86_spill]] %s10337_s9 }
   0x5   :  { %10439 = sst [smem:[#allocation87_spill]] %s10338_s10 }
   0x6   :  { %15 = vsyncpa [#allocation4], 0 }
   0x7   :  { %17 = vsyncpa [#allocation4 + $0x1], 0 }
   0x8   :  { %18 = vsyncpa [#allocation7], 0 }
   0x9   :  { %19 = vsyncpa [#allocation10], 0 }
   0xa   :  { %20 = vsyncpa [#allocation13], 0 }
   0xb   :  { %21 = vsyncpa [#allocation5], 0 }
   0xc   :  { %23 = vsyncpa [#allocation5 + $0x1], 0  ;;  %s7104_s13 = smov 0   ;;  %s7106_s14 = smov 0  }
   0xd   :  { %s7108_s15 = smov 0   ;;  %s7110_s16 = smov 0  }
   0xe LB: > { %10440 = sst [smem:[#allocation25_spill]] %s7009_s13  ;;  %s7125_s17 = sadd.s32 4294967295, %s7021_s16   ;;  %s7021_s16 = sphi %s7110_s16, %s10646_s16   ;;  %s7017_s15 = sphi %s7108_s15, %s10650_s15   ;;  %s7013_s14 = sphi %s7106_s14, %s10649_s14   ;;  %s7009_s13 = sphi %s7104_s13, %s10648_s13  }
   0xf   : > { %s5397_s18 = sadd.s32 4294967294, %s7021_s16   ;;  %s7129_s19 = sadd.s32 1, %s7021_s16  }
  0x10   : > { %10441 = sst [smem:[#allocation26_spill]] %s7129_s19  ;;  %s36_s20 = sadd.s32 1, %s7017_s15 }
  0x11   : > { %s33_s21 = ssub.s32 %s7021_s16, %s7129_s19  ;;  %p43_p0 = scmp.ne.s32.totalorder %s7017_s15, %s7013_s14 }
  0x12   : > { %p34_p1 = scmp.eq.s32.totalorder %s33_s21, 0  ;;  %p44_p2 = scmp.eq.s32.totalorder %s7021_s16, 0 }
  0x13   : > { %p49_p3 = scmp.ne.s32.totalorder %s7013_s14, %s7009_s13  ;;  %p10342_p4 = scmp.eq.s32.totalorder %s7125_s17, 0 }
  0x14   : > { %s7141_s22 = scalar_select %p34_p1, %s7017_s15, %s36_s20  }
  0x15   : > { %p7143_p5 = por %p44_p2, %p43_p0  ;;  %p7149_p6 = por %p10342_p4, %p49_p3 }
  0x16   : > { %10442 = sst [smem:[#allocation27_spill]] %s7141_s22  ;;  %p262_p7 = scmp.eq.s32.totalorder %s7125_s17, 1 }
  0x17   : > { %s10443_s23 = scalar_select %p7143_p5, 1, 0 }
  0x18   : > { %s10444_s24 = scalar_select %p7149_p6, 1, 0 }
  0x19   : > { %p268_p8 = scmp.eq.s32.totalorder %s5397_s18, 1  ;;  %p5398_p9 = scmp.ge.s32.totalorder %s7021_s16, 1 }
  0x1a   : > { %p275_p10 = scmp.lt.s32.totalorder %s7021_s16, 3  ;;  %p7156_p11 = por %p262_p7, %p43_p0 }
  0x1b   : > { %p7160_p12 = por %p268_p8, %p49_p3  ;;  %s7023_s28 = smov [#allocation6]  }
  0x1c   : > { %s10445_s25 = scalar_select %p7156_p11, 1, 0 }
  0x1d   : > { %s10447_s26 = scalar_select %p7160_p12, 1, 0 }
  0x1e   : > { %10446 = sst [smem:[#allocation28_spill]] %s10445_s25  ;;  %p7164_p13 = pnand %p5398_p9, %p275_p10 }
  0x1f   : > { %10448 = sst [smem:[#allocation29_spill]] %s10447_s26  ;;  %s290_s29 = sshll.u32 %s7023_s28, 4  ;;  %s291_s29 = int_to_ptr.vmem [resolvable:$true] %s290_s29 }
  0x20   : > { %s10449_s27 = scalar_select %p7164_p13, 1, 0 }
  0x21   : > { %p6134_p1 = pneg %p7164_p13  ;;  %s7024_s11 = smov [#allocation9]  }
  0x22   : > { %s319_s12 = sshll.u32 %s7024_s11, 4  ;;  %s10451_s2 = sld [smem:[#allocation84_spill]]  ;;  %s7176_s12 = int_to_ptr.vmem [resolvable:$true] %s319_s12 }
  0x23   : > { %p7172_p2 = pnand %p6134_p1, %p10342_p4 }
  0x25   : > { %p7186_p3 = pneg %p7172_p2 }
  0x28   : > { %s6831_s21 = scalar_lea.hbm %s10451_s2, 256 }
  0x29   : > { %p6832_p0 = scmp.ne.s32.totalorder %s10451_s2, %s6831_s21  ;;  %p6838_p9 = scmp.lt.u32.totalorder %s6831_s21, %s10451_s2 }
  0x2b   : > { %p6834_p7 = pnand %p7186_p3, %p6832_p0 }
  0x2d   : > { %p6835_p8 = pneg %p6834_p7 }
  0x2f   : > { %p6840_p10 = pnand %p6838_p9, %p6835_p8 }
  0x31   : > { %6843 = shalt.err (!%p6840_p10)
}
  0x32   : > { %s6844_s18 = scalar_lea.vmem %s291_s29, 256  ;;  %p6852_p11 = scmp.lt.s32.totalorder %s291_s29, %s291_s29 }
  0x33   : > { %p6845_p1 = scmp.ne.s32.totalorder %s291_s29, %s6844_s18  ;;  %p6853_p6 = scmp.lt.s32.totalorder %s6844_s18, %s6844_s18 }
  0x35   : > { %p6847_p4 = pnand %p6845_p1, %p7186_p3  ;;  %p6854_p13 = por %p6853_p6, %p6852_p11 }
  0x37   : > { %p6848_p12 = pneg %p6847_p4 }
  0x39   : > { %p6855_p5 = pnand %p6854_p13, %p6848_p12 }
  0x3b   : > { %6858 = shalt.err (!%p6855_p5)
}
  0x3c   : > { %s10350_s19 = smov 64   ;;  %s10351_s22 = smov 4  }
  0x3d   : > { %6137 = dma.hbm_to_vmem [thread:$0]  (!%p7172_p2), %s10451_s2, 256, %s291_s29, [#allocation7], %s10350_s19, %s10350_s19, %s10351_s22  }
  0x3e   : > { %s6859_s13 = scalar_lea.hbm %s10333_s5, 2048 }
  0x3f   : > { %p6860_p4 = scmp.ne.s32.totalorder %s10333_s5, %s6859_s13  ;;  %p6866_p11 = scmp.lt.u32.totalorder %s6859_s13, %s10333_s5 }
  0x41   : > { %p6862_p5 = pnand %p6860_p4, %p7186_p3 }
  0x43   : > { %p6863_p6 = pneg %p6862_p5 }
  0x45   : > { %p6868_p12 = pnand %p6866_p11, %p6863_p6 }
  0x47   : > { %6871 = shalt.err (!%p6868_p12)
}
  0x48   : > { %s6872_s29 = scalar_lea.vmem %s7176_s12, 2048  ;;  %p6880_p8 = scmp.lt.s32.totalorder %s7176_s12, %s7176_s12 }
  0x49   : > { %p6873_p13 = scmp.ne.s32.totalorder %s7176_s12, %s6872_s29  ;;  %p6881_p9 = scmp.lt.s32.totalorder %s6872_s29, %s6872_s29 }
  0x4b   : > { %p6875_p0 = pnand %p6873_p13, %p7186_p3  ;;  %p6882_p10 = por %p6881_p9, %p6880_p8 }
  0x4d   : > { %p6876_p7 = pneg %p6875_p0 }
  0x4f   : > { %p6883_p1 = pnand %p6882_p10, %p6876_p7 }
  0x51   : > { %6886 = shalt.err (!%p6883_p1)
}
  0x52   : > { %s7027_s10 = smov 128   ;;  %s7028_s9 = smov 8  }
  0x53   : > { %6143 = dma.hbm_to_vmem [thread:$0]  (!%p7172_p2), %s10333_s5, 2048, %s7176_s12, [#allocation10], %s7027_s10, %s7027_s10, %s7028_s9  }
  0x54   : > { %s7029_s26 = smov [#allocation8]   ;;  %s7030_s21 = smov [#allocation11]  }
  0x55   : > { %s306_s20 = sshll.u32 %s7029_s26, 4  ;;  %s332_s11 = sshll.u32 %s7030_s21, 4  ;;  %s307_s20 = int_to_ptr.vmem [resolvable:$true] %s306_s20  ;;  %s333_s11 = int_to_ptr.vmem [resolvable:$true] %s332_s11 }
  0x56   : > { %s6887_s19 = scalar_lea.hbm %s10332_s4, 1024 }
  0x57   : > { %p6888_p4 = scmp.ne.s32.totalorder %s10332_s4, %s6887_s19  ;;  %p6894_p11 = scmp.lt.u32.totalorder %s6887_s19, %s10332_s4 }
  0x59   : > { %p6890_p5 = pnand %p6888_p4, %p7186_p3 }
  0x5b   : > { %p6891_p6 = pneg %p6890_p5 }
  0x5d   : > { %p6896_p12 = pnand %p6894_p11, %p6891_p6 }
  0x5f   : > { %6899 = shalt.err (!%p6896_p12)
}
  0x60   : > { %s6900_s12 = scalar_lea.vmem %s307_s20, 1024  ;;  %p6908_p8 = scmp.lt.s32.totalorder %s307_s20, %s307_s20 }
  0x61   : > { %p6901_p13 = scmp.ne.s32.totalorder %s307_s20, %s6900_s12  ;;  %p6909_p9 = scmp.lt.s32.totalorder %s6900_s12, %s6900_s12 }
  0x63   : > { %p6903_p0 = pnand %p6901_p13, %p7186_p3  ;;  %p6910_p10 = por %p6909_p9, %p6908_p8 }
  0x65   : > { %p6904_p7 = pneg %p6903_p0 }
  0x67   : > { %p6911_p1 = pnand %p6910_p10, %p6904_p7 }
  0x69   : > { %6914 = shalt.err (!%p6911_p1)
}
  0x6a   : > { %s10453_s2 = smov 4   ;;  %s10454_s22 = smov 64  }
  0x6b   : > { %6140 = dma.hbm_to_vmem [thread:$0]  (!%p7172_p2), %s10332_s4, 1024, %s307_s20, [#allocation7], %s10454_s22, %s10454_s22, %s10453_s2  }
  0x6c   : > { %s6915_s25 = scalar_lea.hbm %s10334_s6, 2048 }
  0x6d   : > { %p6916_p4 = scmp.ne.s32.totalorder %s10334_s6, %s6915_s25  ;;  %p6922_p11 = scmp.lt.u32.totalorder %s6915_s25, %s10334_s6 }
  0x6f   : > { %p6918_p5 = pnand %p6916_p4, %p7186_p3 }
  0x71   : > { %p6919_p6 = pneg %p6918_p5 }
  0x73   : > { %p6924_p12 = pnand %p6922_p11, %p6919_p6 }
  0x75   : > { %6927 = shalt.err (!%p6924_p12)
}
  0x76   : > { %s6928_s12 = scalar_lea.vmem %s333_s11, 2048  ;;  %p6936_p8 = scmp.lt.s32.totalorder %s333_s11, %s333_s11 }
  0x77   : > { %p6929_p13 = scmp.ne.s32.totalorder %s333_s11, %s6928_s12  ;;  %p6937_p9 = scmp.lt.s32.totalorder %s6928_s12, %s6928_s12 }
  0x79   : > { %p6931_p0 = pnand %p6929_p13, %p7186_p3  ;;  %p6938_p10 = por %p6937_p9, %p6936_p8 }
  0x7b   : > { %p6932_p7 = pneg %p6931_p0 }
  0x7d   : > { %p6939_p1 = pnand %p6938_p10, %p6932_p7 }
  0x7f   : > { %6942 = shalt.err (!%p6939_p1)
}
  0x80   : > { %6146 = dma.hbm_to_vmem [thread:$0]  (!%p7172_p2), %s10334_s6, 2048, %s333_s11, [#allocation10], %s7027_s10, %s7027_s10, %s7028_s9  }
  0x81   : > { %s7031_s22 = smov [#allocation12]   ;;  %s6943_s13 = scalar_lea.hbm %s10335_s7, 2048 }
  0x82   : > { %s345_s1 = sshll.u32 %s7031_s22, 4  ;;  %p6944_p4 = scmp.ne.s32.totalorder %s10335_s7, %s6943_s13  ;;  %s346_s1 = int_to_ptr.vmem [resolvable:$true] %s345_s1 }
  0x83   : > { %p6950_p11 = scmp.lt.u32.totalorder %s6943_s13, %s10335_s7 }
  0x84   : > { %p6946_p5 = pnand %p6944_p4, %p7186_p3 }
  0x86   : > { %p6947_p6 = pneg %p6946_p5 }
  0x88   : > { %p6952_p12 = pnand %p6950_p11, %p6947_p6 }
  0x8a   : > { %6955 = shalt.err (!%p6952_p12)
}
  0x8b   : > { %s6956_s11 = scalar_lea.vmem %s346_s1, 2048  ;;  %p6964_p8 = scmp.lt.s32.totalorder %s346_s1, %s346_s1 }
  0x8c   : > { %p6957_p13 = scmp.ne.s32.totalorder %s346_s1, %s6956_s11  ;;  %p6965_p9 = scmp.lt.s32.totalorder %s6956_s11, %s6956_s11 }
  0x8e   : > { %p6959_p0 = pnand %p6957_p13, %p7186_p3  ;;  %p6966_p10 = por %p6965_p9, %p6964_p8 }
  0x90   : > { %p6960_p7 = pneg %p6959_p0 }
  0x92   : > { %p6967_p1 = pnand %p6966_p10, %p6960_p7 }
  0x94   : > { %6970 = shalt.err (!%p6967_p1)
}
  0x95   : > { %6149 = dma.hbm_to_vmem [thread:$0]  (!%p7172_p2), %s10335_s7, 2048, %s346_s1, [#allocation13], %s7027_s10, %s7027_s10, %s7028_s9  }
  0x96   : > { %p5404_p4 = scmp.ge.s32.totalorder %s7021_s16, 2 }
  0x98   : > { %361 = sbr.rel (%p5404_p4) target bundleno = 174 (0xae), region = 52 }
  0x9f   : > { %s365_s28 = sand.u32 1, %s7017_s15   ;;  %s5580_s30 = sshll.u32 %s7021_s16, 11 }
  0xa0   : > { %s5405_s20 = sshll.u32 %s365_s28, 8  ;;  %s375_s10 = scalar_lea.hbm %s10328_s0, %s5580_s30 }
  0xa1   : > { %p10455_p2 = scmp.ne.s32.totalorder %s10443_s23, 0  ;;  %s369_s1 = scalar_lea.vmem [#allocation3], %s5405_s20 }
  0xa2   : > { %s388_s8 = sshll.u32 %s369_s1, 4  ;;  %s7032_s13 = smov 4096   ;;  %s389_s8 = int_to_ptr.vmem [resolvable:$true] %s388_s8 }
  0xa3   : > { %s6107_s9 = scalar_select %p10455_p2, [#allocation0], [#allocation19] }
  0xa4   : > { %6108 = sst [smem:[#allocation16]] (%p10455_p2), %s7032_s13  ;;  %s7033_s25 = smov 2048  }
  0xa5   : > { %s380_s19 = sld [smem:[%s6107_s9]]   ;;  %s7034_s26 = smov 16  }
  0xa6   : > { %6109 = sst [smem:[#allocation16 + $0x1]] (%p10455_p2), %s7033_s25  ;;  %s7035_s21 = smov 128  }
  0xa7   : > { %6110 = sst [smem:[#allocation16 + $0x2]] (%p10455_p2), %s7034_s26  ;;  %s7036_s11 = smov 8  }
  0xa8   : > { %6111 = sst [smem:[#allocation16 + $0x3]] (%p10455_p2), %s7035_s21  ;;  %s366_s12 = scalar_lea.sflag [#allocation4], %s365_s28 }
  0xa9   : > { %6112 = sst [smem:[#allocation16 + $0x4]] (%p10455_p2), %s7035_s21  ;;  %s7037_s30 = smov [#allocation15]  }
  0xaa   : > { %6113 = sst [smem:[#allocation16 + $0x5]] (%p10455_p2), %s7036_s11 }
  0xab   : > { %s5408_s18 = sshll.u32 %s380_s19, 26 }
  0xac   : > { %s5409_s29 = sadd.s32 134217728, %s5408_s18 }
  0xad   : > { %6114 = dma.general (%p10455_p2), %s375_s10, 4096, %s389_s8, %s366_s12, %s7037_s30, [#allocation16], %s5409_s29, 0  }
  0xae PF: > { %p10456_p3 = scmp.ne.s32.totalorder %s10449_s27, 0 }
  0xb0   : > { %413 = sbr.rel (%p10456_p3) target bundleno = 3940 (0xf64), region = 60 }
  0xb7   : > { %s7321_s20 = sand.u32 1, %s7013_s14   ;;  %p10457_p5 = scmp.ne.s32.totalorder %s10444_s24, 0 }
  0xb8   : > { %s5411_s2 = sshll.u32 %s7321_s20, 8  ;;  %s416_s22 = scalar_lea.sflag [#allocation4], %s7321_s20 }
  0xb9   : > { %s7327_s9 = scalar_lea.vmem [#allocation3], %s5411_s2 }
  0xba   : > { %6988 = dma.done.wait (%p10457_p5), %s416_s22, 4096  }
  0xbb   : > { %6990 = vsyncadd (%p10457_p5), %s416_s22, 4294963200  ;;  %p10458_p6 = scmp.eq.s32.totalorder %s7125_s17, 0 }
  0xbd   : > { %6992 = dma.done.wait (%p10458_p6), [#allocation7], 1280   ;;  %p10459_p11 = pmov %p10458_p6 }
  0xbe   : > { %p10460_p12 = pmov %p10458_p6 }
  0xbf   : > { %6994 = vsyncadd (%p10459_p11), [#allocation7], 4294966016 }
  0xc0   : > { %6996 = dma.done.wait (%p10460_p12), [#allocation10], 4096   ;;  %p10461_p13 = pmov %p10458_p6 }
  0xc1   : > { %p10462_p0 = pmov %p10458_p6 }
  0xc2   : > { %6998 = vsyncadd (%p10461_p13), [#allocation10], 4294963200 }
  0xc3   : > { %7000 = dma.done.wait (%p10462_p0), [#allocation13], 2048   ;;  %p10463_p7 = pmov %p10462_p0 }
  0xc4   : > { %v7038_v0 = vmov 0   ;;  %v6223_v1 = vld [vmem:[%s10331_s3 + $0x4] ss:$8 sps:$4 sm:$0xff]   ;;  %v6225_v2 = vld [vmem:[%s10331_s3] ss:$8 sps:$4 sm:$0xff]   ;;  %s10464_s30 = sld [smem:[#allocation83_spill]] }
  0xc5   : > { %7002 = vsyncadd (%p10463_p7), [#allocation13], 4294965248  ;;  %655 = vmatprep.mubr.bf16.mxu0 %v7038_v0  ;;  %623 = vmatprep.subr.bf16.mxu0 %v6223_v1  ;;  %v6226_v3 = vld [vmem:[%s10331_s3 + $0x14] ss:$8 sps:$4 sm:$0xff]   ;;  %v6228_v4 = vld [vmem:[%s10331_s3 + $0x10] ss:$8 sps:$4 sm:$0xff]  }
  0xc6   : > { %624 = vmatpush1.bf16.msra.mxu0 %v6225_v2  ;;  %v6229_v5 = vld [vmem:[%s10331_s3 + $0x24] ss:$8 sps:$4 sm:$0xff]   ;;  %v6231_v6 = vld [vmem:[%s10331_s3 + $0x20] ss:$8 sps:$4 sm:$0xff]   ;;  %v6232_v7 = vld [vmem:[%s10331_s3 + $0x34] ss:$8 sps:$4 sm:$0xff]  }
  0xc7   : > { %625 = vmatprep.subr.bf16.mxu0 %v6226_v3  ;;  %v6234_v8 = vld [vmem:[%s10331_s3 + $0x30] ss:$8 sps:$4 sm:$0xff]   ;;  %v6235_v9 = vld [vmem:[%s10331_s3 + $0x44] ss:$8 sps:$4 sm:$0xff]   ;;  %v6237_v10 = vld [vmem:[%s10331_s3 + $0x40] ss:$8 sps:$4 sm:$0xff]  }
  0xc8   : > { %v6238_v11 = vld [vmem:[%s10331_s3 + $0x54] ss:$8 sps:$4 sm:$0xff]   ;;  %v6240_v12 = vld [vmem:[%s10331_s3 + $0x50] ss:$8 sps:$4 sm:$0xff]   ;;  %v6241_v13 = vld [vmem:[%s10331_s3 + $0x64] ss:$8 sps:$4 sm:$0xff]  }
  0xc9   : > { %v6243_v14 = vld [vmem:[%s10331_s3 + $0x60] ss:$8 sps:$4 sm:$0xff]   ;;  %v6244_v15 = vld [vmem:[%s10331_s3 + $0x74] ss:$8 sps:$4 sm:$0xff]   ;;  %v6246_v16 = vld [vmem:[%s10331_s3 + $0x70] ss:$8 sps:$4 sm:$0xff]  }
  0xca   : > { %626 = vmatpush1.bf16.msra.mxu0 %v6228_v4  ;;  %v479_v17 = vld [vmem:[%s7327_s9] sm:$0xff]  ;;  %v480_v18 = vld [vmem:[%s7327_s9 + $0x8] sm:$0xff]  ;;  %vm1037_vm0 = vcmask 261120   ;;  %v481_v22 = vld [vmem:[%s7327_s9 + $0x10] sm:$0xff]  ;;  %s10481_s27 = sld [smem:[#allocation85_spill]]  ;;  %vm1291_vm1 = vcmask 130048  }
  0xcb   : > { %627 = vmatprep.subr.bf16.mxu0 %v6229_v5  ;;  %v6247_v19 = vld [vmem:[%s10464_s30] sm:$0xff]   ;;  %v511_v21 = vpack.c.bf16 %v480_v18, %v479_v17  ;;  %v482_v23 = vld [vmem:[%s7327_s9 + $0x18] sm:$0xff]  ;;  %v484_v26 = vld [vmem:[%s7327_s9 + $0x28] sm:$0xff]  ;;  %s7039_s22 = smov 96   ;;  %s7040_s10 = smov 64   ;;  %vm2942_vm2 = vcmask 523520  }
  0xcc   : > { %v1063_v20 = vsel %vm1037_vm0, %v6247_v19, 0  ;;  %6089 = vmatprep.subr.msk.bf16.mxu1 %vm1037_vm0, %v6247_v19  ;;  %v512_v24 = vpack.c.bf16 %v482_v23, %v481_v22  ;;  %v483_v25 = vld [vmem:[%s7327_s9 + $0x20] sm:$0xff]  ;;  %v485_v28 = vld [vmem:[%s7327_s9 + $0x30] sm:$0xff]  ;;  %v486_v29 = vld [vmem:[%s7327_s9 + $0x38] sm:$0xff]  ;;  %s7041_s21 = smov 32   ;;  %vm3939_vm3 = vcmask 785920  }
  0xcd   : > { %6087 = vmatpush3.bf16.xpose.msra.mxu1 %v1063_v20  ;;  %v513_v27 = vpack.c.bf16 %v484_v26, %v483_v25  ;;  %v514_v30 = vpack.c.bf16 %v486_v29, %v485_v28  ;;  %v487_v31 = vld [vmem:[%s7327_s9 + $0x40] sm:$0xff]  ;;  %v488_v32 = vld [vmem:[%s7327_s9 + $0x48] sm:$0xff]  ;;  %v489_v34 = vld [vmem:[%s7327_s9 + $0x50] sm:$0xff]  ;;  %vm4936_vm4 = vcmask 1048320   ;;  %s10226_s1 = scalar_lea.vmem [#allocation14], %s5411_s2  ;;  %s5234_s2 = scalar_lea.sflag [#allocation5], %s7321_s20 }
  0xce   : > { %628 = vmatpush1.bf16.msra.mxu0 %v6231_v6  ;;  %v515_v33 = vpack.c.bf16 %v488_v32, %v487_v31  ;;  %v490_v35 = vld [vmem:[%s7327_s9 + $0x58] sm:$0xff]  ;;  %v491_v37 = vld [vmem:[%s7327_s9 + $0x60] sm:$0xff]  ;;  %v492_v38 = vld [vmem:[%s7327_s9 + $0x68] sm:$0xff] }
  0xcf   : > { %629 = vmatprep.subr.bf16.mxu0 %v6232_v7  ;;  %v516_v36 = vpack.c.bf16 %v490_v35, %v489_v34  ;;  %v517_v39 = vpack.c.bf16 %v492_v38, %v491_v37  ;;  %v493_v40 = vld [vmem:[%s7327_s9 + $0x70] sm:$0xff]  ;;  %v494_v41 = vld [vmem:[%s7327_s9 + $0x78] sm:$0xff]  ;;  %v495_v43 = vld [vmem:[%s7327_s9 + $0x80] sm:$0xff] }
  0xd0   : > { %v518_v42 = vpack.c.bf16 %v494_v41, %v493_v40  ;;  %v496_v44 = vld [vmem:[%s7327_s9 + $0x88] sm:$0xff]  ;;  %v497_v46 = vld [vmem:[%s7327_s9 + $0x90] sm:$0xff]  ;;  %v498_v47 = vld [vmem:[%s7327_s9 + $0x98] sm:$0xff] }
  0xd1   : > { %v519_v45 = vpack.c.bf16 %v496_v44, %v495_v43  ;;  %v520_v48 = vpack.c.bf16 %v498_v47, %v497_v46  ;;  %v499_v49 = vld [vmem:[%s7327_s9 + $0xa0] sm:$0xff]  ;;  %v500_v50 = vld [vmem:[%s7327_s9 + $0xa8] sm:$0xff]  ;;  %v501_v52 = vld [vmem:[%s7327_s9 + $0xb0] sm:$0xff] }
  0xd2   : > { %630 = vmatpush1.bf16.msra.mxu0 %v6234_v8  ;;  %v521_v51 = vpack.c.bf16 %v500_v50, %v499_v49  ;;  %v502_v53 = vld [vmem:[%s7327_s9 + $0xb8] sm:$0xff]  ;;  %v503_v55 = vld [vmem:[%s7327_s9 + $0xc0] sm:$0xff]  ;;  %v504_v56 = vld [vmem:[%s7327_s9 + $0xc8] sm:$0xff] }
  0xd3   : > { %631 = vmatprep.subr.bf16.mxu0 %v6235_v9  ;;  %v522_v54 = vpack.c.bf16 %v502_v53, %v501_v52  ;;  %v523_v57 = vpack.c.bf16 %v504_v56, %v503_v55  ;;  %v505_v58 = vld [vmem:[%s7327_s9 + $0xd0] sm:$0xff]  ;;  %v506_v59 = vld [vmem:[%s7327_s9 + $0xd8] sm:$0xff]  ;;  %v507_v61 = vld [vmem:[%s7327_s9 + $0xe0] sm:$0xff] }
  0xd4   : > { %v524_v60 = vpack.c.bf16 %v506_v59, %v505_v58  ;;  %v508_v62 = vld [vmem:[%s7327_s9 + $0xe8] sm:$0xff]  ;;  %v509_v1 = vld [vmem:[%s7327_s9 + $0xf0] sm:$0xff]  ;;  %v510_v2 = vld [vmem:[%s7327_s9 + $0xf8] sm:$0xff] }
  0xd5   : > { %v525_v63 = vpack.c.bf16 %v508_v62, %v507_v61  ;;  %v526_v3 = vpack.c.bf16 %v510_v2, %v509_v1  ;;  %v7450_v4 = vld [vmem:[%s10464_s30 + $0x8] sm:$0xff]   ;;  %v7454_v5 = vld [vmem:[#allocation9] sm:$0xff]  ;;  %v7458_v8 = vld [vmem:[#allocation9 + $0x8] sm:$0xff] }
  0xd6   : > { %632 = vmatpush1.bf16.msra.mxu0 %v6237_v10  ;;  %6090 = vmatprep.subr.msk.bf16.mxu1 %vm1037_vm0, %v7450_v4  ;;  %v7456_v6 = vld [vmem:[#allocation11] sm:$0xff]  ;;  %v7461_v10 = vld [vmem:[#allocation11 + $0x8] sm:$0xff]  ;;  %v7476_v25 = vld [vmem:[#allocation9 + $0x18] sm:$0xff] }
  0xd7   : > { %633 = vmatprep.subr.bf16.mxu0 %v6238_v11  ;;  %v7466_v17 = vld [vmem:[#allocation12] sm:$0xff]  ;;  %v7468_v18 = vld [vmem:[#allocation12 + $0x8] sm:$0xff]  ;;  %v7479_v28 = vld [vmem:[#allocation11 + $0x18] sm:$0xff] }
  0xd8   : > { %v7490_v37 = vld [vmem:[#allocation12 + $0x18] sm:$0xff]  ;;  %v7494_v40 = vld [vmem:[#allocation11 + $0x20] sm:$0xff]  ;;  %v7498_v44 = vld [vmem:[#allocation9 + $0x28] sm:$0xff] }
  0xd9   : > { %v7501_v47 = vld [vmem:[#allocation11 + $0x28] sm:$0xff]  ;;  %v7510_v55 = vld [vmem:[#allocation12 + $0x20] sm:$0xff]  ;;  %v7514_v58 = vld [vmem:[#allocation9 + $0x30] sm:$0xff] }
  0xda   : > { %634 = vmatpush1.bf16.msra.mxu0 %v6240_v12  ;;  %v7512_v56 = vld [vmem:[#allocation12 + $0x28] sm:$0xff]  ;;  %v7516_v59 = vld [vmem:[#allocation11 + $0x30] sm:$0xff] }
  0xdb   : > { %635 = vmatprep.subr.bf16.mxu0 %v6241_v13 }
  0xde   : > { %636 = vmatpush1.bf16.msra.mxu0 %v6243_v14 }
  0xdf   : > { %637 = vmatprep.subr.bf16.mxu0 %v6244_v15 }
  0xe2   : > { %638 = vmatpush1.bf16.msra.mxu0 %v6246_v16 }
  0xe3   : > { %6088 = vmatprep.subr.msk.bf16.mxu0 %vm1037_vm0, %v6247_v19 }
  0xe5   : > { %656 = vmatmul.mubr.bf16.vlgmr.msra.gmra.mrb[0].mxu0 %v511_v21  ;;  %v7472_v21 = vld [vmem:[#allocation11 + $0x10] sm:$0xff] }
  0xe6   : > { %665 = vmatprep.mubr.bf16.mxu0 %v7038_v0 }
  0xeb   : > { %5751 = vmatpush3.bf16.xpose.msra.mxu0 %v1063_v20  ;;  %v7470_v20 = vld [vmem:[#allocation9 + $0x10] sm:$0xff] }
  0xed   : > { %666 = vmatmul.mubr.bf16.gmra.mrb[4].mxu0 %v512_v24 }
  0xee   : > { %675 = vmatprep.mubr.bf16.mxu0 %v7038_v0 }
  0xf5   : > { %676 = vmatmul.mubr.bf16.gmra.mrb[8].mxu0 %v513_v27 }
  0xf6   : > { %685 = vmatprep.mubr.bf16.mxu0 %v7038_v0 }
  0xfd   : > { %686 = vmatmul.mubr.bf16.gmra.mrb[12].mxu0 %v514_v30 }
  0xfe   : > { %695 = vmatprep.mubr.bf16.mxu0 %v7038_v0 }
 0x105   : > { %696 = vmatmul.mubr.bf16.gmra.mrb[16].mxu0 %v515_v33 }
 0x106   : > { %705 = vmatprep.mubr.bf16.mxu0 %v7038_v0 }
 0x10d   : > { %706 = vmatmul.mubr.bf16.gmra.mrb[20].mxu0 %v516_v36  ;;  %v7488_v36 = vld [vmem:[#allocation12 + $0x10] sm:$0xff] }
 0x10e   : > { %715 = vmatprep.mubr.bf16.mxu0 %v7038_v0 }
 0x115   : > { %716 = vmatmul.mubr.bf16.gmra.mrb[24].mxu0 %v517_v39  ;;  %v7492_v39 = vld [vmem:[#allocation9 + $0x20] sm:$0xff] }
 0x116   : > { %725 = vmatprep.mubr.bf16.mxu0 %v7038_v0 }
 0x11d   : > { %726 = vmatmul.mubr.bf16.gmra.mrb[28].mxu0 %v518_v42 }
 0x11e   : > { %735 = vmatprep.mubr.bf16.mxu0 %v7038_v0 }
 0x125   : > { %736 = vmatmul.mubr.bf16.gmra.mrb[32].mxu0 %v519_v45 }
 0x126   : > { %745 = vmatprep.mubr.bf16.mxu0 %v7038_v0 }
 0x12d   : > { %746 = vmatmul.mubr.bf16.gmra.mrb[36].mxu0 %v520_v48 }
 0x12e   : > { %755 = vmatprep.mubr.bf16.mxu0 %v7038_v0 }
 0x135   : > { %756 = vmatmul.mubr.bf16.gmra.mrb[40].mxu0 %v521_v51 }
 0x136   : > { %765 = vmatprep.mubr.bf16.mxu0 %v7038_v0 }
 0x13d   : > { %766 = vmatmul.mubr.bf16.gmra.mrb[44].mxu0 %v522_v54 }
 0x13e   : > { %775 = vmatprep.mubr.bf16.mxu0 %v7038_v0 }
 0x145   : > { %776 = vmatmul.mubr.bf16.gmra.mrb[48].mxu0 %v523_v57 }
 0x146   : > { %785 = vmatprep.mubr.bf16.mxu0 %v7038_v0 }
 0x14d   : > { %786 = vmatmul.mubr.bf16.gmra.mrb[52].mxu0 %v524_v60 }
 0x14e   : > { %795 = vmatprep.mubr.bf16.mxu0 %v7038_v0 }
 0x155   : > { %796 = vmatmul.mubr.bf16.gmra.mrb[56].mxu0 %v525_v63  ;;  %v7520_v63 = vld [vmem:[#allocation9 + $0x38] sm:$0xff] }
 0x156   : > { %805 = vmatprep.mubr.bf16.mxu0 %v7038_v0 }
 0x15d   : > { %806 = vmatmul.mubr.bf16.gmra.mrb[60].mxu0 %v526_v3  ;;  %v7523_v3 = vld [vmem:[#allocation11 + $0x38] sm:$0xff] }
 0x1b8   : > { %v657_v7 = vpop.f32.mrb[0].mxu0 }
 0x1b9   : > { %v832_v0 = vmul.f32 %v7454_v5, %v657_v7  ;;  %v659_v9 = vpop.f32.mrb[1].mxu0 }
 0x1ba   : > { %v880_v11 = vmul.f32 %v7456_v6, %v659_v9  ;;  %v661_v12 = vpop.f32.mrb[2].mxu0 }
 0x1bb   : > { %v833_v13 = vmul.f32 %v7458_v8, %v661_v12  ;;  %v663_v14 = vpop.f32.mrb[3].mxu0 }
 0x1bc   : > { %v912_v15 = vadd.f32 %v880_v11, %v832_v0  ;;  %v881_v16 = vmul.f32 %v7461_v10, %v663_v14 }
 0x1be   : > { %v913_v19 = vadd.f32 %v881_v16, %v833_v13  ;;  %v960_v22 = vadd.f32 %v7466_v17, %v912_v15  ;;  %v7532_v15 = vld [vmem:[#allocation12 + $0x30] sm:$0xff]  ;;  %v7534_v16 = vld [vmem:[#allocation12 + $0x38] sm:$0xff] }
 0x1c0   : > { %v961_v23 = vadd.f32 %v7468_v18, %v913_v19  ;;  %v667_v24 = vpop.f32.mrb[4].mxu0 }
 0x1c1   : > { %v834_v26 = vmul.f32 %v7470_v20, %v667_v24  ;;  %v669_v27 = vpop.f32.mrb[5].mxu0 }
 0x1c2   : > { %v7481_v29 = vpack.c.bf16 %v961_v23, %v960_v22  ;;  %v882_v30 = vmul.f32 %v7472_v21, %v669_v27  ;;  %v671_v31 = vpop.f32.mrb[6].mxu0  ;;  %v7536_v22 = vld [vmem:[#allocation9 + $0x40] sm:$0xff] }
 0x1c3   : > { %v835_v32 = vmul.f32 %v7476_v25, %v671_v31  ;;  %v673_v33 = vpop.f32.mrb[7].mxu0  ;;  %v7538_v23 = vld [vmem:[#allocation11 + $0x40] sm:$0xff] }
 0x1c4   : > { %10465 = vst [vmem:[#allocation30_spill] sm:$0xff] %v7481_v29  ;;  %v914_v34 = vadd.f32 %v882_v30, %v834_v26  ;;  %v883_v35 = vmul.f32 %v7479_v28, %v673_v33  ;;  %5752 = vmatprep.mubr.msk.bf16.mxu0 %vm1037_vm0, %v7481_v29  ;;  %v7542_v30 = vld [vmem:[#allocation9 + $0x48] sm:$0xff] }
 0x1c5   : > { %v7545_v33 = vld [vmem:[#allocation11 + $0x48] sm:$0xff] }
 0x1c6   : > { %v915_v38 = vadd.f32 %v883_v35, %v835_v32  ;;  %v962_v41 = vadd.f32 %v7488_v36, %v914_v34 }
 0x1c8   : > { %v963_v42 = vadd.f32 %v7490_v37, %v915_v38  ;;  %v677_v43 = vpop.f32.mrb[8].mxu0 }
 0x1c9   : > { %v836_v45 = vmul.f32 %v7492_v39, %v677_v43  ;;  %v679_v46 = vpop.f32.mrb[9].mxu0 }
 0x1ca   : > { %v7503_v48 = vpack.c.bf16 %v963_v42, %v962_v41  ;;  %v884_v49 = vmul.f32 %v7494_v40, %v679_v46  ;;  %v681_v50 = vpop.f32.mrb[10].mxu0  ;;  %v7554_v46 = vld [vmem:[#allocation12 + $0x40] sm:$0xff] }
 0x1cb   : > { %v837_v51 = vmul.f32 %v7498_v44, %v681_v50  ;;  %v683_v52 = vpop.f32.mrb[11].mxu0 }
 0x1cc   : > { %10466 = vst [vmem:[#allocation31_spill] sm:$0xff] %v7503_v48  ;;  %v916_v53 = vadd.f32 %v884_v49, %v836_v45  ;;  %v885_v54 = vmul.f32 %v7501_v47, %v683_v52  ;;  %5753 = vmatmul.mubr.msk.bf16.vlgmr.msra.gmra.mrb[64].mxu0 %vm1037_vm0, %v7503_v48  ;;  %v7556_v49 = vld [vmem:[#allocation12 + $0x48] sm:$0xff]  ;;  %v7560_v52 = vld [vmem:[#allocation11 + $0x50] sm:$0xff] }
 0x1ce   : > { %v917_v57 = vadd.f32 %v885_v54, %v837_v51  ;;  %v964_v60 = vadd.f32 %v7510_v55, %v916_v53  ;;  %v7558_v51 = vld [vmem:[#allocation9 + $0x50] sm:$0xff] }
 0x1d0   : > { %v965_v61 = vadd.f32 %v7512_v56, %v917_v57  ;;  %v687_v62 = vpop.f32.mrb[12].mxu0 }
 0x1d1   : > { %v838_v1 = vmul.f32 %v7514_v58, %v687_v62  ;;  %v689_v2 = vpop.f32.mrb[13].mxu0 }
 0x1d2   : > { %v7525_v7 = vpack.c.bf16 %v965_v61, %v964_v60  ;;  %v886_v0 = vmul.f32 %v7516_v59, %v689_v2  ;;  %v691_v9 = vpop.f32.mrb[14].mxu0  ;;  %v7564_v60 = vld [vmem:[#allocation9 + $0x58] sm:$0xff] }
 0x1d3   : > { %v839_v11 = vmul.f32 %v7520_v63, %v691_v9  ;;  %v693_v12 = vpop.f32.mrb[15].mxu0 }
 0x1d4   : > { %10467 = vst [vmem:[#allocation32_spill] sm:$0xff] %v7525_v7  ;;  %v918_v13 = vadd.f32 %v886_v0, %v838_v1  ;;  %v887_v14 = vmul.f32 %v7523_v3, %v693_v12  ;;  %5756 = vmatprep.mubr.msk.bf16.mxu0 %vm1037_vm0, %v7525_v7  ;;  %v7567_v1 = vld [vmem:[#allocation11 + $0x58] sm:$0xff] }
 0x1d6   : > { %v919_v19 = vadd.f32 %v887_v14, %v839_v11  ;;  %v966_v24 = vadd.f32 %v7532_v15, %v918_v13 }
 0x1d8   : > { %v967_v26 = vadd.f32 %v7534_v16, %v919_v19  ;;  %v697_v27 = vpop.f32.mrb[16].mxu0  ;;  %v7576_v19 = vld [vmem:[#allocation12 + $0x50] sm:$0xff] }
 0x1d9   : > { %v840_v31 = vmul.f32 %v7536_v22, %v697_v27  ;;  %v699_v32 = vpop.f32.mrb[17].mxu0  ;;  %v7580_v27 = vld [vmem:[#allocation9 + $0x60] sm:$0xff] }
 0x1da   : > { %v7547_v34 = vpack.c.bf16 %v967_v26, %v966_v24  ;;  %v888_v35 = vmul.f32 %v7538_v23, %v699_v32  ;;  %v701_v38 = vpop.f32.mrb[18].mxu0  ;;  %v7578_v24 = vld [vmem:[#allocation12 + $0x58] sm:$0xff] }
 0x1db   : > { %v841_v41 = vmul.f32 %v7542_v30, %v701_v38  ;;  %v703_v42 = vpop.f32.mrb[19].mxu0 }
 0x1dc   : > { %10468 = vst [vmem:[#allocation33_spill] sm:$0xff] %v7547_v34  ;;  %v920_v43 = vadd.f32 %v888_v35, %v840_v31  ;;  %v889_v45 = vmul.f32 %v7545_v33, %v703_v42  ;;  %5757 = vmatmul.mubr.msk.bf16.gmra.mrb[68].mxu0 %vm1037_vm0, %v7547_v34  ;;  %v7582_v31 = vld [vmem:[#allocation11 + $0x60] sm:$0xff] }
 0x1de   : > { %v921_v50 = vadd.f32 %v889_v45, %v841_v41  ;;  %v968_v53 = vadd.f32 %v7554_v46, %v920_v43  ;;  %v7586_v41 = vld [vmem:[#allocation9 + $0x68] sm:$0xff] }
 0x1df   : > { %v7589_v45 = vld [vmem:[#allocation11 + $0x68] sm:$0xff] }
 0x1e0   : > { %v969_v54 = vadd.f32 %v7556_v49, %v921_v50  ;;  %v707_v57 = vpop.f32.mrb[20].mxu0 }
 0x1e1   : > { %v842_v61 = vmul.f32 %v7558_v51, %v707_v57  ;;  %v709_v62 = vpop.f32.mrb[21].mxu0 }
 0x1e2   : > { %v7569_v2 = vpack.c.bf16 %v969_v54, %v968_v53  ;;  %v890_v0 = vmul.f32 %v7560_v52, %v709_v62  ;;  %v711_v9 = vpop.f32.mrb[22].mxu0 }
 0x1e3   : > { %v843_v11 = vmul.f32 %v7564_v60, %v711_v9  ;;  %v713_v12 = vpop.f32.mrb[23].mxu0  ;;  %v7598_v9 = vld [vmem:[#allocation12 + $0x60] sm:$0xff] }
 0x1e4   : > { %10469 = vst [vmem:[#allocation34_spill] sm:$0xff] %v7569_v2  ;;  %v922_v13 = vadd.f32 %v890_v0, %v842_v61  ;;  %v891_v14 = vmul.f32 %v7567_v1, %v713_v12  ;;  %5760 = vmatprep.mubr.msk.bf16.mxu0 %vm1037_vm0, %v7569_v2 }
 0x1e6   : > { %v923_v26 = vadd.f32 %v891_v14, %v843_v11  ;;  %v970_v32 = vadd.f32 %v7576_v19, %v922_v13  ;;  %v7600_v11 = vld [vmem:[#allocation12 + $0x68] sm:$0xff]  ;;  %v7602_v13 = vld [vmem:[#allocation9 + $0x70] sm:$0xff] }
 0x1e7   : > { %v7604_v14 = vld [vmem:[#allocation11 + $0x70] sm:$0xff] }
 0x1e8   : > { %v971_v35 = vadd.f32 %v7578_v24, %v923_v26  ;;  %v717_v38 = vpop.f32.mrb[24].mxu0 }
 0x1e9   : > { %v844_v42 = vmul.f32 %v7580_v27, %v717_v38  ;;  %v719_v43 = vpop.f32.mrb[25].mxu0  ;;  %v7608_v38 = vld [vmem:[#allocation9 + $0x78] sm:$0xff] }
 0x1ea   : > { %v7591_v50 = vpack.c.bf16 %v971_v35, %v970_v32  ;;  %v892_v53 = vmul.f32 %v7582_v31, %v719_v43  ;;  %v721_v54 = vpop.f32.mrb[26].mxu0 }
 0x1eb   : > { %v845_v57 = vmul.f32 %v7586_v41, %v721_v54  ;;  %v723_v61 = vpop.f32.mrb[27].mxu0 }
 0x1ec   : > { %10470 = vst [vmem:[#allocation35_spill] sm:$0xff] %v7591_v50  ;;  %v924_v62 = vadd.f32 %v892_v53, %v844_v42  ;;  %v893_v0 = vmul.f32 %v7589_v45, %v723_v61  ;;  %5761 = vmatmul.mubr.msk.bf16.gmra.mrb[72].mxu0 %vm1037_vm0, %v7591_v50  ;;  %v7611_v53 = vld [vmem:[#allocation11 + $0x78] sm:$0xff] }
 0x1ee   : > { %v925_v12 = vadd.f32 %v893_v0, %v845_v57  ;;  %v972_v26 = vadd.f32 %v7598_v9, %v924_v62 }
 0x1f0   : > { %v973_v32 = vadd.f32 %v7600_v11, %v925_v12  ;;  %v727_v35 = vpop.f32.mrb[28].mxu0  ;;  %v7620_v12 = vld [vmem:[#allocation12 + $0x70] sm:$0xff] }
 0x1f1   : > { %v846_v42 = vmul.f32 %v7602_v13, %v727_v35  ;;  %v729_v43 = vpop.f32.mrb[29].mxu0  ;;  %v7622_v35 = vld [vmem:[#allocation12 + $0x78] sm:$0xff] }
 0x1f2   : > { %v7613_v54 = vpack.c.bf16 %v973_v32, %v972_v26  ;;  %v894_v57 = vmul.f32 %v7604_v14, %v729_v43  ;;  %v731_v61 = vpop.f32.mrb[30].mxu0 }
 0x1f3   : > { %v847_v0 = vmul.f32 %v7608_v38, %v731_v61  ;;  %v733_v2 = vpop.f32.mrb[31].mxu0 }
 0x1f4   : > { %10471 = vst [vmem:[#allocation36_spill] sm:$0xff] %v7613_v54  ;;  %v926_v50 = vadd.f32 %v894_v57, %v846_v42  ;;  %v895_v62 = vmul.f32 %v7611_v53, %v733_v2  ;;  %5764 = vmatprep.mubr.msk.bf16.mxu1 %vm1037_vm0, %v7613_v54  ;;  %v1192_v57 = vsel %vm1037_vm0, %v7450_v4, 0 }
 0x1f6   : > { %v927_v7 = vadd.f32 %v895_v62, %v847_v0  ;;  %v974_v26 = vadd.f32 %v7620_v12, %v926_v50 }
 0x1f8   : > { %v975_v32 = vadd.f32 %v7622_v35, %v927_v7  ;;  %v737_v43 = vpop.f32.mrb[32].mxu0 }
 0x1f9   : > { %v848_v34 = vmul.f32 %v7454_v5, %v737_v43  ;;  %v739_v61 = vpop.f32.mrb[33].mxu0 }
 0x1fa   : > { %v7627_v48 = vpack.c.bf16 %v975_v32, %v974_v26  ;;  %v896_v2 = vmul.f32 %v7456_v6, %v739_v61  ;;  %v741_v42 = vpop.f32.mrb[34].mxu0 }
 0x1fb   : > { %v849_v54 = vmul.f32 %v7458_v8, %v741_v42  ;;  %v743_v29 = vpop.f32.mrb[35].mxu0 }
 0x1fc   : > { %10472 = vst [vmem:[#allocation37_spill] sm:$0xff] %v7627_v48  ;;  %v928_v0 = vadd.f32 %v896_v2, %v848_v34  ;;  %v897_v50 = vmul.f32 %v7461_v10, %v743_v29  ;;  %5765 = vmatmul.mubr.msk.bf16.vlgmr.msra.gmra.mrb[0].mxu1 %vm1037_vm0, %v7627_v48 }
 0x1fd   : > { %5769 = vmatpush3.bf16.xpose.msra.mxu1 %v1192_v57 }
 0x1fe   : > { %v976_v5 = vadd.f32 %v7466_v17, %v928_v0  ;;  %v929_v7 = vadd.f32 %v897_v50, %v849_v54 }
 0x200   : > { %v977_v62 = vadd.f32 %v7468_v18, %v929_v7  ;;  %v747_v6 = vpop.f32.mrb[36].mxu0 }
 0x201   : > { %v850_v26 = vmul.f32 %v7470_v20, %v747_v6  ;;  %v749_v32 = vpop.f32.mrb[37].mxu0 }
 0x202   : > { %v7639_v4 = vpack.c.bf16 %v977_v62, %v976_v5  ;;  %v898_v8 = vmul.f32 %v7472_v21, %v749_v32  ;;  %v751_v34 = vpop.f32.mrb[38].mxu0 }
 0x203   : > { %v851_v10 = vmul.f32 %v7476_v25, %v751_v34  ;;  %v753_v29 = vpop.f32.mrb[39].mxu0 }
 0x204   : > { %10473 = vst [vmem:[#allocation38_spill] sm:$0xff] %v7639_v4  ;;  %v930_v43 = vadd.f32 %v898_v8, %v850_v26  ;;  %v899_v61 = vmul.f32 %v7479_v28, %v753_v29  ;;  %5770 = vmatprep.mubr.msk.bf16.mxu1 %vm1037_vm0, %v7639_v4 }
 0x206   : > { %v978_v17 = vadd.f32 %v7488_v36, %v930_v43  ;;  %v931_v18 = vadd.f32 %v899_v61, %v851_v10 }
 0x208   : > { %v979_v20 = vadd.f32 %v7490_v37, %v931_v18  ;;  %v757_v54 = vpop.f32.mrb[40].mxu0 }
 0x209   : > { %v852_v2 = vmul.f32 %v7492_v39, %v757_v54  ;;  %v759_v42 = vpop.f32.mrb[41].mxu0 }
 0x20a   : > { %v7649_v21 = vpack.c.bf16 %v979_v20, %v978_v17  ;;  %v900_v25 = vmul.f32 %v7494_v40, %v759_v42  ;;  %v761_v57 = vpop.f32.mrb[42].mxu0 }
 0x20b   : > { %v853_v0 = vmul.f32 %v7498_v44, %v761_v57  ;;  %v763_v28 = vpop.f32.mrb[43].mxu0 }
 0x20c   : > { %10474 = vst [vmem:[#allocation39_spill] sm:$0xff] %v7649_v21  ;;  %v932_v50 = vadd.f32 %v900_v25, %v852_v2  ;;  %v901_v5 = vmul.f32 %v7501_v47, %v763_v28  ;;  %5771 = vmatmul.mubr.msk.bf16.vlgmr.msra.gmra.mrb[4].mxu1 %vm1037_vm0, %v7649_v21 }
 0x20e   : > { %v980_v36 = vadd.f32 %v7510_v55, %v932_v50  ;;  %v933_v37 = vadd.f32 %v901_v5, %v853_v0 }
 0x210   : > { %v981_v39 = vadd.f32 %v7512_v56, %v933_v37  ;;  %v767_v7 = vpop.f32.mrb[44].mxu0 }
 0x211   : > { %v854_v62 = vmul.f32 %v7514_v58, %v767_v7  ;;  %v769_v6 = vpop.f32.mrb[45].mxu0 }
 0x212   : > { %v7659_v40 = vpack.c.bf16 %v981_v39, %v980_v36  ;;  %v902_v44 = vmul.f32 %v7516_v59, %v769_v6  ;;  %v771_v26 = vpop.f32.mrb[46].mxu0 }
 0x213   : > { %v855_v32 = vmul.f32 %v7520_v63, %v771_v26  ;;  %v773_v47 = vpop.f32.mrb[47].mxu0 }
 0x214   : > { %10475 = vst [vmem:[#allocation40_spill] sm:$0xff] %v7659_v40  ;;  %v934_v8 = vadd.f32 %v902_v44, %v854_v62  ;;  %v903_v34 = vmul.f32 %v7523_v3, %v773_v47  ;;  %5774 = vmatprep.mubr.msk.bf16.mxu1 %vm1037_vm0, %v7659_v40 }
 0x216   : > { %v982_v55 = vadd.f32 %v7532_v15, %v934_v8  ;;  %v935_v56 = vadd.f32 %v903_v34, %v855_v32 }
 0x218   : > { %v983_v58 = vadd.f32 %v7534_v16, %v935_v56  ;;  %v777_v10 = vpop.f32.mrb[48].mxu0 }
 0x219   : > { %v856_v29 = vmul.f32 %v7536_v22, %v777_v10  ;;  %v779_v43 = vpop.f32.mrb[49].mxu0 }
 0x21a   : > { %v7669_v59 = vpack.c.bf16 %v983_v58, %v982_v55  ;;  %v904_v63 = vmul.f32 %v7538_v23, %v779_v43  ;;  %v781_v61 = vpop.f32.mrb[50].mxu0  ;;  %v7733_v58 = vld [vmem:[%s10481_s27 + $0x8] sm:$0xff] }
 0x21b   : > { %v857_v17 = vmul.f32 %v7542_v30, %v781_v61  ;;  %v783_v3 = vpop.f32.mrb[51].mxu0 }
 0x21c   : > { %10476 = vst [vmem:[#allocation41_spill] sm:$0xff] %v7669_v59  ;;  %v936_v18 = vadd.f32 %v904_v63, %v856_v29  ;;  %v905_v20 = vmul.f32 %v7545_v33, %v783_v3  ;;  %5775 = vmatmul.mubr.msk.bf16.gmra.mrb[8].mxu1 %vm1037_vm0, %v7669_v59 }
 0x21e   : > { %v984_v15 = vadd.f32 %v7554_v46, %v936_v18  ;;  %v937_v16 = vadd.f32 %v905_v20, %v857_v17 }
 0x220   : > { %v985_v22 = vadd.f32 %v7556_v49, %v937_v16  ;;  %v787_v54 = vpop.f32.mrb[52].mxu0 }
 0x221   : > { %v858_v2 = vmul.f32 %v7558_v51, %v787_v54  ;;  %v789_v42 = vpop.f32.mrb[53].mxu0 }
 0x222   : > { %v7679_v23 = vpack.c.bf16 %v985_v22, %v984_v15  ;;  %v906_v30 = vmul.f32 %v7560_v52, %v789_v42  ;;  %v791_v25 = vpop.f32.mrb[54].mxu0  ;;  %v7755_v15 = vld [vmem:[%s10481_s27 + $0x20] sm:$0xff]  ;;  %v7760_v22 = vld [vmem:[%s10481_s27 + $0x30] sm:$0xff] }
 0x223   : > { %v859_v57 = vmul.f32 %v7564_v60, %v791_v25  ;;  %v793_v33 = vpop.f32.mrb[55].mxu0  ;;  %v7773_v25 = vld [vmem:[%s10481_s27 + $0x38] sm:$0xff] }
 0x224   : > { %10477 = vst [vmem:[#allocation42_spill] sm:$0xff] %v7679_v23  ;;  %v938_v0 = vadd.f32 %v906_v30, %v858_v2  ;;  %v907_v28 = vmul.f32 %v7567_v1, %v793_v33  ;;  %5778 = vmatprep.mubr.msk.bf16.mxu1 %vm1037_vm0, %v7679_v23  ;;  %v7765_v2 = vld [vmem:[%s10481_s27 + $0x28] sm:$0xff] }
 0x226   : > { %v986_v46 = vadd.f32 %v7576_v19, %v938_v0  ;;  %v939_v49 = vadd.f32 %v907_v28, %v859_v57 }
 0x228   : > { %v987_v51 = vadd.f32 %v7578_v24, %v939_v49  ;;  %v797_v50 = vpop.f32.mrb[56].mxu0 }
 0x229   : > { %v860_v5 = vmul.f32 %v7580_v27, %v797_v50  ;;  %v799_v36 = vpop.f32.mrb[57].mxu0 }
 0x22a   : > { %v7689_v52 = vpack.c.bf16 %v987_v51, %v986_v46  ;;  %v908_v60 = vmul.f32 %v7582_v31, %v799_v36  ;;  %v801_v37 = vpop.f32.mrb[58].mxu0 }
 0x22b   : > { %v861_v39 = vmul.f32 %v7586_v41, %v801_v37  ;;  %v803_v1 = vpop.f32.mrb[59].mxu0 }
 0x22c   : > { %10478 = vst [vmem:[#allocation43_spill] sm:$0xff] %v7689_v52  ;;  %v940_v7 = vadd.f32 %v908_v60, %v860_v5  ;;  %v909_v62 = vmul.f32 %v7589_v45, %v803_v1  ;;  %5779 = vmatmul.mubr.msk.bf16.gmra.mrb[12].mxu1 %vm1037_vm0, %v7689_v52  ;;  %v7795_v5 = vld [vmem:[%s10481_s27 + $0x40] sm:$0xff]  ;;  %v7800_v60 = vld [vmem:[%s10481_s27 + $0x50] sm:$0xff] }
 0x22e   : > { %v988_v19 = vadd.f32 %v7598_v9, %v940_v7  ;;  %v941_v24 = vadd.f32 %v909_v62, %v861_v39  ;;  %v7805_v39 = vld [vmem:[%s10481_s27 + $0x48] sm:$0xff]  ;;  %v7813_v62 = vld [vmem:[%s10481_s27 + $0x58] sm:$0xff] }
 0x230   : > { %v989_v27 = vadd.f32 %v7600_v11, %v941_v24  ;;  %v807_v6 = vpop.f32.mrb[60].mxu0 }
 0x231   : > { %v862_v44 = vmul.f32 %v7602_v13, %v807_v6  ;;  %v809_v26 = vpop.f32.mrb[61].mxu0 }
 0x232   : > { %v7699_v31 = vpack.c.bf16 %v989_v27, %v988_v19  ;;  %v910_v41 = vmul.f32 %v7604_v14, %v809_v26  ;;  %v811_v32 = vpop.f32.mrb[62].mxu0  ;;  %v7715_v14 = vld [vmem:[%s10481_s27 + $0x10] sm:$0xff] }
 0x233   : > { %v863_v47 = vmul.f32 %v7608_v38, %v811_v32  ;;  %v813_v45 = vpop.f32.mrb[63].mxu0  ;;  %v7720_v38 = vld [vmem:[%s10481_s27] sm:$0xff] }
 0x234   : > { %10479 = vst [vmem:[#allocation44_spill] sm:$0xff] %v7699_v31  ;;  %v942_v8 = vadd.f32 %v910_v41, %v862_v44  ;;  %v911_v34 = vmul.f32 %v7611_v53, %v813_v45  ;;  %5782 = vmatprep.mubr.msk.bf16.mxu1 %vm1037_vm0, %v7699_v31 }
 0x236   : > { %v990_v9 = vadd.f32 %v7620_v12, %v942_v8  ;;  %v943_v11 = vadd.f32 %v911_v34, %v863_v47  ;;  %v7725_v12 = vld [vmem:[%s10481_s27 + $0x18] sm:$0xff]  ;;  %v7835_v47 = vld [vmem:[%s10481_s27 + $0x60] sm:$0xff]  ;;  %v7840_v8 = vld [vmem:[%s10481_s27 + $0x70] sm:$0xff] }
 0x238   : > { %v991_v13 = vadd.f32 %v7622_v35, %v943_v11 }
 0x23a   : > { %v7708_v55 = vpack.c.bf16 %v991_v13, %v990_v9  ;;  %v7845_v9 = vld [vmem:[%s10481_s27 + $0x68] sm:$0xff] }
 0x23c   : > { %10480 = vst [vmem:[#allocation45_spill] sm:$0xff] %v7708_v55  ;;  %5783 = vmatmul.mubr.msk.bf16.gmra.mrb[16].mxu1 %vm1037_vm0, %v7708_v55 }
 0x29f   : > { %v5754_v53 = vpop.f32.mrb[64].mxu0 }
 0x2a0   : > { %v7728_v35 = vadd.f32 %v5754_v53, %v7715_v14  ;;  %v1099_v56 = vpop.f32.mrb[65].mxu0  ;;  %v7853_v53 = vld [vmem:[%s10481_s27 + $0x78] sm:$0xff] }
 0x2a1   : > { %v7736_v10 = vadd.f32 %v1099_v56, %v7720_v38  ;;  %v5755_v29 = vpop.f32.mrb[66].mxu0 }
 0x2a2   : > { %v7739_v43 = vadd.f32 %v5755_v29, %v7725_v12  ;;  %v1102_v63 = vpop.f32.mrb[67].mxu0  ;;  %v1298_v61 = vsel %vm1291_vm1, %v7728_v35, -inf }
 0x2a3   : > { %v7744_v17 = vadd.f32 %v1102_v63, %v7733_v58  ;;  %1299 = vmax.xlane.f32.xlu1 %v1298_v61  ;;  %v1292_v3 = vsel %vm1291_vm1, %v7736_v10, -inf }
 0x2a4   : > { %1293 = vmax.xlane.f32.xlu0 %v1292_v3  ;;  %v1301_v18 = vsel %vm1291_vm1, %v7739_v43, -inf }
 0x2a5   : > { %v1295_v20 = vsel %vm1291_vm1, %v7744_v17, -inf }
 0x2a7   : > { %1302 = vmax.xlane.f32.xlu1 %v1301_v18 }
 0x2a8   : > { %1296 = vmax.xlane.f32.xlu0 %v1295_v20 }
 0x2af   : > { %v5758_v16 = vpop.f32.mrb[68].mxu0 }
 0x2b0   : > { %v1115_v54 = vpop.f32.mrb[69].mxu0  ;;  %v7776_v33 = vadd.f32 %v5758_v16, %v7760_v22 }
 0x2b1   : > { %v7768_v42 = vadd.f32 %v1115_v54, %v7755_v15  ;;  %v5759_v30 = vpop.f32.mrb[70].mxu0 }
 0x2b2   : > { %v1118_v57 = vpop.f32.mrb[71].mxu0  ;;  %v7784_v46 = vadd.f32 %v5759_v30, %v7773_v25  ;;  %v1310_v51 = vsel %vm1291_vm1, %v7776_v33, -inf }
 0x2b3   : > { %v7779_v0 = vadd.f32 %v1118_v57, %v7765_v2  ;;  %v1304_v28 = vsel %vm1291_vm1, %v7768_v42, -inf }
 0x2b4   : > { %1305 = vmax.xlane.f32.xlu0 %v1304_v28  ;;  %v1313_v50 = vsel %vm1291_vm1, %v7784_v46, -inf }
 0x2b5   : > { %v1307_v49 = vsel %vm1291_vm1, %v7779_v0, -inf }
 0x2b6   : > { %1308 = vmax.xlane.f32.xlu1 %v1307_v49 }
 0x2b8   : > { %1311 = vmax.xlane.f32.xlu0 %v1310_v51 }
 0x2ba   : > { %1314 = vmax.xlane.f32.xlu1 %v1313_v50 }
 0x2bf   : > { %v5762_v36 = vpop.f32.mrb[72].mxu0 }
 0x2c0   : > { %v1131_v37 = vpop.f32.mrb[73].mxu0  ;;  %v7816_v24 = vadd.f32 %v5762_v36, %v7800_v60 }
 0x2c1   : > { %v7808_v1 = vadd.f32 %v1131_v37, %v7795_v5  ;;  %v5763_v7 = vpop.f32.mrb[74].mxu0 }
 0x2c2   : > { %v1134_v19 = vpop.f32.mrb[75].mxu0  ;;  %v7824_v44 = vadd.f32 %v5763_v7, %v7813_v62  ;;  %v1322_v41 = vsel %vm1291_vm1, %v7816_v24, -inf }
 0x2c3   : > { %v7819_v27 = vadd.f32 %v1134_v19, %v7805_v39  ;;  %v1316_v6 = vsel %vm1291_vm1, %v7808_v1, -inf }
 0x2c4   : > { %1317 = vmax.xlane.f32.xlu0 %v1316_v6  ;;  %v1325_v32 = vsel %vm1291_vm1, %v7824_v44, -inf }
 0x2c5   : > { %v1319_v26 = vsel %vm1291_vm1, %v7819_v27, -inf }
 0x2c6   : > { %1320 = vmax.xlane.f32.xlu1 %v1319_v26 }
 0x2c8   : > { %1323 = vmax.xlane.f32.xlu0 %v1322_v41 }
 0x2ca   : > { %1326 = vmax.xlane.f32.xlu1 %v1325_v32 }
 0x2cf   : > { %v5766_v45 = vpop.f32.mrb[0].mxu1 }
 0x2d0   : > { %v1147_v34 = vpop.f32.mrb[1].mxu1  ;;  %v7856_v29 = vadd.f32 %v5766_v45, %v7840_v8 }
 0x2d1   : > { %v7848_v11 = vadd.f32 %v1147_v34, %v7835_v47  ;;  %v5767_v13 = vpop.f32.mrb[2].mxu1 }
 0x2d2   : > { %v1150_v56 = vpop.f32.mrb[3].mxu1  ;;  %v7864_v3 = vadd.f32 %v5767_v13, %v7853_v53  ;;  %v1334_v20 = vsel %vm1291_vm1, %v7856_v29, -inf }
 0x2d3   : > { %v7859_v63 = vadd.f32 %v1150_v56, %v7845_v9  ;;  %v1328_v61 = vsel %vm1291_vm1, %v7848_v11, -inf }
 0x2d4   : > { %1329 = vmax.xlane.f32.xlu0 %v1328_v61  ;;  %v1337_v16 = vsel %vm1291_vm1, %v7864_v3, -inf }
 0x2d5   : > { %v1331_v18 = vsel %vm1291_vm1, %v7859_v63, -inf }
 0x2d6   : > { %1332 = vmax.xlane.f32.xlu1 %v1331_v18 }
 0x2d8   : > { %1335 = vmax.xlane.f32.xlu0 %v1334_v20 }
 0x2da   : > { %1338 = vmax.xlane.f32.xlu1 %v1337_v16 }
 0x2df   : > { %v5772_v54 = vpop.f32.mrb[4].mxu1 }
 0x2e0   : > { %v1228_v30 = vpop.f32.mrb[5].mxu1  ;;  %v7876_v51 = vadd.f32 %v5772_v54, %v7715_v14 }
 0x2e1   : > { %v7873_v57 = vadd.f32 %v1228_v30, %v7720_v38  ;;  %v5773_v28 = vpop.f32.mrb[6].mxu1 }
 0x2e2   : > { %v1231_v49 = vpop.f32.mrb[7].mxu1  ;;  %v7884_v37 = vadd.f32 %v5773_v28, %v7725_v12  ;;  %v1346_v38 = vsel %vm1291_vm1, %v7876_v51, -inf }
 0x2e3   : > { %v7879_v50 = vadd.f32 %v1231_v49, %v7733_v58  ;;  %v1340_v36 = vsel %vm1291_vm1, %v7873_v57, -inf }
 0x2e4   : > { %1341 = vmax.xlane.f32.xlu0 %v1340_v36  ;;  %v1349_v14 = vsel %vm1291_vm1, %v7884_v37, -inf }
 0x2e5   : > { %v1343_v7 = vsel %vm1291_vm1, %v7879_v50, -inf }
 0x2e6   : > { %1344 = vmax.xlane.f32.xlu1 %v1343_v7 }
 0x2e8   : > { %1347 = vmax.xlane.f32.xlu0 %v1346_v38 }
 0x2ea   : > { %1350 = vmax.xlane.f32.xlu1 %v1349_v14 }
 0x2ef   : > { %v5776_v58 = vpop.f32.mrb[8].mxu1 }
 0x2f0   : > { %v1244_v19 = vpop.f32.mrb[9].mxu1  ;;  %v7896_v41 = vadd.f32 %v5776_v58, %v7760_v22 }
 0x2f1   : > { %v7893_v6 = vadd.f32 %v1244_v19, %v7755_v15  ;;  %v5777_v26 = vpop.f32.mrb[10].mxu1 }
 0x2f2   : > { %v1247_v12 = vpop.f32.mrb[11].mxu1  ;;  %v7904_v34 = vadd.f32 %v5777_v26, %v7773_v25  ;;  %v1358_v15 = vsel %vm1291_vm1, %v7896_v41, -inf }
 0x2f3   : > { %v7899_v32 = vadd.f32 %v1247_v12, %v7765_v2  ;;  %v1352_v45 = vsel %vm1291_vm1, %v7893_v6, -inf }
 0x2f4   : > { %1353 = vmax.xlane.f32.xlu0 %v1352_v45  ;;  %v1361_v22 = vsel %vm1291_vm1, %v7904_v34, -inf }
 0x2f5   : > { %v1355_v13 = vsel %vm1291_vm1, %v7899_v32, -inf }
 0x2f6   : > { %1356 = vmax.xlane.f32.xlu1 %v1355_v13 }
 0x2f8   : > { %1359 = vmax.xlane.f32.xlu0 %v1358_v15 }
 0x2fa   : > { %1362 = vmax.xlane.f32.xlu1 %v1361_v22 }
 0x2ff   : > { %v5780_v2 = vpop.f32.mrb[12].mxu1 }
 0x300   : > { %v1260_v56 = vpop.f32.mrb[13].mxu1  ;;  %v7916_v20 = vadd.f32 %v5780_v2, %v7800_v60 }
 0x301   : > { %v7913_v61 = vadd.f32 %v1260_v56, %v7795_v5  ;;  %v5781_v18 = vpop.f32.mrb[14].mxu1 }
 0x302   : > { %v1263_v25 = vpop.f32.mrb[15].mxu1  ;;  %v7924_v30 = vadd.f32 %v5781_v18, %v7813_v62  ;;  %v1370_v5 = vsel %vm1291_vm1, %v7916_v20, -inf }
 0x303   : > { %v7919_v16 = vadd.f32 %v1263_v25, %v7805_v39  ;;  %v1364_v54 = vsel %vm1291_vm1, %v7913_v61, -inf }
 0x304   : > { %1365 = vmax.xlane.f32.xlu0 %v1364_v54  ;;  %v1373_v60 = vsel %vm1291_vm1, %v7924_v30, -inf }
 0x305   : > { %v1367_v28 = vsel %vm1291_vm1, %v7919_v16, -inf }
 0x306   : > { %1368 = vmax.xlane.f32.xlu1 %v1367_v28 }
 0x308   : > { %1371 = vmax.xlane.f32.xlu0 %v1370_v5 }
 0x30a   : > { %1374 = vmax.xlane.f32.xlu1 %v1373_v60 }
 0x30f   : > { %v5784_v39 = vpop.f32.mrb[16].mxu1 }
 0x310   : > { %v1276_v49 = vpop.f32.mrb[17].mxu1  ;;  %v7936_v38 = vadd.f32 %v5784_v39, %v7840_v8 }
 0x311   : > { %v7933_v36 = vadd.f32 %v1276_v49, %v7835_v47  ;;  %v5785_v7 = vpop.f32.mrb[18].mxu1 }
 0x312   : > { %v1279_v62 = vpop.f32.mrb[19].mxu1  ;;  %v7944_v19 = vadd.f32 %v5785_v7, %v7853_v53  ;;  %v1382_v47 = vsel %vm1291_vm1, %v7936_v38, -inf }
 0x313   : > { %v7939_v14 = vadd.f32 %v1279_v62, %v7845_v9  ;;  %v1376_v58 = vsel %vm1291_vm1, %v7933_v36, -inf }
 0x314   : > { %1377 = vmax.xlane.f32.xlu0 %v1376_v58  ;;  %v1385_v8 = vsel %vm1291_vm1, %v7944_v19, -inf }
 0x315   : > { %v1379_v26 = vsel %vm1291_vm1, %v7939_v14, -inf }
 0x316   : > { %1380 = vmax.xlane.f32.xlu1 %v1379_v26 }
 0x318   : > { %1383 = vmax.xlane.f32.xlu0 %v1382_v47 }
 0x31a   : > { %1386 = vmax.xlane.f32.xlu1 %v1385_v8 }
 0x330   : > { %v1300_v9 = vpop.xlane.xlu1 %1299 }
 0x331   : > { %v1390_v12 = vsub.f32 %v7728_v35, %v1300_v9  ;;  %v1294_v45 = vpop.xlane.xlu0 %1293 }
 0x332   : > { %v1388_v13 = vsub.f32 %v7736_v10, %v1294_v45 }
 0x333   : > { %v1424_v53 = vmul.f32 1.442695, %v1390_v12 }
 0x334   : > { %v1420_v15 = vmul.f32 1.442695, %v1388_v13  ;;  %v1303_v22 = vpop.xlane.xlu1 %1302 }
 0x335   : > { %6259 = vpow2.f32 %v1424_v53  ;;  %v1391_v2 = vsub.f32 %v7739_v43, %v1303_v22  ;;  %v1297_v56 = vpop.xlane.xlu0 %1296 }
 0x336   : > { %v1389_v18 = vsub.f32 %v7744_v17, %v1297_v56  ;;  %6261 = vpow2.f32 %v1420_v15 }
 0x337   : > { %v1426_v25 = vmul.f32 1.442695, %v1391_v2 }
 0x338   : > { %v1422_v54 = vmul.f32 1.442695, %v1389_v18 }
 0x339   : > { %6263 = vpow2.f32 %v1426_v25 }
 0x33a   : > { %6265 = vpow2.f32 %v1422_v54 }
 0x33f   : > { %v7956_v28 = vpop.eup %6259 }
 0x340   : > { %v1490_v35 = vsel %vm1291_vm1, %v7956_v28, 0.0  ;;  %v7960_v10 = vpop.eup %6261 }
 0x341   : > { %v1306_v5 = vpop.xlane.xlu0 %1305  ;;  %1491 = vadd.xlane.f32.xlu0 %v1490_v35  ;;  %v1484_v49 = vsel %vm1291_vm1, %v7960_v10, 0.0 }
 0x342   : > { %v1392_v43 = vsub.f32 %v7768_v42, %v1306_v5 }
 0x343   : > { %v7962_v60 = vpop.eup %6263  ;;  %v1309_v39 = vpop.xlane.xlu1 %1308 }
 0x344   : > { %v1493_v17 = vsel %vm1291_vm1, %v7962_v60, 0.0  ;;  %v7969_v7 = vpop.eup %6265  ;;  %v1393_v58 = vsub.f32 %v7779_v0, %v1309_v39  ;;  %v1428_v47 = vmul.f32 1.442695, %v1392_v43 }
 0x345   : > { %v1312_v62 = vpop.xlane.xlu0 %1311  ;;  %1494 = vadd.xlane.f32.xlu1 %v1493_v17  ;;  %1485 = vadd.xlane.f32.xlu0 %v1484_v49  ;;  %v1487_v12 = vsel %vm1291_vm1, %v7969_v7, 0.0 }
 0x346   : > { %v1394_v26 = vsub.f32 %v7776_v33, %v1312_v62  ;;  %v1430_v45 = vmul.f32 1.442695, %v1393_v58  ;;  %v6249_v58 = vld [vmem:[#allocation6] sm:$0xff]  }
 0x347   : > { %v1315_v8 = vpop.xlane.xlu1 %1314  ;;  %5786 = vmatprep.subr.bf16.mxu1 %v6249_v58 }
 0x348   : > { %v1432_v9 = vmul.f32 1.442695, %v1394_v26  ;;  %v1395_v42 = vsub.f32 %v7784_v46, %v1315_v8  ;;  %5787 = vmatpush3.bf16.msra.mxu1 %v6249_v58 }
 0x349   : > { %1488 = vadd.xlane.f32.xlu1 %v1487_v12 }
 0x34a   : > { %6267 = vpow2.f32 %v1432_v9  ;;  %v1434_v13 = vmul.f32 1.442695, %v1395_v42 }
 0x34b   : > { %6269 = vpow2.f32 %v1428_v47 }
 0x34c   : > { %6271 = vpow2.f32 %v1434_v13 }
 0x34d   : > { %6273 = vpow2.f32 %v1430_v45 }
 0x351   : > { %v1318_v53 = vpop.xlane.xlu0 %1317 }
 0x352   : > { %v1396_v0 = vsub.f32 %v7808_v1, %v1318_v53 }
 0x353   : > { %v1321_v15 = vpop.xlane.xlu1 %1320 }
 0x354   : > { %v7977_v33 = vpop.eup %6267  ;;  %v1397_v18 = vsub.f32 %v7819_v27, %v1321_v15  ;;  %v1436_v54 = vmul.f32 1.442695, %v1396_v0 }
 0x355   : > { %v7979_v22 = vpop.eup %6269  ;;  %v1324_v2 = vpop.xlane.xlu0 %1323  ;;  %v1502_v46 = vsel %vm1291_vm1, %v7977_v33, 0.0 }
 0x356   : > { %v7983_v56 = vpop.eup %6271  ;;  %v1398_v25 = vsub.f32 %v7816_v24, %v1324_v2  ;;  %1503 = vadd.xlane.f32.xlu0 %v1502_v46  ;;  %v1496_v17 = vsel %vm1291_vm1, %v7979_v22, 0.0  ;;  %v1438_v49 = vmul.f32 1.442695, %v1397_v18 }
 0x357   : > { %v1327_v35 = vpop.xlane.xlu1 %1326  ;;  %v1505_v1 = vsel %vm1291_vm1, %v7983_v56, 0.0  ;;  %v7989_v5 = vpop.eup %6273 }
 0x358   : > { %v1440_v43 = vmul.f32 1.442695, %v1398_v25  ;;  %v1399_v39 = vsub.f32 %v7824_v44, %v1327_v35  ;;  %1506 = vadd.xlane.f32.xlu1 %v1505_v1  ;;  %v1499_v24 = vsel %vm1291_vm1, %v7989_v5, 0.0 }
 0x35a   : > { %6275 = vpow2.f32 %v1440_v43  ;;  %v1442_v27 = vmul.f32 1.442695, %v1399_v39  ;;  %1497 = vadd.xlane.f32.xlu0 %v1496_v17 }
 0x35b   : > { %6277 = vpow2.f32 %v1436_v54 }
 0x35c   : > { %6279 = vpow2.f32 %v1442_v27  ;;  %1500 = vadd.xlane.f32.xlu1 %v1499_v24 }
 0x35d   : > { %6281 = vpow2.f32 %v1438_v49 }
 0x361   : > { %v1330_v62 = vpop.xlane.xlu0 %1329 }
 0x362   : > { %v1400_v26 = vsub.f32 %v7848_v11, %v1330_v62 }
 0x363   : > { %v1333_v44 = vpop.xlane.xlu1 %1332 }
 0x364   : > { %v7997_v47 = vpop.eup %6275  ;;  %v1401_v45 = vsub.f32 %v7859_v63, %v1333_v44  ;;  %v1444_v53 = vmul.f32 1.442695, %v1400_v26 }
 0x365   : > { %v7999_v8 = vpop.eup %6277  ;;  %v1336_v9 = vpop.xlane.xlu0 %1335  ;;  %v1514_v42 = vsel %vm1291_vm1, %v7997_v47, 0.0 }
 0x366   : > { %v8003_v12 = vpop.eup %6279  ;;  %v1402_v13 = vsub.f32 %v7856_v29, %v1336_v9  ;;  %1515 = vadd.xlane.f32.xlu0 %v1514_v42  ;;  %v1508_v18 = vsel %vm1291_vm1, %v7999_v8, 0.0  ;;  %v1446_v25 = vmul.f32 1.442695, %v1401_v45 }
 0x367   : > { %v1339_v11 = vpop.xlane.xlu1 %1338  ;;  %v1517_v0 = vsel %vm1291_vm1, %v8003_v12, 0.0  ;;  %v8009_v15 = vpop.eup %6281 }
 0x368   : > { %v1448_v2 = vmul.f32 1.442695, %v1402_v13  ;;  %v1403_v46 = vsub.f32 %v7864_v3, %v1339_v11  ;;  %1518 = vadd.xlane.f32.xlu1 %v1517_v0  ;;  %v1511_v29 = vsel %vm1291_vm1, %v8009_v15, 0.0 }
 0x36a   : > { %6283 = vpow2.f32 %v1448_v2  ;;  %v1450_v63 = vmul.f32 1.442695, %v1403_v46  ;;  %1509 = vadd.xlane.f32.xlu0 %v1508_v18 }
 0x36b   : > { %6285 = vpow2.f32 %v1444_v53 }
 0x36c   : > { %6287 = vpow2.f32 %v1450_v63  ;;  %1512 = vadd.xlane.f32.xlu1 %v1511_v29 }
 0x36d   : > { %6289 = vpow2.f32 %v1446_v25 }
 0x371   : > { %v1342_v54 = vpop.xlane.xlu0 %1341 }
 0x372   : > { %v1404_v35 = vsub.f32 %v7873_v57, %v1342_v54 }
 0x373   : > { %v1345_v1 = vpop.xlane.xlu1 %1344 }
 0x374   : > { %v8017_v3 = vpop.eup %6283  ;;  %v1405_v27 = vsub.f32 %v7879_v50, %v1345_v1  ;;  %v1452_v62 = vmul.f32 1.442695, %v1404_v35 }
 0x375   : > { %v8019_v43 = vpop.eup %6285  ;;  %v1348_v39 = vpop.xlane.xlu0 %1347  ;;  %v1526_v17 = vsel %vm1291_vm1, %v8017_v3, 0.0 }
 0x376   : > { %v8023_v49 = vpop.eup %6287  ;;  %v1406_v24 = vsub.f32 %v7876_v51, %v1348_v39  ;;  %1527 = vadd.xlane.f32.xlu0 %v1526_v17  ;;  %v1520_v42 = vsel %vm1291_vm1, %v8019_v43, 0.0  ;;  %v1454_v45 = vmul.f32 1.442695, %v1405_v27 }
 0x377   : > { %v1351_v58 = vpop.xlane.xlu1 %1350  ;;  %v1529_v57 = vsel %vm1291_vm1, %v8023_v49, 0.0  ;;  %v8029_v26 = vpop.eup %6289 }
 0x378   : > { %v1456_v44 = vmul.f32 1.442695, %v1406_v24  ;;  %v1407_v9 = vsub.f32 %v7884_v37, %v1351_v58  ;;  %1530 = vadd.xlane.f32.xlu1 %v1529_v57  ;;  %v1523_v51 = vsel %vm1291_vm1, %v8029_v26, 0.0 }
 0x37a   : > { %6291 = vpow2.f32 %v1456_v44  ;;  %v1458_v50 = vmul.f32 1.442695, %v1407_v9  ;;  %1521 = vadd.xlane.f32.xlu0 %v1520_v42 }
 0x37b   : > { %6293 = vpow2.f32 %v1452_v62 }
 0x37c   : > { %6295 = vpow2.f32 %v1458_v50  ;;  %1524 = vadd.xlane.f32.xlu1 %v1523_v51 }
 0x37d   : > { %6297 = vpow2.f32 %v1454_v45 }
 0x381   : > { %v1354_v13 = vpop.xlane.xlu0 %1353 }
 0x382   : > { %v1408_v53 = vsub.f32 %v7893_v6, %v1354_v13 }
 0x383   : > { %v1357_v11 = vpop.xlane.xlu1 %1356 }
 0x384   : > { %v8037_v37 = vpop.eup %6291  ;;  %v1409_v25 = vsub.f32 %v7899_v32, %v1357_v11  ;;  %v1460_v29 = vmul.f32 1.442695, %v1408_v53 }
 0x385   : > { %v8039_v0 = vpop.eup %6293  ;;  %v1360_v2 = vpop.xlane.xlu0 %1359  ;;  %v1538_v46 = vsel %vm1291_vm1, %v8037_v37, 0.0 }
 0x386   : > { %v8043_v18 = vpop.eup %6295  ;;  %v1410_v63 = vsub.f32 %v7896_v41, %v1360_v2  ;;  %1539 = vadd.xlane.f32.xlu0 %v1538_v46  ;;  %v1532_v17 = vsel %vm1291_vm1, %v8039_v0, 0.0  ;;  %v1462_v27 = vmul.f32 1.442695, %v1409_v25 }
 0x387   : > { %v1363_v54 = vpop.xlane.xlu1 %1362  ;;  %v1541_v6 = vsel %vm1291_vm1, %v8043_v18, 0.0  ;;  %v8049_v35 = vpop.eup %6297 }
 0x388   : > { %v1464_v1 = vmul.f32 1.442695, %v1410_v63  ;;  %v1411_v39 = vsub.f32 %v7904_v34, %v1363_v54  ;;  %1542 = vadd.xlane.f32.xlu1 %v1541_v6  ;;  %v1535_v41 = vsel %vm1291_vm1, %v8049_v35, 0.0 }
 0x38a   : > { %6299 = vpow2.f32 %v1464_v1  ;;  %v1466_v32 = vmul.f32 1.442695, %v1411_v39  ;;  %1533 = vadd.xlane.f32.xlu0 %v1532_v17  ;;  %v8083_v17 = vld [vmem:[#allocation6 + $0x8] sm:$0xff]  }
 0x38b   : > { %6301 = vpow2.f32 %v1460_v29  ;;  %5804 = vmatprep.subr.bf16.mxu1 %v8083_v17 }
 0x38c   : > { %6303 = vpow2.f32 %v1466_v32  ;;  %1536 = vadd.xlane.f32.xlu1 %v1535_v41 }
 0x38d   : > { %6305 = vpow2.f32 %v1462_v27 }
 0x391   : > { %v1366_v24 = vpop.xlane.xlu0 %1365 }
 0x392   : > { %v1412_v62 = vsub.f32 %v7913_v61, %v1366_v24 }
 0x393   : > { %v1369_v58 = vpop.xlane.xlu1 %1368 }
 0x394   : > { %v8057_v34 = vpop.eup %6299  ;;  %v1413_v45 = vsub.f32 %v7919_v16, %v1369_v58  ;;  %v1468_v51 = vmul.f32 1.442695, %v1412_v62 }
 0x395   : > { %v8059_v57 = vpop.eup %6301  ;;  %v1372_v44 = vpop.xlane.xlu0 %1371  ;;  %v1550_v9 = vsel %vm1291_vm1, %v8057_v34, 0.0 }
 0x396   : > { %v8063_v42 = vpop.eup %6303  ;;  %v1414_v50 = vsub.f32 %v7916_v20, %v1372_v44  ;;  %1551 = vadd.xlane.f32.xlu0 %v1550_v9  ;;  %v1544_v46 = vsel %vm1291_vm1, %v8059_v57, 0.0  ;;  %v1470_v25 = vmul.f32 1.442695, %v1413_v45 }
 0x397   : > { %v1375_v13 = vpop.xlane.xlu1 %1374  ;;  %v1553_v61 = vsel %vm1291_vm1, %v8063_v42, 0.0  ;;  %v8069_v53 = vpop.eup %6305 }
 0x398   : > { %v1472_v11 = vmul.f32 1.442695, %v1414_v50  ;;  %v1415_v2 = vsub.f32 %v7924_v30, %v1375_v13  ;;  %1554 = vadd.xlane.f32.xlu1 %v1553_v61  ;;  %v1547_v20 = vsel %vm1291_vm1, %v8069_v53, 0.0 }
 0x39a   : > { %6307 = vpow2.f32 %v1472_v11  ;;  %v1474_v16 = vmul.f32 1.442695, %v1415_v2  ;;  %1545 = vadd.xlane.f32.xlu0 %v1544_v46 }
 0x39b   : > { %6309 = vpow2.f32 %v1468_v51 }
 0x39c   : > { %6311 = vpow2.f32 %v1474_v16  ;;  %1548 = vadd.xlane.f32.xlu1 %v1547_v20  ;;  %v10482_v16 = vld [vmem:[#allocation30_spill] sm:$0xff] }
 0x39d   : > { %6313 = vpow2.f32 %v1470_v25 }
 0x3a1   : > { %v1378_v63 = vpop.xlane.xlu0 %1377 }
 0x3a2   : > { %v1416_v29 = vsub.f32 %v7933_v36, %v1378_v63  ;;  %v6771_v63 = vld [vmem:[%s10464_s30] sm:$0xff]  }
 0x3a3   : > { %v1381_v54 = vpop.xlane.xlu1 %1380 }
 0x3a4   : > { %v8077_v30 = vpop.eup %6307  ;;  %v1417_v32 = vsub.f32 %v7939_v14, %v1381_v54  ;;  %v1476_v24 = vmul.f32 1.442695, %v1416_v29  ;;  %v10483_v29 = vld [vmem:[#allocation31_spill] sm:$0xff] }
 0x3a5   : > { %v8079_v6 = vpop.eup %6309  ;;  %v1384_v1 = vpop.xlane.xlu0 %1383  ;;  %v1562_v39 = vsel %vm1291_vm1, %v8077_v30, 0.0 }
 0x3a6   : > { %v8085_v27 = vpop.eup %6311  ;;  %v1418_v41 = vsub.f32 %v7936_v38, %v1384_v1  ;;  %1563 = vadd.xlane.f32.xlu0 %v1562_v39  ;;  %v1556_v45 = vsel %vm1291_vm1, %v8079_v6, 0.0  ;;  %v1478_v14 = vmul.f32 1.442695, %v1417_v32  ;;  %v10484_v39 = vld [vmem:[#allocation33_spill] sm:$0xff]  ;;  %v10485_v32 = vld [vmem:[#allocation32_spill] sm:$0xff] }
 0x3a7   : > { %v1387_v36 = vpop.xlane.xlu1 %1386  ;;  %v1565_v62 = vsel %vm1291_vm1, %v8085_v27, 0.0  ;;  %v8092_v58 = vpop.eup %6313 }
 0x3a8   : > { %v1480_v44 = vmul.f32 1.442695, %v1418_v41  ;;  %v1419_v9 = vsub.f32 %v7944_v19, %v1387_v36  ;;  %1566 = vadd.xlane.f32.xlu1 %v1565_v62  ;;  %v1559_v50 = vsel %vm1291_vm1, %v8092_v58, 0.0  ;;  %v10487_v36 = vld [vmem:[#allocation34_spill] sm:$0xff]  ;;  %v10488_v62 = vld [vmem:[#allocation36_spill] sm:$0xff] }
 0x3aa   : > { %6315 = vpow2.f32 %v1480_v44  ;;  %v1482_v38 = vmul.f32 1.442695, %v1419_v9  ;;  %1557 = vadd.xlane.f32.xlu0 %v1556_v45 }
 0x3ab   : > { %6317 = vpow2.f32 %v1476_v24  ;;  %v10486_v24 = vld [vmem:[#allocation35_spill] sm:$0xff] }
 0x3ac   : > { %6319 = vpow2.f32 %v1482_v38  ;;  %1560 = vadd.xlane.f32.xlu1 %v1559_v50  ;;  %v6772_v50 = vld [vmem:[%s10464_s30 + $0x8] sm:$0xff]  }
 0x3ad   : > { %6321 = vpow2.f32 %v1478_v14 }
 0x3b4   : > { %v8099_v51 = vpop.eup %6315 }
 0x3b5   : > { %v8101_v13 = vpop.eup %6317  ;;  %v1574_v19 = vsel %vm1291_vm1, %v8099_v51, 0.0 }
 0x3b6   : > { %v8105_v61 = vpop.eup %6319  ;;  %1575 = vadd.xlane.f32.xlu0 %v1574_v19  ;;  %v1568_v46 = vsel %vm1291_vm1, %v8101_v13, 0.0 }
 0x3b7   : > { %v1577_v11 = vsel %vm1291_vm1, %v8105_v61, 0.0  ;;  %v8109_v2 = vpop.eup %6321 }
 0x3b8   : > { %1578 = vadd.xlane.f32.xlu1 %v1577_v11  ;;  %v1571_v25 = vsel %vm1291_vm1, %v8109_v2, 0.0 }
 0x3ba   : > { %1569 = vadd.xlane.f32.xlu0 %v1568_v46 }
 0x3bc   : > { %1572 = vadd.xlane.f32.xlu1 %v1571_v25 }
 0x3cd   : > { %1954 = vrot.lane.b32.xlu1 %v10482_v16, %s7039_s22 }
 0x3ce   : > { %v1492_v20 = vpop.xlane.xlu0 %1491 }
 0x3d0   : > { %1970 = vrot.lane.b32.xlu0 %v6771_v63, %s7039_s22 }
 0x3d1   : > { %1956 = vrot.lane.b32.xlu1 %v10483_v29, %s7039_s22 }
 0x3d2   : > { %v1495_v54 = vpop.xlane.xlu1 %1494  ;;  %v1486_v1 = vpop.xlane.xlu0 %1485 }
 0x3d3   : > { %6323 = vrcp.f32 %v1495_v54 }
 0x3d4   : > { %1960 = vrot.lane.b32.xlu0 %v10484_v39, %s7039_s22  ;;  %6325 = vrcp.f32 %v1486_v1 }
 0x3d5   : > { %1958 = vrot.lane.b32.xlu1 %v10485_v32, %s7039_s22  ;;  %6327 = vrcp.f32 %v1492_v20 }
 0x3d6   : > { %v1489_v41 = vpop.xlane.xlu1 %1488 }
 0x3d7   : > { %6329 = vrcp.f32 %v1489_v41 }
 0x3d8   : > { %1964 = vrot.lane.b32.xlu0 %v10486_v24, %s7039_s22 }
 0x3d9   : > { %1962 = vrot.lane.b32.xlu1 %v10487_v36, %s7039_s22 }
 0x3dc   : > { %1968 = vrot.lane.b32.xlu0 %v7627_v48, %s7039_s22 }
 0x3dd   : > { %1966 = vrot.lane.b32.xlu1 %v10488_v62, %s7039_s22  ;;  %v6324_v44 = vpop.eup %6323 }
 0x3de   : > { %v6326_v9 = vpop.eup %6325  ;;  %v1615_v38 = vmul.f32 %v6324_v44, %v7962_v60 }
 0x3df   : > { %v6328_v45 = vpop.eup %6327  ;;  %v1612_v19 = vmul.f32 %v6326_v9, %v7960_v10 }
 0x3e0   : > { %2104 = vrot.lane.b32.xlu0 %v7639_v4, %s7039_s22  ;;  %v1614_v46 = vmul.f32 %v6328_v45, %v7956_v28 }
 0x3e1   : > { %v6330_v14 = vpop.eup %6329  ;;  %2120 = vrot.lane.b32.xlu1 %v6772_v50, %s7039_s22 }
 0x3e2   : > { %v1613_v11 = vmul.f32 %v6330_v14, %v7969_v7  ;;  %v1645_v63 = vpack.c.bf16 %v1615_v38, %v1614_v46 }
 0x3e3   : > { %v1504_v25 = vpop.xlane.xlu0 %1503 }
 0x3e4   : > { %2108 = vrot.lane.b32.xlu0 %v7659_v40, %s7039_s22  ;;  %v1644_v20 = vpack.c.bf16 %v1613_v11, %v1612_v19 }
 0x3e5   : > { %2106 = vrot.lane.b32.xlu1 %v7649_v21, %s7039_s22  ;;  %v1507_v60 = vpop.xlane.xlu1 %1506 }
 0x3e6   : > { %5788 = vmatprep.mubr.msk.bf16.mxu1 %vm1291_vm1, %v1644_v20  ;;  %6331 = vrcp.f32 %v1507_v60 }
 0x3e7   : > { %5789 = vmatmul.mubr.msk.bf16.vlgmr.msra.gmra.mrb[20].mxu1 %vm1291_vm1, %v1645_v63  ;;  %v1498_v10 = vpop.xlane.xlu0 %1497 }
 0x3e8   : > { %6333 = vrcp.f32 %v1498_v10  ;;  %2112 = vrot.lane.b32.xlu0 %v7679_v23, %s7039_s22  ;;  %5805 = vmatpush3.bf16.msra.mxu1 %v8083_v17 }
 0x3e9   : > { %6335 = vrcp.f32 %v1504_v25  ;;  %2110 = vrot.lane.b32.xlu1 %v7669_v59, %s7039_s22  ;;  %v1501_v28 = vpop.xlane.xlu1 %1500 }
 0x3ea   : > { %6337 = vrcp.f32 %v1501_v28 }
 0x3ec   : > { %2116 = vrot.lane.b32.xlu0 %v7699_v31, %s7039_s22 }
 0x3ed   : > { %2114 = vrot.lane.b32.xlu1 %v7689_v52, %s7039_s22 }
 0x3f0   : > { %v6332_v7 = vpop.eup %6331 }
 0x3f1   : > { %2118 = vrot.lane.b32.xlu1 %v7708_v55, %s7039_s22  ;;  %v1619_v44 = vmul.f32 %v6332_v7, %v7983_v56 }
 0x3f2   : > { %v6334_v54 = vpop.eup %6333 }
 0x3f3   : > { %v6336_v1 = vpop.eup %6335  ;;  %v1516_v41 = vpop.xlane.xlu0 %1515  ;;  %v1616_v45 = vmul.f32 %v6334_v54, %v7979_v22 }
 0x3f4   : > { %v6338_v17 = vpop.eup %6337  ;;  %v1618_v38 = vmul.f32 %v6336_v1, %v7977_v33 }
 0x3f5   : > { %v1519_v9 = vpop.xlane.xlu1 %1518  ;;  %v1617_v14 = vmul.f32 %v6338_v17, %v7989_v5 }
 0x3f6   : > { %6339 = vrcp.f32 %v1519_v9  ;;  %v1647_v11 = vpack.c.bf16 %v1619_v44, %v1618_v38 }
 0x3f7   : > { %v1510_v50 = vpop.xlane.xlu0 %1509  ;;  %v1646_v19 = vpack.c.bf16 %v1617_v14, %v1616_v45 }
 0x3f8   : > { %6341 = vrcp.f32 %v1510_v50 }
 0x3f9   : > { %6343 = vrcp.f32 %v1516_v41  ;;  %v1513_v46 = vpop.xlane.xlu1 %1512  ;;  %5792 = vmatprep.mubr.msk.bf16.mxu1 %vm1291_vm1, %v1646_v19 }
 0x3fa   : > { %6345 = vrcp.f32 %v1513_v46  ;;  %5793 = vmatmul.mubr.msk.bf16.gmra.mrb[24].mxu1 %vm1291_vm1, %v1647_v11 }
 0x400   : > { %v6340_v56 = vpop.eup %6339 }
 0x401   : > { %v1623_v5 = vmul.f32 %v6340_v56, %v8003_v12 }
 0x402   : > { %v6342_v25 = vpop.eup %6341 }
 0x403   : > { %v6344_v20 = vpop.eup %6343  ;;  %v1528_v22 = vpop.xlane.xlu0 %1527  ;;  %v1620_v60 = vmul.f32 %v6342_v25, %v7999_v8 }
 0x404   : > { %v6346_v63 = vpop.eup %6345  ;;  %v1622_v28 = vmul.f32 %v6344_v20, %v7997_v47 }
 0x405   : > { %v1531_v33 = vpop.xlane.xlu1 %1530  ;;  %v1621_v10 = vmul.f32 %v6346_v63, %v8009_v15 }
 0x406   : > { %6347 = vrcp.f32 %v1531_v33  ;;  %v1649_v1 = vpack.c.bf16 %v1623_v5, %v1622_v28 }
 0x407   : > { %v1522_v7 = vpop.xlane.xlu0 %1521  ;;  %v1648_v54 = vpack.c.bf16 %v1621_v10, %v1620_v60 }
 0x408   : > { %6349 = vrcp.f32 %v1522_v7 }
 0x409   : > { %6351 = vrcp.f32 %v1528_v22  ;;  %v1525_v41 = vpop.xlane.xlu1 %1524  ;;  %5796 = vmatprep.mubr.msk.bf16.mxu1 %vm1291_vm1, %v1648_v54 }
 0x40a   : > { %6353 = vrcp.f32 %v1525_v41  ;;  %5797 = vmatmul.mubr.msk.bf16.gmra.mrb[28].mxu1 %vm1291_vm1, %v1649_v1 }
 0x410   : > { %v6348_v12 = vpop.eup %6347 }
 0x411   : > { %v1627_v15 = vmul.f32 %v6348_v12, %v8023_v49 }
 0x412   : > { %v6350_v17 = vpop.eup %6349 }
 0x413   : > { %v6352_v44 = vpop.eup %6351  ;;  %v1540_v8 = vpop.xlane.xlu0 %1539  ;;  %v1624_v45 = vmul.f32 %v6350_v17, %v8019_v43 }
 0x414   : > { %v6354_v9 = vpop.eup %6353  ;;  %v1626_v38 = vmul.f32 %v6352_v44, %v8017_v3 }
 0x415   : > { %v1543_v47 = vpop.xlane.xlu1 %1542  ;;  %v1625_v14 = vmul.f32 %v6354_v9, %v8029_v26 }
 0x416   : > { %6355 = vrcp.f32 %v1543_v47  ;;  %v1651_v11 = vpack.c.bf16 %v1627_v15, %v1626_v38 }
 0x417   : > { %v1534_v50 = vpop.xlane.xlu0 %1533  ;;  %v1650_v19 = vpack.c.bf16 %v1625_v14, %v1624_v45 }
 0x418   : > { %6357 = vrcp.f32 %v1534_v50 }
 0x419   : > { %6359 = vrcp.f32 %v1540_v8  ;;  %v1537_v46 = vpop.xlane.xlu1 %1536  ;;  %5800 = vmatprep.mubr.msk.bf16.mxu1 %vm1291_vm1, %v1650_v19 }
 0x41a   : > { %6361 = vrcp.f32 %v1537_v46  ;;  %5801 = vmatmul.mubr.msk.bf16.gmra.mrb[32].mxu1 %vm1291_vm1, %v1651_v11 }
 0x420   : > { %v6356_v49 = vpop.eup %6355 }
 0x421   : > { %v1631_v26 = vmul.f32 %v6356_v49, %v8043_v18 }
 0x422   : > { %v6358_v56 = vpop.eup %6357 }
 0x423   : > { %v6360_v25 = vpop.eup %6359  ;;  %v1552_v43 = vpop.xlane.xlu0 %1551  ;;  %v1628_v22 = vmul.f32 %v6358_v56, %v8039_v0 }
 0x424   : > { %v6362_v20 = vpop.eup %6361  ;;  %v1630_v5 = vmul.f32 %v6360_v25, %v8037_v37 }
 0x425   : > { %v1555_v3 = vpop.xlane.xlu1 %1554  ;;  %v1629_v63 = vmul.f32 %v6362_v20, %v8049_v35 }
 0x426   : > { %6363 = vrcp.f32 %v1555_v3  ;;  %v1653_v10 = vpack.c.bf16 %v1631_v26, %v1630_v5 }
 0x427   : > { %v1546_v33 = vpop.xlane.xlu0 %1545  ;;  %v1652_v60 = vpack.c.bf16 %v1629_v63, %v1628_v22 }
 0x428   : > { %6365 = vrcp.f32 %v1546_v33 }
 0x429   : > { %6367 = vrcp.f32 %v1552_v43  ;;  %v1549_v28 = vpop.xlane.xlu1 %1548  ;;  %5806 = vmatprep.mubr.msk.bf16.mxu1 %vm1291_vm1, %v1652_v60 }
 0x42a   : > { %6369 = vrcp.f32 %v1549_v28  ;;  %5807 = vmatmul.mubr.msk.bf16.vlgmr.msra.gmra.mrb[36].mxu1 %vm1291_vm1, %v1653_v10 }
 0x430   : > { %v6364_v18 = vpop.eup %6363 }
 0x431   : > { %v1635_v35 = vmul.f32 %v6364_v18, %v8063_v42 }
 0x432   : > { %v6366_v7 = vpop.eup %6365 }
 0x433   : > { %v6368_v54 = vpop.eup %6367  ;;  %v1564_v0 = vpop.xlane.xlu0 %1563  ;;  %v1632_v41 = vmul.f32 %v6366_v7, %v8059_v57 }
 0x434   : > { %v6370_v1 = vpop.eup %6369  ;;  %v1634_v17 = vmul.f32 %v6368_v54, %v8057_v34 }
 0x435   : > { %v1567_v37 = vpop.xlane.xlu1 %1566  ;;  %v1633_v12 = vmul.f32 %v6370_v1, %v8069_v53 }
 0x436   : > { %6371 = vrcp.f32 %v1567_v37  ;;  %v1655_v9 = vpack.c.bf16 %v1635_v35, %v1634_v17 }
 0x437   : > { %v1558_v44 = vpop.xlane.xlu0 %1557  ;;  %v1654_v8 = vpack.c.bf16 %v1633_v12, %v1632_v41 }
 0x438   : > { %6373 = vrcp.f32 %v1558_v44 }
 0x439   : > { %6375 = vrcp.f32 %v1564_v0  ;;  %v1561_v15 = vpop.xlane.xlu1 %1560  ;;  %5810 = vmatprep.mubr.msk.bf16.mxu1 %vm1291_vm1, %v1654_v8 }
 0x43a   : > { %6377 = vrcp.f32 %v1561_v15  ;;  %5811 = vmatmul.mubr.msk.bf16.gmra.mrb[40].mxu1 %vm1291_vm1, %v1655_v9 }
 0x440   : > { %v6372_v42 = vpop.eup %6371 }
 0x441   : > { %v1639_v53 = vmul.f32 %v6372_v42, %v8085_v27 }
 0x442   : > { %v6374_v47 = vpop.eup %6373 }
 0x443   : > { %v6376_v45 = vpop.eup %6375  ;;  %v1576_v57 = vpop.xlane.xlu0 %1575  ;;  %v1636_v38 = vmul.f32 %v6374_v47, %v8079_v6 }
 0x444   : > { %v6378_v14 = vpop.eup %6377  ;;  %v1638_v19 = vmul.f32 %v6376_v45, %v8077_v30 }
 0x445   : > { %v1579_v34 = vpop.xlane.xlu1 %1578  ;;  %v1637_v50 = vmul.f32 %v6378_v14, %v8092_v58 }
 0x446   : > { %6379 = vrcp.f32 %v1579_v34  ;;  %v1657_v49 = vpack.c.bf16 %v1639_v53, %v1638_v19 }
 0x447   : > { %v1570_v11 = vpop.xlane.xlu0 %1569  ;;  %v1656_v46 = vpack.c.bf16 %v1637_v50, %v1636_v38 }
 0x448   : > { %6381 = vrcp.f32 %v1570_v11 }
 0x449   : > { %6383 = vrcp.f32 %v1576_v57  ;;  %v1573_v56 = vpop.xlane.xlu1 %1572  ;;  %5814 = vmatprep.mubr.msk.bf16.mxu1 %vm1291_vm1, %v1656_v46 }
 0x44a   : > { %6385 = vrcp.f32 %v1573_v56  ;;  %5815 = vmatmul.mubr.msk.bf16.gmra.mrb[44].mxu1 %vm1291_vm1, %v1657_v49 }
 0x44b   : > { %v1971_v27 = vpop.permute.xlu0 %1970 }
 0x44c   : > { %6091 = vmatprep.subr.msk.bf16.mxu1 %vm1037_vm0, %v1971_v27  ;;  %v1997_v6 = vsel %vm1037_vm0, %v1971_v27, 0 }
 0x44d   : > { %v1955_v58 = vpop.permute.xlu1 %1954  ;;  %5823 = vmatpush3.bf16.xpose.msra.mxu1 %v1997_v6 }
 0x44f   : > { %v1961_v30 = vpop.permute.xlu0 %1960 }
 0x450   : > { %v6380_v25 = vpop.eup %6379 }
 0x451   : > { %v1957_v43 = vpop.permute.xlu1 %1956  ;;  %v1643_v63 = vmul.f32 %v6380_v25, %v8105_v61 }
 0x452   : > { %v6382_v20 = vpop.eup %6381 }
 0x453   : > { %v6384_v26 = vpop.eup %6383  ;;  %v1965_v3 = vpop.permute.xlu0 %1964  ;;  %v1640_v33 = vmul.f32 %v6382_v20, %v8101_v13 }
 0x454   : > { %v6386_v22 = vpop.eup %6385  ;;  %v1642_v10 = vmul.f32 %v6384_v26, %v8099_v51 }
 0x455   : > { %v1959_v5 = vpop.permute.xlu1 %1958  ;;  %v1641_v60 = vmul.f32 %v6386_v22, %v8109_v2 }
 0x456   : > { %v1659_v7 = vpack.c.bf16 %v1643_v63, %v1642_v10 }
 0x457   : > { %v1969_v28 = vpop.permute.xlu0 %1968  ;;  %v1658_v18 = vpack.c.bf16 %v1641_v60, %v1640_v33 }
 0x459   : > { %v1963_v54 = vpop.permute.xlu1 %1962  ;;  %5818 = vmatprep.mubr.msk.bf16.mxu1 %vm1291_vm1, %v1658_v18 }
 0x45a   : > { %5819 = vmatmul.mubr.msk.bf16.gmra.mrb[48].mxu1 %vm1291_vm1, %v1659_v7 }
 0x45b   : > { %5824 = vmatprep.mubr.msk.bf16.mxu1 %vm1037_vm0, %v1955_v58  ;;  %v2105_v0 = vpop.permute.xlu0 %2104 }
 0x45c   : > { %5842 = vmatprep.mubr.msk.bf16.mxu0 %vm1037_vm0, %v2105_v0 }
 0x45d   : > { %v1967_v61 = vpop.permute.xlu1 %1966 }
 0x45f   : > { %v2109_v2 = vpop.permute.xlu0 %2108 }
 0x461   : > { %v2121_v1 = vpop.permute.xlu1 %2120 }
 0x462   : > { %5825 = vmatmul.mubr.msk.bf16.vlgmr.msra.gmra.mrb[52].mxu1 %vm1037_vm0, %v1957_v43  ;;  %6092 = vmatprep.subr.msk.bf16.mxu0 %vm1037_vm0, %v2121_v1  ;;  %v2147_v51 = vsel %vm1037_vm0, %v2121_v1, 0 }
 0x463   : > { %5828 = vmatprep.mubr.msk.bf16.mxu1 %vm1037_vm0, %v1959_v5  ;;  %5841 = vmatpush3.bf16.xpose.msra.mxu0 %v2147_v51  ;;  %v2113_v37 = vpop.permute.xlu0 %2112 }
 0x465   : > { %v2107_v13 = vpop.permute.xlu1 %2106 }
 0x467   : > { %v2117_v12 = vpop.permute.xlu0 %2116 }
 0x469   : > { %v2111_v35 = vpop.permute.xlu1 %2110 }
 0x46a   : > { %5829 = vmatmul.mubr.msk.bf16.gmra.mrb[56].mxu1 %vm1037_vm0, %v1961_v30  ;;  %5843 = vmatmul.mubr.msk.bf16.vlgmr.msra.gmra.mrb[76].mxu0 %vm1037_vm0, %v2107_v13 }
 0x46b   : > { %5832 = vmatprep.mubr.msk.bf16.mxu1 %vm1037_vm0, %v1963_v54  ;;  %5846 = vmatprep.mubr.msk.bf16.mxu0 %vm1037_vm0, %v2109_v2 }
 0x46d   : > { %v2115_v41 = vpop.permute.xlu1 %2114 }
 0x471   : > { %v2119_v17 = vpop.permute.xlu1 %2118 }
 0x472   : > { %5833 = vmatmul.mubr.msk.bf16.gmra.mrb[60].mxu1 %vm1037_vm0, %v1965_v3  ;;  %5847 = vmatmul.mubr.msk.bf16.gmra.mrb[80].mxu0 %vm1037_vm0, %v2111_v35 }
 0x473   : > { %5836 = vmatprep.mubr.msk.bf16.mxu1 %vm1037_vm0, %v1967_v61  ;;  %5850 = vmatprep.mubr.msk.bf16.mxu0 %vm1037_vm0, %v2113_v37 }
 0x47a   : > { %5837 = vmatmul.mubr.msk.bf16.gmra.mrb[64].mxu1 %vm1037_vm0, %v1969_v28  ;;  %5851 = vmatmul.mubr.msk.bf16.gmra.mrb[84].mxu0 %vm1037_vm0, %v2115_v41 }
 0x47b   : > { %5854 = vmatprep.mubr.msk.bf16.mxu0 %vm1037_vm0, %v2117_v12 }
 0x482   : > { %5855 = vmatmul.mubr.msk.bf16.gmra.mrb[88].mxu0 %vm1037_vm0, %v2119_v17 }
 0x4ba   : > { %v5790_v44 = vpop.f32.mrb[20].mxu1 }
 0x4bb   : > { %v1724_v8 = vpop.f32.mrb[21].mxu1 }
 0x4bc   : > { %v5791_v9 = vpop.f32.mrb[22].mxu1 }
 0x4bd   : > { %v1915_v15 = vpack.c.bf16 %v5791_v9, %v5790_v44  ;;  %v1727_v42 = vpop.f32.mrb[23].mxu1 }
 0x4be   : > { %v1914_v47 = vpack.c.bf16 %v1727_v42, %v1724_v8 }
 0x4bf   : > { %1931 = vst.msk [vmem:[#allocation2 + $0x8] sm:$0xff] %vm1037_vm0, %v1915_v15 }
 0x4c0   : > { %1930 = vst.msk [vmem:[#allocation2] sm:$0xff] %vm1037_vm0, %v1914_v47 }
 0x4cd   : > { %v5794_v45 = vpop.f32.mrb[24].mxu1 }
 0x4ce   : > { %v1740_v57 = vpop.f32.mrb[25].mxu1 }
 0x4cf   : > { %v5795_v14 = vpop.f32.mrb[26].mxu1 }
 0x4d0   : > { %v1917_v53 = vpack.c.bf16 %v5795_v14, %v5794_v45  ;;  %v1743_v34 = vpop.f32.mrb[27].mxu1  ;;  %v8255_v14 = vld [vmem:[%s10481_s27] sm:$0xff] }
 0x4d1   : > { %v1916_v38 = vpack.c.bf16 %v1743_v34, %v1740_v57 }
 0x4d2   : > { %1933 = vst.msk [vmem:[#allocation2 + $0x18] sm:$0xff] %vm1037_vm0, %v1917_v53 }
 0x4d3   : > { %1932 = vst.msk [vmem:[#allocation2 + $0x10] sm:$0xff] %vm1037_vm0, %v1916_v38 }
 0x4dd   : > { %v5798_v50 = vpop.f32.mrb[28].mxu1 }
 0x4de   : > { %v1756_v19 = vpop.f32.mrb[29].mxu1 }
 0x4df   : > { %v5799_v11 = vpop.f32.mrb[30].mxu1 }
 0x4e0   : > { %v1919_v46 = vpack.c.bf16 %v5799_v11, %v5798_v50  ;;  %v1759_v49 = vpop.f32.mrb[31].mxu1  ;;  %v8267_v11 = vld [vmem:[%s10481_s27 + $0x10] sm:$0xff] }
 0x4e1   : > { %v1918_v56 = vpack.c.bf16 %v1759_v49, %v1756_v19  ;;  %v8275_v49 = vld [vmem:[%s10481_s27 + $0x8] sm:$0xff] }
 0x4e2   : > { %1935 = vst.msk [vmem:[#allocation2 + $0x28] sm:$0xff] %vm1037_vm0, %v1919_v46 }
 0x4e3   : > { %1934 = vst.msk [vmem:[#allocation2 + $0x20] sm:$0xff] %vm1037_vm0, %v1918_v56 }
 0x4ed   : > { %v5802_v27 = vpop.f32.mrb[32].mxu1 }
 0x4ee   : > { %v1772_v6 = vpop.f32.mrb[33].mxu1 }
 0x4ef   : > { %v5803_v58 = vpop.f32.mrb[34].mxu1 }
 0x4f0   : > { %v1921_v30 = vpack.c.bf16 %v5803_v58, %v5802_v27  ;;  %v1775_v25 = vpop.f32.mrb[35].mxu1 }
 0x4f1   : > { %v1920_v43 = vpack.c.bf16 %v1775_v25, %v1772_v6  ;;  %v8285_v6 = vld [vmem:[%s10481_s27 + $0x18] sm:$0xff] }
 0x4f2   : > { %1937 = vst.msk [vmem:[#allocation2 + $0x38] sm:$0xff] %vm1037_vm0, %v1921_v30 }
 0x4f3   : > { %1936 = vst.msk [vmem:[#allocation2 + $0x30] sm:$0xff] %vm1037_vm0, %v1920_v43 }
 0x4fd   : > { %v5808_v20 = vpop.f32.mrb[36].mxu1 }
 0x4fe   : > { %v1851_v26 = vpop.f32.mrb[37].mxu1 }
 0x4ff   : > { %v5809_v3 = vpop.f32.mrb[38].mxu1 }
 0x500   : > { %v1923_v22 = vpack.c.bf16 %v5809_v3, %v5808_v20  ;;  %v1854_v63 = vpop.f32.mrb[39].mxu1 }
 0x501   : > { %v1922_v5 = vpack.c.bf16 %v1854_v63, %v1851_v26 }
 0x502   : > { %1939 = vst.msk [vmem:[#allocation2 + $0x48] sm:$0xff] %vm1037_vm0, %v1923_v22  ;;  %v8301_v22 = vld [vmem:[%s10481_s27 + $0x20] sm:$0xff] }
 0x503   : > { %1938 = vst.msk [vmem:[#allocation2 + $0x40] sm:$0xff] %vm1037_vm0, %v1922_v5 }
 0x50d   : > { %v5812_v33 = vpop.f32.mrb[40].mxu1 }
 0x50e   : > { %v1867_v60 = vpop.f32.mrb[41].mxu1 }
 0x50f   : > { %v5813_v10 = vpop.f32.mrb[42].mxu1 }
 0x510   : > { %v1925_v28 = vpack.c.bf16 %v5813_v10, %v5812_v33  ;;  %v1870_v18 = vpop.f32.mrb[43].mxu1 }
 0x511   : > { %v1924_v7 = vpack.c.bf16 %v1870_v18, %v1867_v60  ;;  %v8315_v18 = vld [vmem:[%s10481_s27 + $0x30] sm:$0xff] }
 0x512   : > { %1941 = vst.msk [vmem:[#allocation2 + $0x58] sm:$0xff] %vm1037_vm0, %v1925_v28 }
 0x513   : > { %1940 = vst.msk [vmem:[#allocation2 + $0x50] sm:$0xff] %vm1037_vm0, %v1924_v7 }
 0x51d   : > { %v5816_v54 = vpop.f32.mrb[44].mxu1 }
 0x51e   : > { %v1883_v0 = vpop.f32.mrb[45].mxu1 }
 0x51f   : > { %v5817_v61 = vpop.f32.mrb[46].mxu1 }
 0x520   : > { %v1927_v1 = vpack.c.bf16 %v5817_v61, %v5816_v54  ;;  %v1886_v51 = vpop.f32.mrb[47].mxu1  ;;  %v8323_v54 = vld [vmem:[%s10481_s27 + $0x28] sm:$0xff] }
 0x521   : > { %v1926_v13 = vpack.c.bf16 %v1886_v51, %v1883_v0 }
 0x522   : > { %1943 = vst.msk [vmem:[#allocation2 + $0x68] sm:$0xff] %vm1037_vm0, %v1927_v1  ;;  %v6780_v1 = vld [vmem:[%s10481_s27 + $0x38] sm:$0xff] }
 0x523   : > { %1942 = vst.msk [vmem:[#allocation2 + $0x60] sm:$0xff] %vm1037_vm0, %v1926_v13 }
 0x52d   : > { %v5820_v2 = vpop.f32.mrb[48].mxu1 }
 0x52e   : > { %v1899_v35 = vpop.f32.mrb[49].mxu1 }
 0x52f   : > { %v5821_v37 = vpop.f32.mrb[50].mxu1 }
 0x530   : > { %v1929_v41 = vpack.c.bf16 %v5821_v37, %v5820_v2  ;;  %v1902_v12 = vpop.f32.mrb[51].mxu1 }
 0x531   : > { %v1928_v17 = vpack.c.bf16 %v1902_v12, %v1899_v35 }
 0x532   : > { %1945 = vst.msk [vmem:[#allocation2 + $0x78] sm:$0xff] %vm1037_vm0, %v1929_v41 }
 0x533   : > { %1944 = vst.msk [vmem:[#allocation2 + $0x70] sm:$0xff] %vm1037_vm0, %v1928_v17  ;;  %v8346_v17 = vld [vmem:[%s10481_s27 + $0x40] sm:$0xff] }
 0x535   : > { %v8240_v44 = vpop.f32.mrb[52].mxu1 }
 0x536   : > { %v8242_v8 = vpop.f32.mrb[53].mxu1 }
 0x537   : > { %v8244_v9 = vpop.f32.mrb[54].mxu1  ;;  %v8424_v31 = vadd.f32 %v8255_v14, %v8242_v8 }
 0x538   : > { %v8246_v15 = vpop.f32.mrb[55].mxu1 }
 0x53d   : > { %v8248_v42 = vpop.f32.mrb[56].mxu1  ;;  %v5844_v47 = vpop.f32.mrb[76].mxu0 }
 0x53e   : > { %v8250_v45 = vpop.f32.mrb[57].mxu1  ;;  %v2183_v57 = vpop.f32.mrb[77].mxu0  ;;  %v8270_v46 = vadd.f32 %v8267_v11, %v5844_v47 }
 0x53f   : > { %v8258_v53 = vadd.f32 %v8255_v14, %v2183_v57  ;;  %v8260_v34 = vpop.f32.mrb[58].mxu1  ;;  %v5845_v38 = vpop.f32.mrb[78].mxu0 }
 0x540   : > { %v8262_v50 = vpop.f32.mrb[59].mxu1  ;;  %v2186_v19 = vpop.f32.mrb[79].mxu0  ;;  %v8288_v58 = vadd.f32 %v8285_v6, %v5845_v38  ;;  %v2300_v20 = vsel %vm1291_vm1, %v8270_v46, -inf }
 0x541   : > { %v8278_v56 = vadd.f32 %v8275_v49, %v2186_v19  ;;  %v2294_v27 = vsel %vm1291_vm1, %v8258_v53, -inf  ;;  %v8441_v8 = vadd.f32 %v8323_v54, %v8262_v50  ;;  %v8458_v50 = vadd.f32 %v8301_v22, %v8250_v45 }
 0x542   : > { %2295 = vmax.xlane.f32.xlu0 %v2294_v27  ;;  %v2303_v60 = vsel %vm1291_vm1, %v8288_v58, -inf }
 0x543   : > { %v2297_v30 = vsel %vm1291_vm1, %v8278_v56, -inf }
 0x544   : > { %2298 = vmax.xlane.f32.xlu1 %v2297_v30 }
 0x545   : > { %v8292_v25 = vpop.f32.mrb[60].mxu1  ;;  %v5848_v43 = vpop.f32.mrb[80].mxu0 }
 0x546   : > { %v8296_v26 = vpop.f32.mrb[61].mxu1  ;;  %2301 = vmax.xlane.f32.xlu0 %v2300_v20  ;;  %v2199_v3 = vpop.f32.mrb[81].mxu0  ;;  %v8318_v7 = vadd.f32 %v8315_v18, %v5848_v43  ;;  %v6782_v43 = vld [vmem:[%s10481_s27 + $0x50] sm:$0xff] }
 0x547   : > { %v8304_v63 = vadd.f32 %v8301_v22, %v2199_v3  ;;  %v8306_v5 = vpop.f32.mrb[62].mxu1  ;;  %v5849_v33 = vpop.f32.mrb[82].mxu0  ;;  %v6783_v3 = vld [vmem:[%s10481_s27 + $0x48] sm:$0xff]  ;;  %v8476_v22 = vadd.f32 %v8346_v17, %v8296_v26 }
 0x548   : > { %v8310_v10 = vpop.f32.mrb[63].mxu1  ;;  %2304 = vmax.xlane.f32.xlu1 %v2303_v60  ;;  %v2202_v28 = vpop.f32.mrb[83].mxu0  ;;  %v8333_v51 = vadd.f32 %v6780_v1, %v5849_v33  ;;  %v2312_v37 = vsel %vm1291_vm1, %v8318_v7, -inf }
 0x549   : > { %v8326_v0 = vadd.f32 %v8323_v54, %v2202_v28  ;;  %v2306_v61 = vsel %vm1291_vm1, %v8304_v63, -inf  ;;  %v6784_v28 = vld [vmem:[%s10481_s27 + $0x58] sm:$0xff] }
 0x54a   : > { %2307 = vmax.xlane.f32.xlu0 %v2306_v61  ;;  %v2315_v19 = vsel %vm1291_vm1, %v8333_v51, -inf }
 0x54b   : > { %v2309_v13 = vsel %vm1291_vm1, %v8326_v0, -inf }
 0x54c   : > { %2310 = vmax.xlane.f32.xlu1 %v2309_v13 }
 0x54d   : > { %v8337_v2 = vpop.f32.mrb[64].mxu1  ;;  %v5852_v35 = vpop.f32.mrb[84].mxu0 }
 0x54e   : > { %v8341_v41 = vpop.f32.mrb[65].mxu1  ;;  %2313 = vmax.xlane.f32.xlu0 %v2312_v37  ;;  %v2215_v12 = vpop.f32.mrb[85].mxu0  ;;  %v8360_v20 = vadd.f32 %v6782_v43, %v5852_v35 }
 0x54f   : > { %v8349_v47 = vadd.f32 %v8346_v17, %v2215_v12  ;;  %v8351_v57 = vpop.f32.mrb[66].mxu1  ;;  %v5853_v38 = vpop.f32.mrb[86].mxu0  ;;  %v6789_v17 = vld [vmem:[#allocation6] sm:$0xff]  }
 0x550   : > { %v8355_v27 = vpop.f32.mrb[67].mxu1  ;;  %2316 = vmax.xlane.f32.xlu1 %v2315_v19  ;;  %v2218_v30 = vpop.f32.mrb[87].mxu0  ;;  %v8372_v61 = vadd.f32 %v6784_v28, %v5853_v38  ;;  %v2324_v37 = vsel %vm1291_vm1, %v8360_v20, -inf  ;;  %v6785_v19 = vld [vmem:[%s10481_s27 + $0x60] sm:$0xff] }
 0x551   : > { %v8365_v33 = vadd.f32 %v6783_v3, %v2218_v30  ;;  %v2318_v60 = vsel %vm1291_vm1, %v8349_v47, -inf }
 0x552   : > { %2319 = vmax.xlane.f32.xlu0 %v2318_v60  ;;  %v2327_v38 = vsel %vm1291_vm1, %v8372_v61, -inf }
 0x553   : > { %v2321_v13 = vsel %vm1291_vm1, %v8365_v33, -inf }
 0x554   : > { %2322 = vmax.xlane.f32.xlu1 %v2321_v13  ;;  %v6786_v13 = vld [vmem:[%s10481_s27 + $0x70] sm:$0xff] }
 0x555   : > { %v5856_v35 = vpop.f32.mrb[88].mxu0 }
 0x556   : > { %2325 = vmax.xlane.f32.xlu0 %v2324_v37  ;;  %v2231_v12 = vpop.f32.mrb[89].mxu0  ;;  %v8388_v52 = vadd.f32 %v6786_v13, %v5856_v35  ;;  %v8393_v37 = vld [vmem:[%s10481_s27 + $0x68] sm:$0xff] }
 0x557   : > { %v8381_v30 = vadd.f32 %v6785_v19, %v2231_v12  ;;  %v5857_v60 = vpop.f32.mrb[90].mxu0 }
 0x558   : > { %2328 = vmax.xlane.f32.xlu1 %v2327_v38  ;;  %v2234_v55 = vpop.f32.mrb[91].mxu0  ;;  %v8403_v38 = vld [vmem:[%s10481_s27 + $0x78] sm:$0xff]  ;;  %v2336_v39 = vsel %vm1291_vm1, %v8388_v52, -inf }
 0x559   : > { %v8396_v12 = vadd.f32 %v8393_v37, %v2234_v55  ;;  %v2330_v59 = vsel %vm1291_vm1, %v8381_v30, -inf  ;;  %v8406_v35 = vadd.f32 %v8403_v38, %v5857_v60  ;;  %v8412_v55 = vadd.f32 %v8267_v11, %v8240_v44 }
 0x55a   : > { %2331 = vmax.xlane.f32.xlu0 %v2330_v59  ;;  %v8418_v59 = vadd.f32 %v8275_v49, %v8246_v15  ;;  %v8429_v44 = vadd.f32 %v6780_v1, %v8260_v34  ;;  %v8435_v15 = vadd.f32 %v8285_v6, %v8244_v9  ;;  %v2246_v11 = vsel %vm1291_vm1, %v8424_v31, -inf }
 0x55b   : > { %v2333_v21 = vsel %vm1291_vm1, %v8396_v12, -inf  ;;  %v2339_v60 = vsel %vm1291_vm1, %v8406_v35, -inf  ;;  %v8447_v34 = vadd.f32 %v8315_v18, %v8248_v42  ;;  %v8452_v49 = vadd.f32 %v6784_v28, %v8306_v5 }
 0x55c   : > { %2334 = vmax.xlane.f32.xlu1 %v2333_v21  ;;  %v2252_v21 = vsel %vm1291_vm1, %v8412_v55, -inf  ;;  %v2267_v14 = vsel %vm1291_vm1, %v8429_v44, -inf  ;;  %v2255_v9 = vsel %vm1291_vm1, %v8435_v15, -inf  ;;  %v2261_v6 = vsel %vm1291_vm1, %v8441_v8, -inf }
 0x55d   : > { %v2264_v54 = vsel %vm1291_vm1, %v8447_v34, -inf  ;;  %v8463_v42 = vadd.f32 %v6783_v3, %v8310_v10  ;;  %v2279_v18 = vsel %vm1291_vm1, %v8452_v49, -inf  ;;  %v8468_v5 = vadd.f32 %v6782_v43, %v8292_v25 }
 0x55e   : > { %2337 = vmax.xlane.f32.xlu0 %v2336_v39  ;;  %v2249_v39 = vsel %vm1291_vm1, %v8418_v59, -inf  ;;  %v2258_v1 = vsel %vm1291_vm1, %v8458_v50, -inf  ;;  %v8481_v3 = vadd.f32 %v6786_v13, %v8337_v2  ;;  %v2270_v25 = vsel %vm1291_vm1, %v8476_v22, -inf }
 0x55f   : > { %v2273_v45 = vsel %vm1291_vm1, %v8463_v42, -inf  ;;  %v2276_v10 = vsel %vm1291_vm1, %v8468_v5, -inf  ;;  %v8486_v43 = vadd.f32 %v6785_v19, %v8341_v41 }
 0x560   : > { %2340 = vmax.xlane.f32.xlu1 %v2339_v60  ;;  %v2288_v28 = vsel %vm1291_vm1, %v8481_v3, -inf }
 0x561   : > { %v2282_v26 = vsel %vm1291_vm1, %v8486_v43, -inf }
 0x562   : > { %2253 = vmax.xlane.f32.xlu0 %v2252_v21 }
 0x564   : > { %2250 = vmax.xlane.f32.xlu1 %v2249_v39 }
 0x566   : > { %2247 = vmax.xlane.f32.xlu0 %v2246_v11 }
 0x568   : > { %2268 = vmax.xlane.f32.xlu1 %v2267_v14 }
 0x56a   : > { %2256 = vmax.xlane.f32.xlu0 %v2255_v9 }
 0x56c   : > { %2262 = vmax.xlane.f32.xlu1 %v2261_v6 }
 0x56e   : > { %2265 = vmax.xlane.f32.xlu0 %v2264_v54 }
 0x570   : > { %2280 = vmax.xlane.f32.xlu1 %v2279_v18 }
 0x572   : > { %2259 = vmax.xlane.f32.xlu0 %v2258_v1 }
 0x574   : > { %2274 = vmax.xlane.f32.xlu1 %v2273_v45 }
 0x576   : > { %2277 = vmax.xlane.f32.xlu0 %v2276_v10 }
 0x57a   : > { %2271 = vmax.xlane.f32.xlu0 %v2270_v25 }
 0x57e   : > { %2289 = vmax.xlane.f32.xlu0 %v2288_v28 }
 0x582   : > { %2283 = vmax.xlane.f32.xlu0 %v2282_v26 }
 0x598   : > { %2614 = vrot.lane.b32.xlu0 %v6789_v17, %s7039_s22 }
 0x5cf   : > { %v2296_v2 = vpop.xlane.xlu0 %2295 }
 0x5d0   : > { %v2358_v13 = vsub.f32 %v8258_v53, %v2296_v2 }
 0x5d1   : > { %v2299_v60 = vpop.xlane.xlu1 %2298 }
 0x5d2   : > { %v2406_v21 = vmul.f32 1.442695, %v2358_v13  ;;  %v2359_v39 = vsub.f32 %v8278_v56, %v2299_v60 }
 0x5d3   : > { %v2302_v41 = vpop.xlane.xlu0 %2301 }
 0x5d4   : > { %6387 = vpow2.f32 %v2406_v21  ;;  %v2408_v19 = vmul.f32 1.442695, %v2359_v39  ;;  %v2360_v11 = vsub.f32 %v8270_v46, %v2302_v41 }
 0x5d5   : > { %v2305_v14 = vpop.xlane.xlu1 %2304 }
 0x5d6   : > { %6389 = vpow2.f32 %v2408_v19  ;;  %v2410_v9 = vmul.f32 1.442695, %v2360_v11  ;;  %v2361_v6 = vsub.f32 %v8288_v58, %v2305_v14 }
 0x5d7   : > { %v2308_v54 = vpop.xlane.xlu0 %2307 }
 0x5d8   : > { %6391 = vpow2.f32 %v2410_v9  ;;  %v2412_v1 = vmul.f32 1.442695, %v2361_v6  ;;  %v2362_v53 = vsub.f32 %v8304_v63, %v2308_v54 }
 0x5d9   : > { %v2311_v18 = vpop.xlane.xlu1 %2310 }
 0x5da   : > { %6393 = vpow2.f32 %v2412_v1  ;;  %v2414_v28 = vmul.f32 1.442695, %v2362_v53  ;;  %v2363_v46 = vsub.f32 %v8326_v0, %v2311_v18 }
 0x5db   : > { %v2314_v45 = vpop.xlane.xlu0 %2313 }
 0x5dc   : > { %v2364_v10 = vsub.f32 %v8318_v7, %v2314_v45  ;;  %v2416_v13 = vmul.f32 1.442695, %v2363_v46 }
 0x5dd   : > { %v2317_v56 = vpop.xlane.xlu1 %2316 }
 0x5de   : > { %v8499_v25 = vpop.eup %6387  ;;  %v2418_v26 = vmul.f32 1.442695, %v2364_v10  ;;  %v2365_v7 = vsub.f32 %v8333_v51, %v2317_v56 }
 0x5df   : > { %v2320_v17 = vpop.xlane.xlu0 %2319  ;;  %v2486_v58 = vsel %vm1291_vm1, %v8499_v25, 0.0 }
 0x5e0   : > { %v8504_v2 = vpop.eup %6389  ;;  %6395 = vpow2.f32 %v2418_v26  ;;  %2487 = vadd.xlane.f32.xlu1 %v2486_v58  ;;  %v2420_v41 = vmul.f32 1.442695, %v2365_v7  ;;  %v2366_v53 = vsub.f32 %v8349_v47, %v2320_v17 }
 0x5e1   : > { %v2323_v63 = vpop.xlane.xlu1 %2322  ;;  %6397 = vpow2.f32 %v2414_v28  ;;  %v2489_v21 = vsel %vm1291_vm1, %v8504_v2, 0.0 }
 0x5e2   : > { %v8509_v39 = vpop.eup %6391  ;;  %6399 = vpow2.f32 %v2416_v13  ;;  %v2422_v26 = vmul.f32 1.442695, %v2366_v53  ;;  %v2367_v58 = vsub.f32 %v8365_v33, %v2323_v63 }
 0x5e3   : > { %v2326_v60 = vpop.xlane.xlu0 %2325  ;;  %v2492_v11 = vsel %vm1291_vm1, %v8509_v39, 0.0  ;;  %6401 = vpow2.f32 %v2420_v41 }
 0x5e4   : > { %2490 = vadd.xlane.f32.xlu1 %v2489_v21  ;;  %v8515_v14 = vpop.eup %6393  ;;  %v2424_v41 = vmul.f32 1.442695, %v2367_v58 }
 0x5e5   : > { %v2329_v0 = vpop.xlane.xlu1 %2328  ;;  %v2495_v54 = vsel %vm1291_vm1, %v8515_v14, 0.0 }
 0x5e7   : > { %v8511_v19 = vpop.xlane.xlu0 %2331 }
 0x5e8   : > { %2493 = vadd.xlane.f32.xlu1 %v2492_v11 }
 0x5e9   : > { %v8519_v51 = vpop.xlane.xlu1 %2334 }
 0x5ea   : > { %v8517_v9 = vpop.eup %6395 }
 0x5eb   : > { %v8521_v6 = vpop.xlane.xlu0 %2337  ;;  %v2504_v18 = vsel %vm1291_vm1, %v8517_v9, 0.0  ;;  %v8527_v1 = vpop.eup %6397 }
 0x5ec   : > { %2496 = vadd.xlane.f32.xlu1 %v2495_v54  ;;  %2505 = vadd.xlane.f32.xlu0 %v2504_v18  ;;  %v2498_v10 = vsel %vm1291_vm1, %v8527_v1, 0.0  ;;  %v8532_v56 = vpop.eup %6399  ;;  %v8546_v54 = vadd.f32 %v8403_v38, %v8351_v57 }
 0x5ed   : > { %v8535_v46 = vpop.xlane.xlu1 %2340  ;;  %v2501_v21 = vsel %vm1291_vm1, %v8532_v56, 0.0  ;;  %v8540_v47 = vpop.eup %6401 }
 0x5ee   : > { %v2507_v18 = vsel %vm1291_vm1, %v8540_v47, 0.0  ;;  %v2291_v57 = vsel %vm1291_vm1, %v8546_v54, -inf }
 0x5ef   : > { %v2254_v45 = vpop.xlane.xlu0 %2253 }
 0x5f0   : > { %v2344_v28 = vsub.f32 %v8412_v55, %v2254_v45  ;;  %2499 = vadd.xlane.f32.xlu1 %v2498_v10  ;;  %v2368_v55 = vsub.f32 %v8360_v20, %v2326_v60  ;;  %v8553_v45 = vadd.f32 %v8393_v37, %v8355_v27 }
 0x5f1   : > { %v2251_v33 = vpop.xlane.xlu1 %2250 }
 0x5f2   : > { %v2378_v13 = vmul.f32 1.442695, %v2344_v28  ;;  %v2426_v53 = vmul.f32 1.442695, %v2368_v55  ;;  %v2285_v27 = vsel %vm1291_vm1, %v8553_v45, -inf }
 0x5f3   : > { %v2248_v7 = vpop.xlane.xlu0 %2247 }
 0x5f4   : > { %6403 = vpow2.f32 %v2378_v13  ;;  %v2342_v17 = vsub.f32 %v8424_v31, %v2248_v7  ;;  %2502 = vadd.xlane.f32.xlu1 %v2501_v21  ;;  %v2369_v31 = vsub.f32 %v8372_v61, %v2329_v0 }
 0x5f5   : > { %6405 = vpow2.f32 %v2422_v26  ;;  %v2269_v60 = vpop.xlane.xlu1 %2268 }
 0x5f6   : > { %v2374_v11 = vmul.f32 1.442695, %v2342_v17  ;;  %v2428_v28 = vmul.f32 1.442695, %v2369_v31 }
 0x5f7   : > { %v2257_v63 = vpop.xlane.xlu0 %2256 }
 0x5f8   : > { %6407 = vpow2.f32 %v2374_v11  ;;  %2508 = vadd.xlane.f32.xlu1 %v2507_v18  ;;  %v2345_v26 = vsub.f32 %v8435_v15, %v2257_v63  ;;  %v2343_v15 = vsub.f32 %v8418_v59, %v2251_v33  ;;  %v2349_v59 = vsub.f32 %v8429_v44, %v2269_v60 }
 0x5f9   : > { %6409 = vpow2.f32 %v2424_v41  ;;  %v2263_v17 = vpop.xlane.xlu1 %2262 }
 0x5fa   : > { %6411 = vpow2.f32 %v2426_v53  ;;  %v2380_v7 = vmul.f32 1.442695, %v2345_v26  ;;  %v2376_v18 = vmul.f32 1.442695, %v2343_v15  ;;  %v2347_v26 = vsub.f32 %v8441_v8, %v2263_v17 }
 0x5fb   : > { %v2266_v20 = vpop.xlane.xlu0 %2265 }
 0x5fc   : > { %v2348_v38 = vsub.f32 %v8447_v34, %v2266_v20  ;;  %2292 = vmax.xlane.f32.xlu1 %v2291_v57  ;;  %v2384_v8 = vmul.f32 1.442695, %v2347_v26 }
 0x5fe   : > { %v8558_v10 = vpop.eup %6403  ;;  %v2386_v58 = vmul.f32 1.442695, %v2348_v38  ;;  %v2281_v38 = vpop.xlane.xlu1 %2280 }
 0x5ff   : > { %v2260_v61 = vpop.xlane.xlu0 %2259  ;;  %v2444_v37 = vsel %vm1291_vm1, %v8558_v10, 0.0  ;;  %v8565_v0 = vpop.eup %6405  ;;  %v2353_v15 = vsub.f32 %v8452_v49, %v2281_v38  ;;  %v2371_v49 = vsub.f32 %v8396_v12, %v8519_v51 }
 0x600   : > { %6413 = vpow2.f32 %v2386_v58  ;;  %v2346_v34 = vsub.f32 %v8458_v50, %v2260_v61  ;;  %2286 = vmax.xlane.f32.xlu1 %v2285_v27  ;;  %2445 = vadd.xlane.f32.xlu0 %v2444_v37  ;;  %v2510_v55 = vsel %vm1291_vm1, %v8565_v0, 0.0  ;;  %v2370_v37 = vsub.f32 %v8381_v30, %v8511_v19 }
 0x601   : > { %6415 = vpow2.f32 %v2428_v28  ;;  %v2432_v12 = vmul.f32 1.442695, %v2371_v49 }
 0x602   : > { %v8568_v13 = vpop.eup %6407  ;;  %v2382_v21 = vmul.f32 1.442695, %v2346_v34  ;;  %v2430_v19 = vmul.f32 1.442695, %v2370_v37 }
 0x603   : > { %v2278_v41 = vpop.xlane.xlu0 %2277  ;;  %v2438_v11 = vsel %vm1291_vm1, %v8568_v13, 0.0  ;;  %v8575_v63 = vpop.eup %6409 }
 0x604   : > { %6417 = vpow2.f32 %v2382_v21  ;;  %v2352_v50 = vsub.f32 %v8468_v5, %v2278_v41  ;;  %2511 = vadd.xlane.f32.xlu1 %v2510_v55  ;;  %2439 = vadd.xlane.f32.xlu0 %v2438_v11  ;;  %v2513_v31 = vsel %vm1291_vm1, %v8575_v63, 0.0  ;;  %v8581_v20 = vpop.eup %6411  ;;  %v2388_v5 = vmul.f32 1.442695, %v2349_v59  ;;  %v2275_v21 = vpop.xlane.xlu1 %2274 }
 0x605   : > { %6419 = vpow2.f32 %v2380_v7  ;;  %v2516_v58 = vsel %vm1291_vm1, %v8581_v20, 0.0 }
 0x606   : > { %v2394_v33 = vmul.f32 1.442695, %v2352_v50  ;;  %v2396_v50 = vmul.f32 1.442695, %v2353_v15 }
 0x607   : > { %v2272_v53 = vpop.xlane.xlu0 %2271 }
 0x608   : > { %6421 = vpow2.f32 %v2394_v33  ;;  %v2350_v57 = vsub.f32 %v8476_v22, %v2272_v53  ;;  %2514 = vadd.xlane.f32.xlu1 %v2513_v31 }
 0x609   : > { %6423 = vpow2.f32 %v2376_v18  ;;  %v2351_v18 = vsub.f32 %v8463_v42, %v2275_v21  ;;  %v2372_v42 = vsub.f32 %v8388_v52, %v8521_v6 }
 0x60a   : > { %v8584_v28 = vpop.eup %6413  ;;  %v2390_v44 = vmul.f32 1.442695, %v2350_v57 }
 0x60b   : > { %v2290_v60 = vpop.xlane.xlu0 %2289  ;;  %v2456_v61 = vsel %vm1291_vm1, %v8584_v28, 0.0  ;;  %v8591_v27 = vpop.eup %6415  ;;  %v2392_v57 = vmul.f32 1.442695, %v2351_v18 }
 0x60c   : > { %6425 = vpow2.f32 %v2390_v44  ;;  %v2356_v22 = vsub.f32 %v8481_v3, %v2290_v60  ;;  %2517 = vadd.xlane.f32.xlu1 %v2516_v58  ;;  %2457 = vadd.xlane.f32.xlu0 %v2456_v61  ;;  %v2519_v41 = vsel %vm1291_vm1, %v8591_v27, 0.0  ;;  %v2434_v60 = vmul.f32 1.442695, %v2372_v42 }
 0x60d   : > { %6427 = vpow2.f32 %v2388_v5 }
 0x60e   : > { %v8596_v34 = vpop.eup %6417  ;;  %v2402_v7 = vmul.f32 1.442695, %v2356_v22 }
 0x60f   : > { %v2284_v17 = vpop.xlane.xlu0 %2283  ;;  %v2450_v3 = vsel %vm1291_vm1, %v8596_v34, 0.0  ;;  %v8603_v55 = vpop.eup %6419 }
 0x610   : > { %6429 = vpow2.f32 %v2402_v7  ;;  %v2354_v30 = vsub.f32 %v8486_v43, %v2284_v17  ;;  %2520 = vadd.xlane.f32.xlu1 %v2519_v41  ;;  %2451 = vadd.xlane.f32.xlu0 %v2450_v3  ;;  %v2447_v33 = vsel %vm1291_vm1, %v8603_v55, 0.0 }
 0x611   : > { %6431 = vpow2.f32 %v2384_v8 }
 0x612   : > { %v8608_v11 = vpop.eup %6421  ;;  %v2398_v59 = vmul.f32 1.442695, %v2354_v30 }
 0x613   : > { %v2468_v53 = vsel %vm1291_vm1, %v8608_v11, 0.0  ;;  %v8615_v43 = vpop.eup %6423  ;;  %v2615_v31 = vpop.permute.xlu0 %2614 }
 0x614   : > { %6433 = vpow2.f32 %v2398_v59  ;;  %2448 = vadd.xlane.f32.xlu1 %v2447_v33  ;;  %2469 = vadd.xlane.f32.xlu0 %v2468_v53  ;;  %v2441_v38 = vsel %vm1291_vm1, %v8615_v43, 0.0  ;;  %v10489_v59 = vld [vmem:[#allocation44_spill] sm:$0xff] }
 0x615   : > { %6435 = vpow2.f32 %v2430_v19  ;;  %5858 = vmatprep.subr.bf16.mxu1 %v2615_v31 }
 0x616   : > { %v8617_v51 = vpop.eup %6425  ;;  %6437 = vpow2.f32 %v2396_v50  ;;  %5859 = vmatpush3.bf16.msra.mxu1 %v2615_v31  ;;  %v6790_v50 = vld [vmem:[#allocation6 + $0x8] sm:$0xff]  }
 0x617   : > { %v2462_v5 = vsel %vm1291_vm1, %v8617_v51, 0.0  ;;  %v8625_v26 = vpop.eup %6427  ;;  %6439 = vpow2.f32 %v2432_v12 }
 0x618   : > { %2442 = vadd.xlane.f32.xlu1 %v2441_v38  ;;  %2463 = vadd.xlane.f32.xlu0 %v2462_v5  ;;  %6441 = vpow2.f32 %v2392_v57  ;;  %v2459_v52 = vsel %vm1291_vm1, %v8625_v26, 0.0 }
 0x619   : > { %6443 = vpow2.f32 %v2434_v60 }
 0x61a   : > { %v8627_v44 = vpop.eup %6429 }
 0x61b   : > { %v2480_v6 = vsel %vm1291_vm1, %v8627_v44, 0.0  ;;  %v8633_v58 = vpop.eup %6431 }
 0x61c   : > { %2460 = vadd.xlane.f32.xlu1 %v2459_v52  ;;  %2481 = vadd.xlane.f32.xlu0 %v2480_v6  ;;  %v2453_v37 = vsel %vm1291_vm1, %v8633_v58, 0.0 }
 0x61e   : > { %v8635_v61 = vpop.eup %6433 }
 0x61f   : > { %v8637_v22 = vpop.eup %6435  ;;  %v2474_v8 = vsel %vm1291_vm1, %v8635_v61, 0.0 }
 0x620   : > { %v8643_v15 = vpop.eup %6437  ;;  %2454 = vadd.xlane.f32.xlu1 %v2453_v37  ;;  %2475 = vadd.xlane.f32.xlu0 %v2474_v8  ;;  %v2522_v17 = vsel %vm1291_vm1, %v8637_v22, 0.0 }
 0x621   : > { %v8645_v7 = vpop.eup %6439  ;;  %v2471_v21 = vsel %vm1291_vm1, %v8643_v15, 0.0 }
 0x622   : > { %v8651_v41 = vpop.eup %6441  ;;  %v2525_v30 = vsel %vm1291_vm1, %v8645_v7, 0.0 }
 0x623   : > { %v2465_v3 = vsel %vm1291_vm1, %v8651_v41, 0.0  ;;  %v8657_v19 = vpop.eup %6443 }
 0x624   : > { %2472 = vadd.xlane.f32.xlu1 %v2471_v21  ;;  %2523 = vadd.xlane.f32.xlu0 %v2522_v17  ;;  %v2528_v49 = vsel %vm1291_vm1, %v8657_v19, 0.0 }
 0x628   : > { %2466 = vadd.xlane.f32.xlu1 %v2465_v3  ;;  %2526 = vadd.xlane.f32.xlu0 %v2525_v30 }
 0x62c   : > { %2529 = vadd.xlane.f32.xlu0 %v2528_v49 }
 0x642   : > { %2738 = vrot.lane.b32.xlu0 %v6790_v50, %s7039_s22 }
 0x646   : > { %2959 = vrot.lane.b32.xlu0 %v10482_v16, %s7040_s10 }
 0x64a   : > { %2961 = vrot.lane.b32.xlu0 %v10483_v29, %s7040_s10 }
 0x64e   : > { %2963 = vrot.lane.b32.xlu0 %v10485_v32, %s7040_s10 }
 0x652   : > { %2967 = vrot.lane.b32.xlu0 %v10487_v36, %s7040_s10 }
 0x656   : > { %2969 = vrot.lane.b32.xlu0 %v10486_v24, %s7040_s10 }
 0x65a   : > { %2971 = vrot.lane.b32.xlu0 %v10488_v62, %s7040_s10 }
 0x65e   : > { %2973 = vrot.lane.b32.xlu0 %v7627_v48, %s7040_s10 }
 0x662   : > { %3101 = vrot.lane.b32.xlu0 %v7639_v4, %s7040_s10 }
 0x666   : > { %3105 = vrot.lane.b32.xlu0 %v7659_v40, %s7040_s10 }
 0x66a   : > { %3109 = vrot.lane.b32.xlu0 %v7679_v23, %s7040_s10 }
 0x66d   : > { %v2488_v18 = vpop.xlane.xlu1 %2487 }
 0x66e   : > { %3113 = vrot.lane.b32.xlu0 %v10489_v59, %s7040_s10  ;;  %6445 = vrcp.f32 %v2488_v18 }
 0x671   : > { %v2491_v33 = vpop.xlane.xlu1 %2490 }
 0x672   : > { %6447 = vrcp.f32 %v2491_v33 }
 0x675   : > { %v2494_v53 = vpop.xlane.xlu1 %2493 }
 0x678   : > { %v6446_v12 = vpop.eup %6445 }
 0x679   : > { %v2497_v31 = vpop.xlane.xlu1 %2496  ;;  %v2582_v38 = vmul.f32 %v6446_v12, %v8499_v25  ;;  %v8690_v21 = vpop.xlane.xlu0 %2505 }
 0x67c   : > { %v6448_v42 = vpop.eup %6447 }
 0x67d   : > { %v2500_v57 = vpop.xlane.xlu1 %2499  ;;  %v2583_v5 = vmul.f32 %v6448_v42, %v8504_v2 }
 0x67f   : > { %v2606_v60 = vpack.c.bf16 %v2583_v5, %v2582_v38 }
 0x681   : > { %5878 = vmatprep.mubr.msk.bf16.mxu0 %vm1291_vm1, %v2606_v60  ;;  %v2503_v52 = vpop.xlane.xlu1 %2502 }
 0x685   : > { %v8687_v6 = vpop.xlane.xlu1 %2508 }
 0x689   : > { %v2293_v37 = vpop.xlane.xlu1 %2292 }
 0x68a   : > { %v2357_v8 = vsub.f32 %v8546_v54, %v2293_v37 }
 0x68c   : > { %v2404_v17 = vmul.f32 1.442695, %v2357_v8 }
 0x68d   : > { %v2287_v3 = vpop.xlane.xlu1 %2286  ;;  %v2446_v49 = vpop.xlane.xlu0 %2445 }
 0x68e   : > { %6449 = vpow2.f32 %v2404_v17  ;;  %v2355_v30 = vsub.f32 %v8553_v45, %v2287_v3 }
 0x690   : > { %v2400_v25 = vmul.f32 1.442695, %v2355_v30 }
 0x691   : > { %v8693_v50 = vpop.xlane.xlu1 %2511  ;;  %v2440_v2 = vpop.xlane.xlu0 %2439 }
 0x692   : > { %6451 = vpow2.f32 %v2400_v25 }
 0x695   : > { %v2515_v18 = vpop.xlane.xlu1 %2514 }
 0x698   : > { %v8695_v33 = vpop.eup %6449 }
 0x699   : > { %v8697_v12 = vpop.xlane.xlu1 %2517  ;;  %v2458_v42 = vpop.xlane.xlu0 %2457  ;;  %v2483_v54 = vsel %vm1291_vm1, %v8695_v33, 0.0 }
 0x69a   : > { %2484 = vadd.xlane.f32.xlu1 %v2483_v54 }
 0x69c   : > { %v8701_v38 = vpop.eup %6451 }
 0x69d   : > { %v8703_v5 = vpop.xlane.xlu1 %2520  ;;  %v2452_v45 = vpop.xlane.xlu0 %2451  ;;  %v2477_v60 = vsel %vm1291_vm1, %v8701_v38, 0.0 }
 0x69e   : > { %2478 = vadd.xlane.f32.xlu1 %v2477_v60 }
 0x6a1   : > { %v2449_v37 = vpop.xlane.xlu1 %2448  ;;  %v2470_v8 = vpop.xlane.xlu0 %2469 }
 0x6a2   : > { %6453 = vrcp.f32 %v2449_v37 }
 0x6a3   : > { %6455 = vrcp.f32 %v2440_v2 }
 0x6a4   : > { %6457 = vrcp.f32 %v2446_v49  ;;  %v6791_v49 = vld [vmem:[%s10464_s30] sm:$0xff]  }
 0x6a5   : > { %v2443_v17 = vpop.xlane.xlu1 %2442  ;;  %v2464_v3 = vpop.xlane.xlu0 %2463 }
 0x6a6   : > { %6459 = vrcp.f32 %v2443_v17 }
 0x6a9   : > { %v2461_v30 = vpop.xlane.xlu1 %2460  ;;  %v8707_v25 = vpop.xlane.xlu0 %2481 }
 0x6aa   : > { %6461 = vrcp.f32 %v2461_v30 }
 0x6ab   : > { %6463 = vrcp.f32 %v2452_v45 }
 0x6ac   : > { %v6454_v54 = vpop.eup %6453  ;;  %6465 = vrcp.f32 %v2458_v42 }
 0x6ad   : > { %v2455_v59 = vpop.xlane.xlu1 %2454  ;;  %v8709_v23 = vpop.xlane.xlu0 %2475  ;;  %v2569_v37 = vmul.f32 %v6454_v54, %v8603_v55 }
 0x6ae   : > { %v6456_v40 = vpop.eup %6455  ;;  %6467 = vrcp.f32 %v2455_v59 }
 0x6af   : > { %v6458_v60 = vpop.eup %6457  ;;  %6469 = vrcp.f32 %v2497_v31  ;;  %2975 = vrot.lane.b32.xlu1 %v6791_v49, %s7040_s10  ;;  %v2566_v17 = vmul.f32 %v6456_v40, %v8568_v13 }
 0x6b0   : > { %v6460_v2 = vpop.eup %6459  ;;  %6471 = vrcp.f32 %v2503_v52  ;;  %v2568_v59 = vmul.f32 %v6458_v60, %v8558_v10 }
 0x6b1   : > { %6473 = vrcp.f32 %v2494_v53  ;;  %v2473_v45 = vpop.xlane.xlu1 %2472  ;;  %v2524_v42 = vpop.xlane.xlu0 %2523  ;;  %v2567_v30 = vmul.f32 %v6460_v2, %v8615_v43 }
 0x6b2   : > { %6475 = vrcp.f32 %v2500_v57  ;;  %v2599_v4 = vpack.c.bf16 %v2569_v37, %v2568_v59 }
 0x6b3   : > { %6477 = vrcp.f32 %v2473_v45  ;;  %v2598_v31 = vpack.c.bf16 %v2567_v30, %v2566_v17 }
 0x6b4   : > { %6479 = vrcp.f32 %v2464_v3  ;;  %v6462_v48 = vpop.eup %6461 }
 0x6b5   : > { %6481 = vrcp.f32 %v2470_v8  ;;  %v2467_v49 = vpop.xlane.xlu1 %2466  ;;  %5860 = vmatprep.mubr.msk.bf16.mxu1 %vm1291_vm1, %v2598_v31  ;;  %v2527_v55 = vpop.xlane.xlu0 %2526  ;;  %v2573_v10 = vmul.f32 %v6462_v48, %v8625_v26  ;;  %v2373_v48 = vsub.f32 %v8406_v35, %v8535_v46 }
 0x6b6   : > { %v6464_v53 = vpop.eup %6463  ;;  %6483 = vrcp.f32 %v2467_v49  ;;  %5861 = vmatmul.mubr.msk.bf16.vlgmr.msra.gmra.mrb[68].mxu1 %vm1291_vm1, %v2599_v4 }
 0x6b7   : > { %v6466_v40 = vpop.eup %6465  ;;  %6485 = vrcp.f32 %v8687_v6  ;;  %v2570_v52 = vmul.f32 %v6464_v53, %v8596_v34  ;;  %v2436_v46 = vmul.f32 1.442695, %v2373_v48 }
 0x6b8   : > { %v6468_v13 = vpop.eup %6467  ;;  %6487 = vrcp.f32 %v2515_v18  ;;  %v2572_v4 = vmul.f32 %v6466_v40, %v8584_v28 }
 0x6b9   : > { %v6470_v43 = vpop.eup %6469  ;;  %6489 = vrcp.f32 %v8690_v21  ;;  %v8724_v57 = vpop.xlane.xlu0 %2529  ;;  %v2571_v8 = vmul.f32 %v6468_v13, %v8633_v58 }
 0x6ba   : > { %v6472_v3 = vpop.eup %6471  ;;  %6491 = vrcp.f32 %v8693_v50  ;;  %v2585_v26 = vmul.f32 %v6470_v43, %v8515_v14  ;;  %v2601_v21 = vpack.c.bf16 %v2573_v10, %v2572_v4  ;;  %v10490_v4 = vld [vmem:[#allocation33_spill] sm:$0xff] }
 0x6bb   : > { %v6474_v54 = vpop.eup %6473  ;;  %v2600_v6 = vpack.c.bf16 %v2571_v8, %v2570_v52  ;;  %v2587_v58 = vmul.f32 %v6472_v3, %v8532_v56  ;;  %6493 = vrcp.f32 %v8703_v5 }
 0x6bc   : > { %v6476_v60 = vpop.eup %6475  ;;  %v2584_v50 = vmul.f32 %v6474_v54, %v8509_v39  ;;  %6495 = vrcp.f32 %v2527_v55  ;;  %v10494_v54 = vld [vmem:[#allocation45_spill] sm:$0xff] }
 0x6bd   : > { %v6478_v18 = vpop.eup %6477  ;;  %5864 = vmatprep.mubr.msk.bf16.mxu1 %vm1291_vm1, %v2600_v6  ;;  %v2739_v34 = vpop.permute.xlu0 %2738  ;;  %v2586_v35 = vmul.f32 %v6476_v60, %v8527_v1  ;;  %6497 = vrcp.f32 %v8697_v12 }
 0x6be   : > { %v6480_v2 = vpop.eup %6479  ;;  %5865 = vmatmul.mubr.msk.bf16.gmra.mrb[72].mxu1 %vm1291_vm1, %v2601_v21  ;;  %5876 = vmatprep.subr.bf16.mxu0 %v2739_v34  ;;  %v2607_v37 = vpack.c.bf16 %v2585_v26, %v2584_v50  ;;  %v2577_v45 = vmul.f32 %v6478_v18, %v8643_v15  ;;  %6499 = vrcp.f32 %v2524_v42 }
 0x6bf   : > { %v6482_v28 = vpop.eup %6481  ;;  %5877 = vmatpush3.bf16.msra.mxu0 %v2739_v34  ;;  %v2608_v56 = vpack.c.bf16 %v2587_v58, %v2586_v35  ;;  %v2574_v39 = vmul.f32 %v6480_v2, %v8617_v51  ;;  %6501 = vpow2.f32 %v2436_v46 }
 0x6c0   : > { %v6484_v14 = vpop.eup %6483  ;;  %v2576_v1 = vmul.f32 %v6482_v28, %v8608_v11 }
 0x6c1   : > { %v6486_v17 = vpop.eup %6485  ;;  %v2575_v30 = vmul.f32 %v6484_v14, %v8651_v41  ;;  %v2960_v28 = vpop.permute.xlu0 %2959 }
 0x6c2   : > { %v6488_v59 = vpop.eup %6487  ;;  %5879 = vmatmul.mubr.msk.bf16.vlgmr.msra.gmra.mrb[92].mxu0 %vm1291_vm1, %v2607_v37  ;;  %v2603_v15 = vpack.c.bf16 %v2577_v45, %v2576_v1  ;;  %v2589_v55 = vmul.f32 %v6486_v17, %v8540_v47 }
 0x6c3   : > { %v6490_v5 = vpop.eup %6489  ;;  %5882 = vmatprep.mubr.msk.bf16.mxu0 %vm1291_vm1, %v2608_v56  ;;  %v2602_v31 = vpack.c.bf16 %v2575_v30, %v2574_v39  ;;  %v2591_v51 = vmul.f32 %v6488_v59, %v8575_v63 }
 0x6c4   : > { %v6492_v49 = vpop.eup %6491  ;;  %v2588_v41 = vmul.f32 %v6490_v5, %v8517_v9 }
 0x6c5   : > { %5868 = vmatprep.mubr.msk.bf16.mxu1 %vm1291_vm1, %v2602_v31  ;;  %v2590_v12 = vmul.f32 %v6492_v49, %v8565_v0  ;;  %v6494_v42 = vpop.eup %6493  ;;  %v2962_v46 = vpop.permute.xlu0 %2961 }
 0x6c6   : > { %5869 = vmatmul.mubr.msk.bf16.gmra.mrb[76].mxu1 %vm1291_vm1, %v2603_v15  ;;  %v2609_v11 = vpack.c.bf16 %v2589_v55, %v2588_v41  ;;  %v6496_v40 = vpop.eup %6495  ;;  %v2593_v10 = vmul.f32 %v6494_v42, %v8591_v27  ;;  %v6792_v27 = vld [vmem:[%s10464_s30 + $0x8] sm:$0xff]  }
 0x6c7   : > { %v2610_v53 = vpack.c.bf16 %v2591_v51, %v2590_v12  ;;  %v6498_v13 = vpop.eup %6497  ;;  %v2595_v63 = vmul.f32 %v6496_v40, %v8645_v7  ;;  %v10493_v7 = vld [vmem:[#allocation43_spill] sm:$0xff] }
 0x6c8   : > { %v6500_v47 = vpop.eup %6499  ;;  %v2592_v43 = vmul.f32 %v6498_v13, %v8581_v20  ;;  %v10491_v20 = vld [vmem:[#allocation39_spill] sm:$0xff]  ;;  %v8937_v13 = vld [vmem:[%s10481_s27] sm:$0xff] }
 0x6c9   : > { %v6502_v52 = vpop.eup %6501  ;;  %v2594_v9 = vmul.f32 %v6500_v47, %v8637_v22  ;;  %v10492_v22 = vld [vmem:[#allocation41_spill] sm:$0xff]  ;;  %v2964_v37 = vpop.permute.xlu0 %2963 }
 0x6ca   : > { %5883 = vmatmul.mubr.msk.bf16.gmra.mrb[96].mxu0 %vm1291_vm1, %v2609_v11  ;;  %v2611_v0 = vpack.c.bf16 %v2593_v10, %v2592_v43  ;;  %v2531_v3 = vsel %vm1291_vm1, %v6502_v52, 0.0 }
 0x6cb   : > { %5886 = vmatprep.mubr.msk.bf16.mxu0 %vm1291_vm1, %v2610_v53  ;;  %v2612_v8 = vpack.c.bf16 %v2595_v63, %v2594_v9 }
 0x6d2   : > { %5887 = vmatmul.mubr.msk.bf16.gmra.mrb[100].mxu0 %vm1291_vm1, %v2611_v0 }
 0x6d3   : > { %2532 = vadd.xlane.f32.xlu1 %v2531_v3  ;;  %5890 = vmatprep.mubr.msk.bf16.mxu0 %vm1291_vm1, %v2612_v8 }
 0x6e4   : > { %2965 = vrot.lane.b32.xlu1 %v10490_v4, %s7040_s10 }
 0x6e8   : > { %3117 = vrot.lane.b32.xlu1 %v6792_v27, %s7040_s10 }
 0x6ec   : > { %3103 = vrot.lane.b32.xlu1 %v10491_v20, %s7040_s10 }
 0x6f0   : > { %3107 = vrot.lane.b32.xlu1 %v10492_v22, %s7040_s10 }
 0x6f4   : > { %3111 = vrot.lane.b32.xlu1 %v10493_v7, %s7040_s10 }
 0x6f8   : > { %3115 = vrot.lane.b32.xlu1 %v10494_v54, %s7040_s10 }
 0x727   : > { %v2485_v6 = vpop.xlane.xlu1 %2484 }
 0x728   : > { %6503 = vrcp.f32 %v2485_v6 }
 0x729   : > { %6505 = vrcp.f32 %v8709_v23 }
 0x72a   : > { %6507 = vrcp.f32 %v8707_v25 }
 0x72b   : > { %v2479_v60 = vpop.xlane.xlu1 %2478 }
 0x72c   : > { %6509 = vrcp.f32 %v2479_v60 }
 0x72d   : > { %6511 = vrcp.f32 %v8724_v57 }
 0x72f   : > { %v2976_v48 = vpop.permute.xlu1 %2975 }
 0x730   : > { %6093 = vmatprep.subr.msk.bf16.mxu1 %vm1037_vm0, %v2976_v48  ;;  %v3002_v26 = vsel %vm1037_vm0, %v2976_v48, 0 }
 0x731   : > { %5895 = vmatpush3.bf16.xpose.msra.mxu1 %v3002_v26 }
 0x732   : > { %v6504_v21 = vpop.eup %6503 }
 0x733   : > { %v6506_v18 = vpop.eup %6505  ;;  %v2581_v2 = vmul.f32 %v6504_v21, %v8695_v33 }
 0x734   : > { %v6508_v34 = vpop.eup %6507  ;;  %v2578_v50 = vmul.f32 %v6506_v18, %v8635_v61  ;;  %v2968_v61 = vpop.permute.xlu0 %2967 }
 0x735   : > { %v2580_v25 = vmul.f32 %v6508_v34, %v8627_v44 }
 0x736   : > { %v6510_v58 = vpop.eup %6509 }
 0x737   : > { %v2579_v23 = vmul.f32 %v6510_v58, %v8701_v38  ;;  %v2605_v14 = vpack.c.bf16 %v2581_v2, %v2580_v25  ;;  %v6512_v56 = vpop.eup %6511 }
 0x738   : > { %v2970_v33 = vpop.permute.xlu0 %2969  ;;  %v2596_v1 = vmul.f32 %v6512_v56, %v8657_v19 }
 0x739   : > { %v2604_v35 = vpack.c.bf16 %v2579_v23, %v2578_v50 }
 0x73b   : > { %5872 = vmatprep.mubr.msk.bf16.mxu1 %vm1291_vm1, %v2604_v35 }
 0x73c   : > { %5873 = vmatmul.mubr.msk.bf16.gmra.mrb[80].mxu1 %vm1291_vm1, %v2605_v14  ;;  %v2972_v44 = vpop.permute.xlu0 %2971 }
 0x73d   : > { %5896 = vmatprep.mubr.msk.bf16.mxu1 %vm1037_vm0, %v2960_v28 }
 0x740   : > { %v2974_v30 = vpop.permute.xlu0 %2973 }
 0x744   : > { %5897 = vmatmul.mubr.msk.bf16.vlgmr.msra.gmra.mrb[84].mxu1 %vm1037_vm0, %v2962_v46  ;;  %v3102_v31 = vpop.permute.xlu0 %3101 }
 0x745   : > { %5900 = vmatprep.mubr.msk.bf16.mxu1 %vm1037_vm0, %v2964_v37 }
 0x748   : > { %v3106_v15 = vpop.permute.xlu0 %3105 }
 0x74c   : > { %v3110_v55 = vpop.permute.xlu0 %3109 }
 0x750   : > { %v3114_v41 = vpop.permute.xlu0 %3113 }
 0x760   : > { %v2533_v38 = vpop.xlane.xlu1 %2532 }
 0x761   : > { %6513 = vrcp.f32 %v2533_v38 }
 0x764   : > { %v2966_v45 = vpop.permute.xlu1 %2965 }
 0x765   : > { %5901 = vmatmul.mubr.msk.bf16.gmra.mrb[88].mxu1 %vm1037_vm0, %v2966_v45 }
 0x766   : > { %5904 = vmatprep.mubr.msk.bf16.mxu1 %vm1037_vm0, %v2968_v61 }
 0x768   : > { %v3118_v17 = vpop.permute.xlu1 %3117 }
 0x769   : > { %6094 = vmatprep.subr.msk.bf16.mxu0 %vm1037_vm0, %v3118_v17  ;;  %v3144_v39 = vsel %vm1037_vm0, %v3118_v17, 0 }
 0x76a   : > { %5913 = vmatpush3.bf16.xpose.msra.mxu0 %v3144_v39 }
 0x76b   : > { %v6514_v59 = vpop.eup %6513 }
 0x76c   : > { %v2597_v57 = vmul.f32 %v6514_v59, %v6502_v52  ;;  %v3104_v49 = vpop.permute.xlu1 %3103 }
 0x76d   : > { %5905 = vmatmul.mubr.msk.bf16.gmra.mrb[92].mxu1 %vm1037_vm0, %v2970_v33 }
 0x76e   : > { %5908 = vmatprep.mubr.msk.bf16.mxu1 %vm1037_vm0, %v2972_v44  ;;  %v2613_v5 = vpack.c.bf16 %v2597_v57, %v2596_v1 }
 0x770   : > { %5891 = vmatmul.mubr.msk.bf16.gmra.mrb[104].mxu0 %vm1291_vm1, %v2613_v5  ;;  %v3108_v19 = vpop.permute.xlu1 %3107 }
 0x771   : > { %5914 = vmatprep.mubr.msk.bf16.mxu0 %vm1037_vm0, %v3102_v31 }
 0x774   : > { %v3112_v51 = vpop.permute.xlu1 %3111 }
 0x775   : > { %5909 = vmatmul.mubr.msk.bf16.gmra.mrb[96].mxu1 %vm1037_vm0, %v2974_v30 }
 0x778   : > { %5915 = vmatmul.mubr.msk.bf16.vlgmr.msra.gmra.mrb[108].mxu0 %vm1037_vm0, %v3104_v49  ;;  %v3116_v47 = vpop.permute.xlu1 %3115 }
 0x779   : > { %5918 = vmatprep.mubr.msk.bf16.mxu0 %vm1037_vm0, %v3106_v15 }
 0x780   : > { %5919 = vmatmul.mubr.msk.bf16.gmra.mrb[112].mxu0 %vm1037_vm0, %v3108_v19 }
 0x781   : > { %5922 = vmatprep.mubr.msk.bf16.mxu0 %vm1037_vm0, %v3110_v55 }
 0x788   : > { %5923 = vmatmul.mubr.msk.bf16.gmra.mrb[116].mxu0 %vm1037_vm0, %v3112_v51 }
 0x789   : > { %v8804_v12 = vpop.f32.mrb[68].mxu1  ;;  %5926 = vmatprep.mubr.msk.bf16.mxu0 %vm1037_vm0, %v3114_v41 }
 0x78a   : > { %10495 = vst [vmem:[#allocation30_spill] sm:$0xff] %v8804_v12  ;;  %v8807_v11 = vpop.f32.mrb[69].mxu1 }
 0x78b   : > { %10496 = vst [vmem:[#allocation31_spill] sm:$0xff] %v8807_v11  ;;  %v8809_v42 = vpop.f32.mrb[70].mxu1 }
 0x78c   : > { %10497 = vst [vmem:[#allocation32_spill] sm:$0xff] %v8809_v42  ;;  %v8813_v40 = vpop.f32.mrb[71].mxu1 }
 0x78d   : > { %10498 = vst [vmem:[#allocation35_spill] sm:$0xff] %v8813_v40 }
 0x790   : > { %5927 = vmatmul.mubr.msk.bf16.gmra.mrb[120].mxu0 %vm1037_vm0, %v3116_v47 }
 0x791   : > { %v8818_v10 = vpop.f32.mrb[72].mxu1 }
 0x792   : > { %10499 = vst [vmem:[#allocation34_spill] sm:$0xff] %v8818_v10  ;;  %v8820_v63 = vpop.f32.mrb[73].mxu1 }
 0x793   : > { %10500 = vst [vmem:[#allocation36_spill] sm:$0xff] %v8820_v63  ;;  %v8822_v43 = vpop.f32.mrb[74].mxu1 }
 0x794   : > { %10501 = vst [vmem:[#allocation33_spill] sm:$0xff] %v8822_v43  ;;  %v8826_v9 = vpop.f32.mrb[75].mxu1 }
 0x795   : > { %10502 = vst [vmem:[#allocation39_spill] sm:$0xff] %v8826_v9  ;;  %v8830_v8 = vpop.f32.mrb[92].mxu0 }
 0x796   : > { %10503 = vst [vmem:[#allocation41_spill] sm:$0xff] %v8830_v8  ;;  %v8832_v3 = vpop.f32.mrb[93].mxu0 }
 0x797   : > { %10504 = vst [vmem:[#allocation43_spill] sm:$0xff] %v8832_v3  ;;  %v8834_v27 = vpop.f32.mrb[94].mxu0  ;;  %v8993_v3 = vld [vmem:[%s10481_s27 + $0x28] sm:$0xff] }
 0x798   : > { %10505 = vst [vmem:[#allocation46_spill] sm:$0xff] %v8834_v27  ;;  %v8838_v60 = vpop.f32.mrb[95].mxu0 }
 0x799   : > { %10506 = vst [vmem:[#allocation47_spill] sm:$0xff] %v8838_v60  ;;  %v8842_v26 = vpop.f32.mrb[76].mxu1  ;;  %v6800_v60 = vld [vmem:[%s10481_s27 + $0x38] sm:$0xff] }
 0x79a   : > { %10507 = vst [vmem:[#allocation48_spill] sm:$0xff] %v8842_v26  ;;  %v8844_v21 = vpop.f32.mrb[77].mxu1 }
 0x79b   : > { %10508 = vst [vmem:[#allocation49_spill] sm:$0xff] %v8844_v21  ;;  %v8846_v18 = vpop.f32.mrb[78].mxu1  ;;  %v6803_v21 = vld [vmem:[%s10481_s27 + $0x48] sm:$0xff] }
 0x79c   : > { %10509 = vst [vmem:[#allocation50_spill] sm:$0xff] %v8846_v18  ;;  %v8850_v58 = vpop.f32.mrb[79].mxu1 }
 0x79d   : > { %10510 = vst [vmem:[#allocation51_spill] sm:$0xff] %v8850_v58  ;;  %v8854_v50 = vpop.f32.mrb[96].mxu0 }
 0x79e   : > { %10511 = vst [vmem:[#allocation52_spill] sm:$0xff] %v8854_v50  ;;  %v8856_v23 = vpop.f32.mrb[97].mxu0 }
 0x79f   : > { %10512 = vst [vmem:[#allocation53_spill] sm:$0xff] %v8856_v23  ;;  %v8858_v28 = vpop.f32.mrb[98].mxu0 }
 0x7a0   : > { %10513 = vst [vmem:[#allocation54_spill] sm:$0xff] %v8858_v28  ;;  %v8862_v35 = vpop.f32.mrb[99].mxu0  ;;  %v8985_v28 = vld [vmem:[%s10481_s27 + $0x30] sm:$0xff] }
 0x7a1   : > { %10514 = vst [vmem:[#allocation55_spill] sm:$0xff] %v8862_v35 }
 0x7a5   : > { %v8866_v46 = vpop.f32.mrb[100].mxu0 }
 0x7a6   : > { %10515 = vst [vmem:[#allocation56_spill] sm:$0xff] %v8866_v46  ;;  %v8868_v37 = vpop.f32.mrb[101].mxu0 }
 0x7a7   : > { %10516 = vst [vmem:[#allocation57_spill] sm:$0xff] %v8868_v37  ;;  %v8870_v61 = vpop.f32.mrb[102].mxu0 }
 0x7a8   : > { %10517 = vst [vmem:[#allocation58_spill] sm:$0xff] %v8870_v61  ;;  %v8874_v38 = vpop.f32.mrb[103].mxu0 }
 0x7a9   : > { %10518 = vst [vmem:[#allocation59_spill] sm:$0xff] %v8874_v38  ;;  %v8963_v38 = vld [vmem:[%s10481_s27 + $0x18] sm:$0xff] }
 0x80f   : > { %v8878_v45 = vpop.f32.mrb[80].mxu1 }
 0x810   : > { %10519 = vst [vmem:[#allocation60_spill] sm:$0xff] %v8878_v45  ;;  %v8880_v17 = vpop.f32.mrb[81].mxu1 }
 0x811   : > { %10520 = vst [vmem:[#allocation61_spill] sm:$0xff] %v8880_v17  ;;  %v8882_v56 = vpop.f32.mrb[82].mxu1 }
 0x812   : > { %10521 = vst [vmem:[#allocation62_spill] sm:$0xff] %v8882_v56  ;;  %v8886_v30 = vpop.f32.mrb[83].mxu1  ;;  %v6802_v56 = vld [vmem:[%s10481_s27 + $0x50] sm:$0xff] }
 0x813   : > { %10522 = vst [vmem:[#allocation63_spill] sm:$0xff] %v8886_v30 }
 0x817   : > { %v8890_v1 = vpop.f32.mrb[84].mxu1 }
 0x818   : > { %v8892_v57 = vpop.f32.mrb[85].mxu1 }
 0x819   : > { %v8894_v5 = vpop.f32.mrb[86].mxu1  ;;  %v9086_v54 = vadd.f32 %v8937_v13, %v8892_v57 }
 0x81a   : > { %v8896_v31 = vpop.f32.mrb[87].mxu1 }
 0x838   : > { %v8898_v49 = vpop.f32.mrb[88].mxu1 }
 0x839   : > { %v8900_v15 = vpop.f32.mrb[89].mxu1  ;;  %v9109_v57 = vadd.f32 %v8985_v28, %v8898_v49 }
 0x83a   : > { %v8902_v19 = vpop.f32.mrb[90].mxu1 }
 0x83b   : > { %v8904_v55 = vpop.f32.mrb[91].mxu1 }
 0x840   : > { %v8906_v51 = vpop.f32.mrb[92].mxu1 }
 0x841   : > { %v8908_v41 = vpop.f32.mrb[93].mxu1 }
 0x842   : > { %v8910_v47 = vpop.f32.mrb[94].mxu1 }
 0x843   : > { %v8912_v44 = vpop.f32.mrb[104].mxu0  ;;  %v8914_v33 = vpop.f32.mrb[95].mxu1 }
 0x844   : > { %10523 = vst [vmem:[#allocation64_spill] sm:$0xff] %v8912_v44  ;;  %v8916_v14 = vpop.f32.mrb[105].mxu0 }
 0x845   : > { %10524 = vst [vmem:[#allocation65_spill] sm:$0xff] %v8916_v14  ;;  %v8918_v25 = vpop.f32.mrb[106].mxu0  ;;  %v8945_v14 = vld [vmem:[%s10481_s27 + $0x10] sm:$0xff] }
 0x846   : > { %10525 = vst [vmem:[#allocation66_spill] sm:$0xff] %v8918_v25  ;;  %v8922_v6 = vpop.f32.mrb[107].mxu0  ;;  %v8953_v25 = vld [vmem:[%s10481_s27 + $0x8] sm:$0xff] }
 0x847   : > { %10526 = vst [vmem:[#allocation67_spill] sm:$0xff] %v8922_v6 }
 0x848   : > { %v8926_v39 = vpop.f32.mrb[96].mxu1 }
 0x849   : > { %v8928_v2 = vpop.f32.mrb[97].mxu1 }
 0x84a   : > { %v8930_v34 = vpop.f32.mrb[98].mxu1 }
 0x84b   : > { %v8932_v0 = vpop.f32.mrb[99].mxu1  ;;  %v5916_v52 = vpop.f32.mrb[108].mxu0 }
 0x84c   : > { %v3180_v53 = vpop.f32.mrb[109].mxu0  ;;  %v8948_v6 = vadd.f32 %v8945_v14, %v5916_v52 }
 0x84d   : > { %v8940_v48 = vadd.f32 %v8937_v13, %v3180_v53  ;;  %v5917_v44 = vpop.f32.mrb[110].mxu0  ;;  %v9103_v13 = vadd.f32 %v8993_v3, %v8904_v55  ;;  %v9130_v55 = vadd.f32 %v6802_v56, %v8906_v51 }
 0x84e   : > { %v3183_v59 = vpop.f32.mrb[111].mxu0  ;;  %v8966_v52 = vadd.f32 %v8963_v38, %v5917_v44 }
 0x84f   : > { %v8956_v37 = vadd.f32 %v8953_v25, %v3183_v59  ;;  %v3291_v53 = vsel %vm1291_vm1, %v8940_v48, -inf  ;;  %v3297_v59 = vsel %vm1291_vm1, %v8948_v6, -inf }
 0x850   : > { %3292 = vmax.xlane.f32.xlu0 %v3291_v53  ;;  %v8975_v53 = vld [vmem:[%s10481_s27 + $0x20] sm:$0xff]  ;;  %v3300_v50 = vsel %vm1291_vm1, %v8966_v52, -inf }
 0x851   : > { %v3294_v46 = vsel %vm1291_vm1, %v8956_v37, -inf }
 0x852   : > { %3295 = vmax.xlane.f32.xlu1 %v3294_v46 }
 0x853   : > { %v5920_v61 = vpop.f32.mrb[112].mxu0 }
 0x854   : > { %3298 = vmax.xlane.f32.xlu0 %v3297_v59  ;;  %v3196_v23 = vpop.f32.mrb[113].mxu0  ;;  %v8988_v59 = vadd.f32 %v8985_v28, %v5920_v61  ;;  %v9125_v28 = vadd.f32 %v6803_v21, %v8914_v33 }
 0x855   : > { %v8978_v35 = vadd.f32 %v8975_v53, %v3196_v23  ;;  %v5921_v44 = vpop.f32.mrb[114].mxu0 }
 0x856   : > { %3301 = vmax.xlane.f32.xlu1 %v3300_v50  ;;  %v3199_v46 = vpop.f32.mrb[115].mxu0  ;;  %v9003_v8 = vadd.f32 %v6800_v60, %v5921_v44  ;;  %v3309_v17 = vsel %vm1291_vm1, %v8988_v59, -inf }
 0x857   : > { %v8996_v23 = vadd.f32 %v8993_v3, %v3199_v46  ;;  %v3303_v50 = vsel %vm1291_vm1, %v8978_v35, -inf  ;;  %v9120_v3 = vadd.f32 %v8975_v53, %v8900_v15  ;;  %v3270_v15 = vsel %vm1291_vm1, %v9125_v28, -inf }
 0x858   : > { %3304 = vmax.xlane.f32.xlu0 %v3303_v50  ;;  %v9012_v50 = vld [vmem:[%s10481_s27 + $0x40] sm:$0xff]  ;;  %v3312_v45 = vsel %vm1291_vm1, %v9003_v8, -inf }
 0x859   : > { %v3306_v61 = vsel %vm1291_vm1, %v8996_v23, -inf  ;;  %v9138_v53 = vadd.f32 %v9012_v50, %v8908_v41 }
 0x85a   : > { %3307 = vmax.xlane.f32.xlu1 %v3306_v61 }
 0x85b   : > { %v5924_v27 = vpop.f32.mrb[116].mxu0 }
 0x85c   : > { %3310 = vmax.xlane.f32.xlu0 %v3309_v17  ;;  %v3212_v46 = vpop.f32.mrb[117].mxu0  ;;  %v9022_v17 = vadd.f32 %v6802_v56, %v5924_v27  ;;  %v3267_v56 = vsel %vm1291_vm1, %v9138_v53, -inf }
 0x85d   : > { %v9015_v30 = vadd.f32 %v9012_v50, %v3212_v46  ;;  %v5925_v44 = vpop.f32.mrb[118].mxu0  ;;  %v6809_v50 = vld [vmem:[#allocation6] sm:$0xff]  }
 0x85e   : > { %3313 = vmax.xlane.f32.xlu1 %v3312_v45  ;;  %v3215_v61 = vpop.f32.mrb[119].mxu0  ;;  %v6804_v45 = vld [vmem:[%s10481_s27 + $0x58] sm:$0xff]  ;;  %v3321_v63 = vsel %vm1291_vm1, %v9022_v17, -inf }
 0x85f   : > { %v9027_v58 = vadd.f32 %v6803_v21, %v3215_v61  ;;  %v3315_v46 = vsel %vm1291_vm1, %v9015_v30, -inf  ;;  %v9034_v26 = vadd.f32 %v6804_v45, %v5925_v44  ;;  %v3273_v21 = vsel %vm1291_vm1, %v9130_v55, -inf }
 0x860   : > { %3316 = vmax.xlane.f32.xlu0 %v3315_v46  ;;  %v6805_v46 = vld [vmem:[%s10481_s27 + $0x60] sm:$0xff] }
 0x861   : > { %v3318_v27 = vsel %vm1291_vm1, %v9027_v58, -inf  ;;  %v3324_v44 = vsel %vm1291_vm1, %v9034_v26, -inf  ;;  %v9148_v51 = vadd.f32 %v6805_v46, %v8928_v2 }
 0x862   : > { %3319 = vmax.xlane.f32.xlu1 %v3318_v27  ;;  %v6806_v27 = vld [vmem:[%s10481_s27 + $0x70] sm:$0xff] }
 0x863   : > { %v5928_v18 = vpop.f32.mrb[120].mxu0  ;;  %v9143_v33 = vadd.f32 %v6806_v27, %v8926_v39  ;;  %v3279_v41 = vsel %vm1291_vm1, %v9148_v51, -inf }
 0x864   : > { %3322 = vmax.xlane.f32.xlu0 %v3321_v63  ;;  %v3228_v61 = vpop.f32.mrb[121].mxu0  ;;  %v9050_v12 = vadd.f32 %v6806_v27, %v5928_v18  ;;  %v9055_v63 = vld [vmem:[%s10481_s27 + $0x68] sm:$0xff] }
 0x865   : > { %v9043_v9 = vadd.f32 %v6805_v46, %v3228_v61  ;;  %v5929_v10 = vpop.f32.mrb[122].mxu0 }
 0x866   : > { %3325 = vmax.xlane.f32.xlu1 %v3324_v44  ;;  %v3231_v43 = vpop.f32.mrb[123].mxu0  ;;  %v9065_v44 = vld [vmem:[%s10481_s27 + $0x78] sm:$0xff]  ;;  %v3333_v40 = vsel %vm1291_vm1, %v9050_v12, -inf }
 0x867   : > { %v9058_v61 = vadd.f32 %v9055_v63, %v3231_v43  ;;  %v3327_v42 = vsel %vm1291_vm1, %v9043_v9, -inf  ;;  %v9068_v18 = vadd.f32 %v9065_v44, %v5929_v10  ;;  %v9074_v43 = vadd.f32 %v8945_v14, %v8890_v1 }
 0x868   : > { %3328 = vmax.xlane.f32.xlu0 %v3327_v42  ;;  %v9080_v42 = vadd.f32 %v8953_v25, %v8896_v31  ;;  %v9091_v14 = vadd.f32 %v6800_v60, %v8902_v19  ;;  %v9097_v25 = vadd.f32 %v8963_v38, %v8894_v5  ;;  %v3243_v1 = vsel %vm1291_vm1, %v9086_v54, -inf }
 0x869   : > { %v3330_v11 = vsel %vm1291_vm1, %v9058_v61, -inf  ;;  %v3336_v10 = vsel %vm1291_vm1, %v9068_v18, -inf  ;;  %v9114_v5 = vadd.f32 %v6804_v45, %v8910_v47  ;;  %v3258_v31 = vsel %vm1291_vm1, %v9103_v13, -inf }
 0x86a   : > { %3331 = vmax.xlane.f32.xlu1 %v3330_v11  ;;  %v3249_v11 = vsel %vm1291_vm1, %v9074_v43, -inf  ;;  %v3264_v60 = vsel %vm1291_vm1, %v9091_v14, -inf  ;;  %v3252_v38 = vsel %vm1291_vm1, %v9097_v25, -inf  ;;  %v3261_v19 = vsel %vm1291_vm1, %v9109_v57, -inf }
 0x86b   : > { %v3276_v49 = vsel %vm1291_vm1, %v9114_v5, -inf  ;;  %v3255_v47 = vsel %vm1291_vm1, %v9120_v3, -inf  ;;  %v3285_v45 = vsel %vm1291_vm1, %v9143_v33, -inf }
 0x86c   : > { %3334 = vmax.xlane.f32.xlu0 %v3333_v40  ;;  %v3246_v40 = vsel %vm1291_vm1, %v9080_v42, -inf }
 0x86e   : > { %3337 = vmax.xlane.f32.xlu1 %v3336_v10 }
 0x870   : > { %3250 = vmax.xlane.f32.xlu0 %v3249_v11 }
 0x872   : > { %3247 = vmax.xlane.f32.xlu1 %v3246_v40 }
 0x874   : > { %3244 = vmax.xlane.f32.xlu0 %v3243_v1 }
 0x876   : > { %3265 = vmax.xlane.f32.xlu1 %v3264_v60 }
 0x878   : > { %3253 = vmax.xlane.f32.xlu0 %v3252_v38 }
 0x87a   : > { %3259 = vmax.xlane.f32.xlu1 %v3258_v31 }
 0x87c   : > { %3262 = vmax.xlane.f32.xlu0 %v3261_v19 }
 0x87e   : > { %3277 = vmax.xlane.f32.xlu1 %v3276_v49 }
 0x880   : > { %3256 = vmax.xlane.f32.xlu0 %v3255_v47 }
 0x882   : > { %3271 = vmax.xlane.f32.xlu1 %v3270_v15 }
 0x884   : > { %3274 = vmax.xlane.f32.xlu0 %v3273_v21 }
 0x888   : > { %3268 = vmax.xlane.f32.xlu0 %v3267_v56 }
 0x88c   : > { %3286 = vmax.xlane.f32.xlu0 %v3285_v45 }
 0x890   : > { %3280 = vmax.xlane.f32.xlu0 %v3279_v41 }
 0x8a6   : > { %3611 = vrot.lane.b32.xlu0 %v6809_v50, %s7040_s10 }
 0x8dd   : > { %v3293_v39 = vpop.xlane.xlu0 %3292 }
 0x8de   : > { %v3355_v27 = vsub.f32 %v8940_v48, %v3293_v39 }
 0x8df   : > { %v3296_v10 = vpop.xlane.xlu1 %3295 }
 0x8e0   : > { %v3403_v11 = vmul.f32 1.442695, %v3355_v27  ;;  %v3356_v40 = vsub.f32 %v8956_v37, %v3296_v10 }
 0x8e1   : > { %v3299_v2 = vpop.xlane.xlu0 %3298 }
 0x8e2   : > { %6515 = vpow2.f32 %v3403_v11  ;;  %v3405_v46 = vmul.f32 1.442695, %v3356_v40  ;;  %v3357_v1 = vsub.f32 %v8948_v6, %v3299_v2 }
 0x8e3   : > { %v3302_v60 = vpop.xlane.xlu1 %3301 }
 0x8e4   : > { %6517 = vpow2.f32 %v3405_v46  ;;  %v3407_v38 = vmul.f32 1.442695, %v3357_v1  ;;  %v3358_v31 = vsub.f32 %v8966_v52, %v3302_v60 }
 0x8e5   : > { %v3305_v19 = vpop.xlane.xlu0 %3304 }
 0x8e6   : > { %6519 = vpow2.f32 %v3407_v38  ;;  %v3409_v47 = vmul.f32 1.442695, %v3358_v31  ;;  %v3359_v48 = vsub.f32 %v8978_v35, %v3305_v19 }
 0x8e7   : > { %v3308_v49 = vpop.xlane.xlu1 %3307 }
 0x8e8   : > { %6521 = vpow2.f32 %v3409_v47  ;;  %v3411_v45 = vmul.f32 1.442695, %v3359_v48  ;;  %v3360_v6 = vsub.f32 %v8996_v23, %v3308_v49 }
 0x8e9   : > { %v3311_v15 = vpop.xlane.xlu0 %3310 }
 0x8ea   : > { %v3361_v21 = vsub.f32 %v8988_v59, %v3311_v15  ;;  %v3413_v27 = vmul.f32 1.442695, %v3360_v6 }
 0x8eb   : > { %v3314_v37 = vpop.xlane.xlu1 %3313 }
 0x8ec   : > { %v9161_v56 = vpop.eup %6515  ;;  %v3415_v41 = vmul.f32 1.442695, %v3361_v21  ;;  %v3362_v59 = vsub.f32 %v9003_v8, %v3314_v37 }
 0x8ed   : > { %v3317_v50 = vpop.xlane.xlu0 %3316  ;;  %v3483_v52 = vsel %vm1291_vm1, %v9161_v56, 0.0 }
 0x8ee   : > { %v9166_v39 = vpop.eup %6517  ;;  %6523 = vpow2.f32 %v3415_v41  ;;  %3484 = vadd.xlane.f32.xlu1 %v3483_v52  ;;  %v3417_v2 = vmul.f32 1.442695, %v3362_v59  ;;  %v3363_v48 = vsub.f32 %v9015_v30, %v3317_v50 }
 0x8ef   : > { %v3320_v35 = vpop.xlane.xlu1 %3319  ;;  %6525 = vpow2.f32 %v3411_v45  ;;  %v3486_v11 = vsel %vm1291_vm1, %v9166_v39, 0.0 }
 0x8f0   : > { %v9171_v40 = vpop.eup %6519  ;;  %6527 = vpow2.f32 %v3413_v27  ;;  %v3419_v41 = vmul.f32 1.442695, %v3363_v48  ;;  %v3364_v52 = vsub.f32 %v9027_v58, %v3320_v35 }
 0x8f1   : > { %v3323_v10 = vpop.xlane.xlu0 %3322  ;;  %v3489_v1 = vsel %vm1291_vm1, %v9171_v40, 0.0  ;;  %6529 = vpow2.f32 %v3417_v2 }
 0x8f2   : > { %3487 = vadd.xlane.f32.xlu1 %v3486_v11  ;;  %v9177_v60 = vpop.eup %6521  ;;  %v3421_v2 = vmul.f32 1.442695, %v3364_v52 }
 0x8f3   : > { %v3326_v23 = vpop.xlane.xlu1 %3325  ;;  %v3492_v19 = vsel %vm1291_vm1, %v9177_v60, 0.0 }
 0x8f5   : > { %v9173_v46 = vpop.xlane.xlu0 %3328 }
 0x8f6   : > { %3490 = vadd.xlane.f32.xlu1 %v3489_v1 }
 0x8f7   : > { %v9181_v8 = vpop.xlane.xlu1 %3331 }
 0x8f8   : > { %v9179_v38 = vpop.eup %6523 }
 0x8f9   : > { %v9183_v31 = vpop.xlane.xlu0 %3334  ;;  %v3501_v49 = vsel %vm1291_vm1, %v9179_v38, 0.0  ;;  %v9189_v47 = vpop.eup %6525 }
 0x8fa   : > { %3493 = vadd.xlane.f32.xlu1 %v3492_v19  ;;  %3502 = vadd.xlane.f32.xlu0 %v3501_v49  ;;  %v3495_v21 = vsel %vm1291_vm1, %v9189_v47, 0.0  ;;  %v9194_v37 = vpop.eup %6527  ;;  %v9208_v19 = vadd.f32 %v9065_v44, %v8930_v34 }
 0x8fb   : > { %v9197_v6 = vpop.xlane.xlu1 %3337  ;;  %v3498_v11 = vsel %vm1291_vm1, %v9194_v37, 0.0  ;;  %v9202_v30 = vpop.eup %6529 }
 0x8fc   : > { %v3504_v49 = vsel %vm1291_vm1, %v9202_v30, 0.0  ;;  %v3288_v34 = vsel %vm1291_vm1, %v9208_v19, -inf }
 0x8fd   : > { %v3251_v15 = vpop.xlane.xlu0 %3250 }
 0x8fe   : > { %v3341_v45 = vsub.f32 %v9074_v43, %v3251_v15  ;;  %3496 = vadd.xlane.f32.xlu1 %v3495_v21  ;;  %v3365_v43 = vsub.f32 %v9022_v17, %v3323_v10  ;;  %v9215_v15 = vadd.f32 %v9055_v63, %v8932_v0 }
 0x8ff   : > { %v3248_v58 = vpop.xlane.xlu1 %3247 }
 0x900   : > { %v3375_v27 = vmul.f32 1.442695, %v3341_v45  ;;  %v3423_v48 = vmul.f32 1.442695, %v3365_v43  ;;  %v3282_v0 = vsel %vm1291_vm1, %v9215_v15, -inf }
 0x901   : > { %v3245_v59 = vpop.xlane.xlu0 %3244 }
 0x902   : > { %6531 = vpow2.f32 %v3375_v27  ;;  %v3339_v50 = vsub.f32 %v9086_v54, %v3245_v59  ;;  %3499 = vadd.xlane.f32.xlu1 %v3498_v11  ;;  %v3366_v54 = vsub.f32 %v9034_v26, %v3326_v23 }
 0x903   : > { %6533 = vpow2.f32 %v3419_v41  ;;  %v3266_v10 = vpop.xlane.xlu1 %3265 }
 0x904   : > { %v3371_v1 = vmul.f32 1.442695, %v3339_v50  ;;  %v3425_v45 = vmul.f32 1.442695, %v3366_v54 }
 0x905   : > { %v3254_v35 = vpop.xlane.xlu0 %3253 }
 0x906   : > { %6535 = vpow2.f32 %v3371_v1  ;;  %3505 = vadd.xlane.f32.xlu1 %v3504_v49  ;;  %v3342_v41 = vsub.f32 %v9097_v25, %v3254_v35  ;;  %v3340_v25 = vsub.f32 %v9080_v42, %v3248_v58  ;;  %v3346_v42 = vsub.f32 %v9091_v14, %v3266_v10 }
 0x907   : > { %6537 = vpow2.f32 %v3421_v2  ;;  %v3260_v50 = vpop.xlane.xlu1 %3259 }
 0x908   : > { %6539 = vpow2.f32 %v3423_v48  ;;  %v3377_v59 = vmul.f32 1.442695, %v3342_v41  ;;  %v3373_v49 = vmul.f32 1.442695, %v3340_v25  ;;  %v3344_v41 = vsub.f32 %v9103_v13, %v3260_v50 }
 0x909   : > { %v3263_v17 = vpop.xlane.xlu0 %3262 }
 0x90a   : > { %v3345_v44 = vsub.f32 %v9109_v57, %v3263_v17  ;;  %3289 = vmax.xlane.f32.xlu1 %v3288_v34  ;;  %v3381_v13 = vmul.f32 1.442695, %v3344_v41 }
 0x90c   : > { %v9220_v21 = vpop.eup %6531  ;;  %v3383_v52 = vmul.f32 1.442695, %v3345_v44  ;;  %v3278_v44 = vpop.xlane.xlu1 %3277 }
 0x90d   : > { %v3257_v26 = vpop.xlane.xlu0 %3256  ;;  %v3441_v63 = vsel %vm1291_vm1, %v9220_v21, 0.0  ;;  %v9227_v23 = vpop.eup %6533  ;;  %v3350_v25 = vsub.f32 %v9114_v5, %v3278_v44  ;;  %v3368_v5 = vsub.f32 %v9058_v61, %v9181_v8 }
 0x90e   : > { %6541 = vpow2.f32 %v3383_v52  ;;  %v3343_v57 = vsub.f32 %v9120_v3, %v3257_v26  ;;  %3283 = vmax.xlane.f32.xlu1 %v3282_v0  ;;  %3442 = vadd.xlane.f32.xlu0 %v3441_v63  ;;  %v3507_v43 = vsel %vm1291_vm1, %v9227_v23, 0.0  ;;  %v3367_v63 = vsub.f32 %v9043_v9, %v9173_v46 }
 0x90f   : > { %6543 = vpow2.f32 %v3425_v45  ;;  %v3429_v61 = vmul.f32 1.442695, %v3368_v5 }
 0x910   : > { %v9230_v27 = vpop.eup %6535  ;;  %v3379_v11 = vmul.f32 1.442695, %v3343_v57  ;;  %v3427_v46 = vmul.f32 1.442695, %v3367_v63 }
 0x911   : > { %v3275_v2 = vpop.xlane.xlu0 %3274  ;;  %v3435_v1 = vsel %vm1291_vm1, %v9230_v27, 0.0  ;;  %v9237_v35 = vpop.eup %6537 }
 0x912   : > { %6545 = vpow2.f32 %v3379_v11  ;;  %v3349_v3 = vsub.f32 %v9130_v55, %v3275_v2  ;;  %3508 = vadd.xlane.f32.xlu1 %v3507_v43  ;;  %3436 = vadd.xlane.f32.xlu0 %v3435_v1  ;;  %v3510_v54 = vsel %vm1291_vm1, %v9237_v35, 0.0  ;;  %v9243_v17 = vpop.eup %6539  ;;  %v3385_v55 = vmul.f32 1.442695, %v3346_v42  ;;  %v3272_v11 = vpop.xlane.xlu1 %3271 }
 0x913   : > { %6547 = vpow2.f32 %v3377_v59  ;;  %v3513_v52 = vsel %vm1291_vm1, %v9243_v17, 0.0 }
 0x914   : > { %v3391_v58 = vmul.f32 1.442695, %v3349_v3  ;;  %v3393_v3 = vmul.f32 1.442695, %v3350_v25 }
 0x915   : > { %v3269_v48 = vpop.xlane.xlu0 %3268 }
 0x916   : > { %6549 = vpow2.f32 %v3391_v58  ;;  %v3347_v34 = vsub.f32 %v9138_v53, %v3269_v48  ;;  %3511 = vadd.xlane.f32.xlu1 %v3510_v54 }
 0x917   : > { %6551 = vpow2.f32 %v3373_v49  ;;  %v3348_v49 = vsub.f32 %v9125_v28, %v3272_v11  ;;  %v3369_v28 = vsub.f32 %v9050_v12, %v9183_v31 }
 0x918   : > { %v9246_v45 = vpop.eup %6541  ;;  %v3387_v14 = vmul.f32 1.442695, %v3347_v34 }
 0x919   : > { %v3287_v10 = vpop.xlane.xlu0 %3286  ;;  %v3453_v26 = vsel %vm1291_vm1, %v9246_v45, 0.0  ;;  %v9253_v0 = vpop.eup %6543  ;;  %v3389_v34 = vmul.f32 1.442695, %v3348_v49  ;;  %v10527_v49 = vld [vmem:[#allocation37_spill] sm:$0xff] }
 0x91a   : > { %6553 = vpow2.f32 %v3387_v14  ;;  %v3353_v53 = vsub.f32 %v9143_v33, %v3287_v10  ;;  %3514 = vadd.xlane.f32.xlu1 %v3513_v52  ;;  %3454 = vadd.xlane.f32.xlu0 %v3453_v26  ;;  %v3516_v2 = vsel %vm1291_vm1, %v9253_v0, 0.0  ;;  %v3431_v10 = vmul.f32 1.442695, %v3369_v28 }
 0x91b   : > { %6555 = vpow2.f32 %v3385_v55 }
 0x91c   : > { %v9258_v57 = vpop.eup %6545  ;;  %v3399_v59 = vmul.f32 1.442695, %v3353_v53 }
 0x91d   : > { %v3281_v50 = vpop.xlane.xlu0 %3280  ;;  %v3447_v33 = vsel %vm1291_vm1, %v9258_v57, 0.0  ;;  %v9265_v43 = vpop.eup %6547 }
 0x91e   : > { %6557 = vpow2.f32 %v3399_v59  ;;  %v3351_v9 = vsub.f32 %v9148_v51, %v3281_v50  ;;  %3517 = vadd.xlane.f32.xlu1 %v3516_v2  ;;  %3448 = vadd.xlane.f32.xlu0 %v3447_v33  ;;  %v3444_v58 = vsel %vm1291_vm1, %v9265_v43, 0.0 }
 0x91f   : > { %6559 = vpow2.f32 %v3381_v13 }
 0x920   : > { %v9270_v1 = vpop.eup %6549  ;;  %v3395_v42 = vmul.f32 1.442695, %v3351_v9 }
 0x921   : > { %v3465_v48 = vsel %vm1291_vm1, %v9270_v1, 0.0  ;;  %v9277_v51 = vpop.eup %6551  ;;  %v3612_v54 = vpop.permute.xlu0 %3611 }
 0x922   : > { %6561 = vpow2.f32 %v3395_v42  ;;  %3445 = vadd.xlane.f32.xlu1 %v3444_v58  ;;  %3466 = vadd.xlane.f32.xlu0 %v3465_v48  ;;  %v3438_v44 = vsel %vm1291_vm1, %v9277_v51, 0.0 }
 0x923   : > { %6563 = vpow2.f32 %v3427_v46  ;;  %5930 = vmatprep.subr.bf16.mxu1 %v3612_v54 }
 0x924   : > { %v9279_v8 = vpop.eup %6553  ;;  %6565 = vpow2.f32 %v3393_v3  ;;  %5931 = vmatpush3.bf16.msra.mxu1 %v3612_v54  ;;  %v6810_v3 = vld [vmem:[#allocation6 + $0x8] sm:$0xff]  }
 0x925   : > { %v3459_v55 = vsel %vm1291_vm1, %v9279_v8, 0.0  ;;  %v9287_v41 = vpop.eup %6555  ;;  %6567 = vpow2.f32 %v3429_v61 }
 0x926   : > { %3439 = vadd.xlane.f32.xlu1 %v3438_v44  ;;  %3460 = vadd.xlane.f32.xlu0 %v3459_v55  ;;  %6569 = vpow2.f32 %v3389_v34  ;;  %v3456_v12 = vsel %vm1291_vm1, %v9287_v41, 0.0 }
 0x927   : > { %6571 = vpow2.f32 %v3431_v10 }
 0x928   : > { %v9289_v14 = vpop.eup %6557 }
 0x929   : > { %v3477_v31 = vsel %vm1291_vm1, %v9289_v14, 0.0  ;;  %v9295_v52 = vpop.eup %6559 }
 0x92a   : > { %3457 = vadd.xlane.f32.xlu1 %v3456_v12  ;;  %3478 = vadd.xlane.f32.xlu0 %v3477_v31  ;;  %v3450_v63 = vsel %vm1291_vm1, %v9295_v52, 0.0 }
 0x92c   : > { %v9297_v26 = vpop.eup %6561 }
 0x92d   : > { %v9299_v53 = vpop.eup %6563  ;;  %v3471_v13 = vsel %vm1291_vm1, %v9297_v26, 0.0 }
 0x92e   : > { %v9305_v25 = vpop.eup %6565  ;;  %3451 = vadd.xlane.f32.xlu1 %v3450_v63  ;;  %3472 = vadd.xlane.f32.xlu0 %v3471_v13  ;;  %v3519_v50 = vsel %vm1291_vm1, %v9299_v53, 0.0 }
 0x92f   : > { %v9307_v59 = vpop.eup %6567  ;;  %v3468_v11 = vsel %vm1291_vm1, %v9305_v25, 0.0 }
 0x930   : > { %v9313_v2 = vpop.eup %6569  ;;  %v3522_v9 = vsel %vm1291_vm1, %v9307_v59, 0.0 }
 0x931   : > { %v3462_v33 = vsel %vm1291_vm1, %v9313_v2, 0.0  ;;  %v9319_v46 = vpop.eup %6571 }
 0x932   : > { %3469 = vadd.xlane.f32.xlu1 %v3468_v11  ;;  %3520 = vadd.xlane.f32.xlu0 %v3519_v50  ;;  %v3525_v5 = vsel %vm1291_vm1, %v9319_v46, 0.0 }
 0x936   : > { %3463 = vadd.xlane.f32.xlu1 %v3462_v33  ;;  %3523 = vadd.xlane.f32.xlu0 %v3522_v9 }
 0x93a   : > { %3526 = vadd.xlane.f32.xlu0 %v3525_v5 }
 0x950   : > { %3735 = vrot.lane.b32.xlu0 %v6810_v3, %s7040_s10 }
 0x954   : > { %3956 = vrot.lane.b32.xlu0 %v10482_v16, %s7041_s21  ;;  %v10528_v16 = vld [vmem:[#allocation38_spill] sm:$0xff] }
 0x958   : > { %3958 = vrot.lane.b32.xlu0 %v10483_v29, %s7041_s21  ;;  %v10529_v29 = vld [vmem:[#allocation40_spill] sm:$0xff] }
 0x95c   : > { %3960 = vrot.lane.b32.xlu0 %v10485_v32, %s7041_s21  ;;  %v10530_v32 = vld [vmem:[#allocation42_spill] sm:$0xff] }
 0x960   : > { %3964 = vrot.lane.b32.xlu0 %v10487_v36, %s7041_s21  ;;  %v10531_v36 = vld [vmem:[#allocation44_spill] sm:$0xff] }
 0x964   : > { %3966 = vrot.lane.b32.xlu0 %v10486_v24, %s7041_s21 }
 0x968   : > { %3968 = vrot.lane.b32.xlu0 %v10488_v62, %s7041_s21 }
 0x96c   : > { %3970 = vrot.lane.b32.xlu0 %v10527_v49, %s7041_s21 }
 0x970   : > { %4098 = vrot.lane.b32.xlu0 %v10528_v16, %s7041_s21 }
 0x974   : > { %4102 = vrot.lane.b32.xlu0 %v10529_v29, %s7041_s21 }
 0x978   : > { %4106 = vrot.lane.b32.xlu0 %v10530_v32, %s7041_s21 }
 0x97b   : > { %v3485_v42 = vpop.xlane.xlu1 %3484 }
 0x97c   : > { %4110 = vrot.lane.b32.xlu0 %v10531_v36, %s7041_s21  ;;  %6573 = vrcp.f32 %v3485_v42 }
 0x97f   : > { %v3488_v24 = vpop.xlane.xlu1 %3487 }
 0x980   : > { %6575 = vrcp.f32 %v3488_v24 }
 0x983   : > { %v3491_v62 = vpop.xlane.xlu1 %3490 }
 0x986   : > { %v6574_v48 = vpop.eup %6573 }
 0x987   : > { %v3494_v58 = vpop.xlane.xlu1 %3493  ;;  %v3579_v28 = vmul.f32 %v6574_v48, %v9161_v56  ;;  %v9352_v63 = vpop.xlane.xlu0 %3502 }
 0x98a   : > { %v6576_v54 = vpop.eup %6575 }
 0x98b   : > { %v3497_v61 = vpop.xlane.xlu1 %3496  ;;  %v3580_v34 = vmul.f32 %v6576_v54, %v9166_v39 }
 0x98d   : > { %v3603_v44 = vpack.c.bf16 %v3580_v34, %v3579_v28 }
 0x98f   : > { %5950 = vmatprep.mubr.msk.bf16.mxu0 %vm1291_vm1, %v3603_v44  ;;  %v3500_v55 = vpop.xlane.xlu1 %3499 }
 0x993   : > { %v9349_v10 = vpop.xlane.xlu1 %3505 }
 0x997   : > { %v3290_v12 = vpop.xlane.xlu1 %3289 }
 0x998   : > { %v3354_v31 = vsub.f32 %v9208_v19, %v3290_v12 }
 0x99a   : > { %v3401_v13 = vmul.f32 1.442695, %v3354_v31 }
 0x99b   : > { %v3284_v11 = vpop.xlane.xlu1 %3283  ;;  %v3443_v33 = vpop.xlane.xlu0 %3442 }
 0x99c   : > { %6577 = vpow2.f32 %v3401_v13  ;;  %v3352_v50 = vsub.f32 %v9215_v15, %v3284_v11 }
 0x99e   : > { %v3397_v56 = vmul.f32 1.442695, %v3352_v50  ;;  %v6811_v50 = vld [vmem:[%s10464_s30] sm:$0xff]  }
 0x99f   : > { %v9355_v9 = vpop.xlane.xlu1 %3508  ;;  %v3437_v39 = vpop.xlane.xlu0 %3436 }
 0x9a0   : > { %6579 = vpow2.f32 %v3397_v56 }
 0x9a3   : > { %v3512_v5 = vpop.xlane.xlu1 %3511 }
 0x9a6   : > { %v9357_v3 = vpop.eup %6577 }
 0x9a7   : > { %v9359_v49 = vpop.xlane.xlu1 %3514  ;;  %v3455_v16 = vpop.xlane.xlu0 %3454  ;;  %v3480_v19 = vsel %vm1291_vm1, %v9357_v3, 0.0 }
 0x9a8   : > { %3481 = vadd.xlane.f32.xlu1 %v3480_v19 }
 0x9aa   : > { %v9363_v29 = vpop.eup %6579 }
 0x9ab   : > { %v9365_v32 = vpop.xlane.xlu1 %3517  ;;  %v3449_v15 = vpop.xlane.xlu0 %3448  ;;  %v3474_v42 = vsel %vm1291_vm1, %v9363_v29, 0.0 }
 0x9ac   : > { %3475 = vadd.xlane.f32.xlu1 %v3474_v42 }
 0x9af   : > { %v3446_v36 = vpop.xlane.xlu1 %3445  ;;  %v3467_v24 = vpop.xlane.xlu0 %3466 }
 0x9b0   : > { %6581 = vrcp.f32 %v3446_v36 }
 0x9b1   : > { %6583 = vrcp.f32 %v3437_v39 }
 0x9b2   : > { %6585 = vrcp.f32 %v3443_v33 }
 0x9b3   : > { %v3440_v48 = vpop.xlane.xlu1 %3439  ;;  %v3461_v54 = vpop.xlane.xlu0 %3460 }
 0x9b4   : > { %6587 = vrcp.f32 %v3440_v48 }
 0x9b7   : > { %v3458_v28 = vpop.xlane.xlu1 %3457  ;;  %v9369_v34 = vpop.xlane.xlu0 %3478 }
 0x9b8   : > { %6589 = vrcp.f32 %v3458_v28 }
 0x9b9   : > { %6591 = vrcp.f32 %v3449_v15 }
 0x9ba   : > { %v6582_v44 = vpop.eup %6581  ;;  %6593 = vrcp.f32 %v3455_v16 }
 0x9bb   : > { %v3452_v12 = vpop.xlane.xlu1 %3451  ;;  %v9371_v31 = vpop.xlane.xlu0 %3472  ;;  %v3566_v56 = vmul.f32 %v6582_v44, %v9265_v43 }
 0x9bc   : > { %v6584_v13 = vpop.eup %6583  ;;  %6595 = vrcp.f32 %v3452_v12 }
 0x9bd   : > { %v6586_v11 = vpop.eup %6585  ;;  %6597 = vrcp.f32 %v3494_v58  ;;  %3972 = vrot.lane.b32.xlu1 %v6811_v50, %s7041_s21  ;;  %v3563_v19 = vmul.f32 %v6584_v13, %v9230_v27 }
 0x9be   : > { %v6588_v33 = vpop.eup %6587  ;;  %6599 = vrcp.f32 %v3500_v55  ;;  %v3565_v58 = vmul.f32 %v6586_v11, %v9220_v21 }
 0x9bf   : > { %6601 = vrcp.f32 %v3491_v62  ;;  %v3470_v39 = vpop.xlane.xlu1 %3469  ;;  %v3521_v16 = vpop.xlane.xlu0 %3520  ;;  %v3564_v15 = vmul.f32 %v6588_v33, %v9277_v51 }
 0x9c0   : > { %6603 = vrcp.f32 %v3497_v61  ;;  %v3596_v36 = vpack.c.bf16 %v3566_v56, %v3565_v58 }
 0x9c1   : > { %6605 = vrcp.f32 %v3470_v39  ;;  %v3595_v42 = vpack.c.bf16 %v3564_v15, %v3563_v19 }
 0x9c2   : > { %6607 = vrcp.f32 %v3461_v54  ;;  %v6590_v48 = vpop.eup %6589 }
 0x9c3   : > { %6609 = vrcp.f32 %v3467_v24  ;;  %v3464_v28 = vpop.xlane.xlu1 %3463  ;;  %5932 = vmatprep.mubr.msk.bf16.mxu1 %vm1291_vm1, %v3595_v42  ;;  %v3524_v43 = vpop.xlane.xlu0 %3523  ;;  %v3570_v21 = vmul.f32 %v6590_v48, %v9287_v41  ;;  %v3370_v41 = vsub.f32 %v9068_v18, %v9197_v6 }
 0x9c4   : > { %v6592_v62 = vpop.eup %6591  ;;  %6611 = vrcp.f32 %v3464_v28  ;;  %5933 = vmatmul.mubr.msk.bf16.vlgmr.msra.gmra.mrb[100].mxu1 %vm1291_vm1, %v3596_v36 }
 0x9c5   : > { %v6594_v27 = vpop.eup %6593  ;;  %6613 = vrcp.f32 %v9349_v10  ;;  %v3567_v24 = vmul.f32 %v6592_v62, %v9258_v57  ;;  %v3433_v6 = vmul.f32 1.442695, %v3370_v41 }
 0x9c6   : > { %v6596_v51 = vpop.eup %6595  ;;  %6615 = vrcp.f32 %v3512_v5  ;;  %v3569_v12 = vmul.f32 %v6594_v27, %v9246_v45 }
 0x9c7   : > { %v6598_v61 = vpop.eup %6597  ;;  %6617 = vrcp.f32 %v9352_v63  ;;  %v9386_v55 = vpop.xlane.xlu0 %3526  ;;  %v3568_v54 = vmul.f32 %v6596_v51, %v9295_v52 }
 0x9c8   : > { %v6600_v44 = vpop.eup %6599  ;;  %6619 = vrcp.f32 %v9355_v9  ;;  %v3582_v5 = vmul.f32 %v6598_v61, %v9177_v60  ;;  %v3598_v63 = vpack.c.bf16 %v3570_v21, %v3569_v12 }
 0x9c9   : > { %v6602_v13 = vpop.eup %6601  ;;  %v3597_v10 = vpack.c.bf16 %v3568_v54, %v3567_v24  ;;  %v3584_v52 = vmul.f32 %v6600_v44, %v9194_v37  ;;  %6621 = vrcp.f32 %v9365_v32 }
 0x9ca   : > { %v6604_v11 = vpop.eup %6603  ;;  %v3581_v9 = vmul.f32 %v6602_v13, %v9171_v40  ;;  %6623 = vrcp.f32 %v3524_v43 }
 0x9cb   : > { %v6606_v50 = vpop.eup %6605  ;;  %5936 = vmatprep.mubr.msk.bf16.mxu1 %vm1291_vm1, %v3597_v10  ;;  %v3736_v57 = vpop.permute.xlu0 %3735  ;;  %v3583_v18 = vmul.f32 %v6604_v11, %v9189_v47  ;;  %6625 = vrcp.f32 %v9359_v49 }
 0x9cc   : > { %v6608_v33 = vpop.eup %6607  ;;  %5937 = vmatmul.mubr.msk.bf16.gmra.mrb[104].mxu1 %vm1291_vm1, %v3598_v63  ;;  %5948 = vmatprep.subr.bf16.mxu0 %v3736_v57  ;;  %v3604_v56 = vpack.c.bf16 %v3582_v5, %v3581_v9  ;;  %v3574_v39 = vmul.f32 %v6606_v50, %v9305_v25  ;;  %6627 = vrcp.f32 %v3521_v16 }
 0x9cd   : > { %v6610_v45 = vpop.eup %6609  ;;  %5949 = vmatpush3.bf16.msra.mxu0 %v3736_v57  ;;  %v3605_v37 = vpack.c.bf16 %v3584_v52, %v3583_v18  ;;  %v3571_v40 = vmul.f32 %v6608_v33, %v9279_v8  ;;  %6629 = vpow2.f32 %v3433_v6 }
 0x9ce   : > { %v6612_v60 = vpop.eup %6611  ;;  %v3573_v47 = vmul.f32 %v6610_v45, %v9270_v1 }
 0x9cf   : > { %v6614_v19 = vpop.eup %6613  ;;  %v3572_v15 = vmul.f32 %v6612_v60, %v9313_v2  ;;  %v3957_v10 = vpop.permute.xlu0 %3956 }
 0x9d0   : > { %v6616_v58 = vpop.eup %6615  ;;  %5951 = vmatmul.mubr.msk.bf16.vlgmr.msra.gmra.mrb[124].mxu0 %vm1291_vm1, %v3604_v56  ;;  %v3600_v25 = vpack.c.bf16 %v3574_v39, %v3573_v47  ;;  %v3586_v48 = vmul.f32 %v6614_v19, %v9202_v30 }
 0x9d1   : > { %v6618_v32 = vpop.eup %6617  ;;  %5954 = vmatprep.mubr.msk.bf16.mxu0 %vm1291_vm1, %v3605_v37  ;;  %v3599_v42 = vpack.c.bf16 %v3572_v15, %v3571_v40  ;;  %v3588_v8 = vmul.f32 %v6616_v58, %v9237_v35 }
 0x9d2   : > { %v6620_v36 = vpop.eup %6619  ;;  %v3585_v2 = vmul.f32 %v6618_v32, %v9179_v38 }
 0x9d3   : > { %5940 = vmatprep.mubr.msk.bf16.mxu1 %vm1291_vm1, %v3599_v42  ;;  %v3587_v49 = vmul.f32 %v6620_v36, %v9227_v23  ;;  %v6622_v16 = vpop.eup %6621  ;;  %v3959_v5 = vpop.permute.xlu0 %3958 }
 0x9d4   : > { %5941 = vmatmul.mubr.msk.bf16.gmra.mrb[108].mxu1 %vm1291_vm1, %v3600_v25  ;;  %v3606_v1 = vpack.c.bf16 %v3586_v48, %v3585_v2  ;;  %v6624_v43 = vpop.eup %6623  ;;  %v3590_v27 = vmul.f32 %v6622_v16, %v9253_v0  ;;  %v6812_v0 = vld [vmem:[%s10464_s30 + $0x8] sm:$0xff]  }
 0x9d5   : > { %v3607_v28 = vpack.c.bf16 %v3588_v8, %v3587_v49  ;;  %v6626_v62 = vpop.eup %6625  ;;  %v3592_v35 = vmul.f32 %v6624_v43, %v9307_v59 }
 0x9d6   : > { %v6628_v30 = vpop.eup %6627  ;;  %v3589_v51 = vmul.f32 %v6626_v62, %v9243_v17  ;;  %v10532_v17 = vld [vmem:[#allocation45_spill] sm:$0xff] }
 0x9d7   : > { %v6630_v21 = vpop.eup %6629  ;;  %v3591_v38 = vmul.f32 %v6628_v30, %v9299_v53  ;;  %v3961_v63 = vpop.permute.xlu0 %3960 }
 0x9d8   : > { %5955 = vmatmul.mubr.msk.bf16.gmra.mrb[128].mxu0 %vm1291_vm1, %v3606_v1  ;;  %v3608_v23 = vpack.c.bf16 %v3590_v27, %v3589_v51  ;;  %v3528_v24 = vsel %vm1291_vm1, %v6630_v21, 0.0 }
 0x9d9   : > { %5958 = vmatprep.mubr.msk.bf16.mxu0 %vm1291_vm1, %v3607_v28  ;;  %v3609_v61 = vpack.c.bf16 %v3592_v35, %v3591_v38 }
 0x9e0   : > { %5959 = vmatmul.mubr.msk.bf16.gmra.mrb[132].mxu0 %vm1291_vm1, %v3608_v23 }
 0x9e1   : > { %3529 = vadd.xlane.f32.xlu1 %v3528_v24  ;;  %5962 = vmatprep.mubr.msk.bf16.mxu0 %vm1291_vm1, %v3609_v61 }
 0x9f2   : > { %3962 = vrot.lane.b32.xlu1 %v10490_v4, %s7041_s21 }
 0x9f6   : > { %4114 = vrot.lane.b32.xlu1 %v6812_v0, %s7041_s21 }
 0x9fa   : > { %4100 = vrot.lane.b32.xlu1 %v10491_v20, %s7041_s21 }
 0x9fe   : > { %4104 = vrot.lane.b32.xlu1 %v10492_v22, %s7041_s21 }
 0xa02   : > { %4108 = vrot.lane.b32.xlu1 %v10493_v7, %s7041_s21 }
 0xa06   : > { %4112 = vrot.lane.b32.xlu1 %v10532_v17, %s7041_s21 }
 0xa35   : > { %v3482_v53 = vpop.xlane.xlu1 %3481 }
 0xa36   : > { %6631 = vrcp.f32 %v3482_v53 }
 0xa37   : > { %6633 = vrcp.f32 %v9371_v31 }
 0xa38   : > { %6635 = vrcp.f32 %v9369_v34 }
 0xa39   : > { %v3476_v4 = vpop.xlane.xlu1 %3475 }
 0xa3a   : > { %6637 = vrcp.f32 %v3476_v4 }
 0xa3b   : > { %6639 = vrcp.f32 %v9386_v55 }
 0xa3d   : > { %v3973_v59 = vpop.permute.xlu1 %3972 }
 0xa3e   : > { %6095 = vmatprep.subr.msk.bf16.mxu1 %vm1037_vm0, %v3973_v59  ;;  %v3999_v20 = vsel %vm1037_vm0, %v3973_v59, 0 }
 0xa3f   : > { %5967 = vmatpush3.bf16.xpose.msra.mxu1 %v3999_v20  ;;  %v6813_v20 = vld [vmem:[%s10481_s27] sm:$0xff] }
 0xa40   : > { %v6632_v22 = vpop.eup %6631 }
 0xa41   : > { %v6634_v54 = vpop.eup %6633  ;;  %v3578_v12 = vmul.f32 %v6632_v22, %v9357_v3 }
 0xa42   : > { %v6636_v7 = vpop.eup %6635  ;;  %v3575_v13 = vmul.f32 %v6634_v54, %v9297_v26  ;;  %v3965_v26 = vpop.permute.xlu0 %3964 }
 0xa43   : > { %v3577_v34 = vmul.f32 %v6636_v7, %v9289_v14 }
 0xa44   : > { %v6638_v44 = vpop.eup %6637 }
 0xa45   : > { %v3576_v31 = vmul.f32 %v6638_v44, %v9363_v29  ;;  %v3602_v41 = vpack.c.bf16 %v3578_v12, %v3577_v34  ;;  %v6640_v52 = vpop.eup %6639 }
 0xa46   : > { %v3967_v3 = vpop.permute.xlu0 %3966  ;;  %v3593_v18 = vmul.f32 %v6640_v52, %v9319_v46 }
 0xa47   : > { %v3601_v11 = vpack.c.bf16 %v3576_v31, %v3575_v13 }
 0xa49   : > { %5944 = vmatprep.mubr.msk.bf16.mxu1 %vm1291_vm1, %v3601_v11 }
 0xa4a   : > { %5945 = vmatmul.mubr.msk.bf16.gmra.mrb[112].mxu1 %vm1291_vm1, %v3602_v41  ;;  %v3969_v14 = vpop.permute.xlu0 %3968 }
 0xa4b   : > { %5968 = vmatprep.mubr.msk.bf16.mxu1 %vm1037_vm0, %v3957_v10 }
 0xa4e   : > { %v3971_v9 = vpop.permute.xlu0 %3970 }
 0xa52   : > { %5969 = vmatmul.mubr.msk.bf16.vlgmr.msra.gmra.mrb[116].mxu1 %vm1037_vm0, %v3959_v5  ;;  %v4099_v6 = vpop.permute.xlu0 %4098  ;;  %v6815_v5 = vld [vmem:[%s10481_s27 + $0x8] sm:$0xff] }
 0xa53   : > { %5972 = vmatprep.mubr.msk.bf16.mxu1 %vm1037_vm0, %v3961_v63 }
 0xa56   : > { %v4103_v39 = vpop.permute.xlu0 %4102 }
 0xa5a   : > { %v4107_v19 = vpop.permute.xlu0 %4106 }
 0xa5e   : > { %v4111_v40 = vpop.permute.xlu0 %4110 }
 0xa6e   : > { %v3530_v29 = vpop.xlane.xlu1 %3529 }
 0xa6f   : > { %6641 = vrcp.f32 %v3530_v29 }
 0xa72   : > { %v3963_v50 = vpop.permute.xlu1 %3962 }
 0xa73   : > { %5973 = vmatmul.mubr.msk.bf16.gmra.mrb[120].mxu1 %vm1037_vm0, %v3963_v50 }
 0xa74   : > { %5976 = vmatprep.mubr.msk.bf16.mxu1 %vm1037_vm0, %v3965_v26 }
 0xa76   : > { %v4115_v57 = vpop.permute.xlu1 %4114 }
 0xa77   : > { %6096 = vmatprep.subr.msk.bf16.mxu0 %vm1037_vm0, %v4115_v57  ;;  %v4141_v33 = vsel %vm1037_vm0, %v4115_v57, 0 }
 0xa78   : > { %5985 = vmatpush3.bf16.xpose.msra.mxu0 %v4141_v33 }
 0xa79   : > { %v6642_v45 = vpop.eup %6641 }
 0xa7a   : > { %v3594_v55 = vmul.f32 %v6642_v45, %v6630_v21  ;;  %v4101_v56 = vpop.permute.xlu1 %4100 }
 0xa7b   : > { %5977 = vmatmul.mubr.msk.bf16.gmra.mrb[124].mxu1 %vm1037_vm0, %v3967_v3 }
 0xa7c   : > { %5980 = vmatprep.mubr.msk.bf16.mxu1 %vm1037_vm0, %v3969_v14  ;;  %v3610_v60 = vpack.c.bf16 %v3594_v55, %v3593_v18 }
 0xa7e   : > { %5963 = vmatmul.mubr.msk.bf16.gmra.mrb[136].mxu0 %vm1291_vm1, %v3610_v60  ;;  %v4105_v46 = vpop.permute.xlu1 %4104 }
 0xa7f   : > { %5986 = vmatprep.mubr.msk.bf16.mxu0 %vm1037_vm0, %v4099_v6 }
 0xa82   : > { %v4109_v37 = vpop.permute.xlu1 %4108 }
 0xa83   : > { %5981 = vmatmul.mubr.msk.bf16.gmra.mrb[128].mxu1 %vm1037_vm0, %v3971_v9 }
 0xa86   : > { %5987 = vmatmul.mubr.msk.bf16.vlgmr.msra.gmra.mrb[140].mxu0 %vm1037_vm0, %v4101_v56  ;;  %v4113_v25 = vpop.permute.xlu1 %4112 }
 0xa87   : > { %5990 = vmatprep.mubr.msk.bf16.mxu0 %vm1037_vm0, %v4103_v39 }
 0xa8e   : > { %5991 = vmatmul.mubr.msk.bf16.gmra.mrb[144].mxu0 %vm1037_vm0, %v4105_v46  ;;  %v6814_v46 = vld [vmem:[%s10481_s27 + $0x10] sm:$0xff] }
 0xa8f   : > { %5994 = vmatprep.mubr.msk.bf16.mxu0 %vm1037_vm0, %v4107_v19 }
 0xa96   : > { %5995 = vmatmul.mubr.msk.bf16.gmra.mrb[148].mxu0 %vm1037_vm0, %v4109_v37 }
 0xa97   : > { %v9466_v15 = vpop.f32.mrb[100].mxu1  ;;  %5998 = vmatprep.mubr.msk.bf16.mxu0 %vm1037_vm0, %v4111_v40 }
 0xa98   : > { %v9469_v58 = vpop.f32.mrb[101].mxu1 }
 0xa99   : > { %v9471_v47 = vpop.f32.mrb[102].mxu1 }
 0xa9a   : > { %v9475_v42 = vpop.f32.mrb[103].mxu1 }
 0xa9e   : > { %5999 = vmatmul.mubr.msk.bf16.gmra.mrb[152].mxu0 %vm1037_vm0, %v4113_v25 }
 0xa9f   : > { %v9480_v48 = vpop.f32.mrb[104].mxu1 }
 0xaa0   : > { %v9482_v8 = vpop.f32.mrb[105].mxu1 }
 0xaa1   : > { %v9484_v2 = vpop.f32.mrb[106].mxu1 }
 0xaa2   : > { %v9488_v1 = vpop.f32.mrb[107].mxu1 }
 0xaa3   : > { %v9492_v28 = vpop.f32.mrb[124].mxu0 }
 0xaa4   : > { %10533 = vst [vmem:[#allocation37_spill] sm:$0xff] %v9492_v28  ;;  %v9494_v43 = vpop.f32.mrb[125].mxu0 }
 0xaa5   : > { %10534 = vst [vmem:[#allocation38_spill] sm:$0xff] %v9494_v43  ;;  %v9496_v62 = vpop.f32.mrb[126].mxu0 }
 0xaa6   : > { %10535 = vst [vmem:[#allocation40_spill] sm:$0xff] %v9496_v62  ;;  %v9500_v27 = vpop.f32.mrb[127].mxu0 }
 0xaa7   : > { %10536 = vst [vmem:[#allocation42_spill] sm:$0xff] %v9500_v27  ;;  %v9504_v51 = vpop.f32.mrb[108].mxu1 }
 0xaa8   : > { %v9506_v21 = vpop.f32.mrb[109].mxu1 }
 0xaa9   : > { %10537 = vst [vmem:[#allocation44_spill] sm:$0xff] %v9506_v21  ;;  %v9508_v38 = vpop.f32.mrb[110].mxu1 }
 0xaaa   : > { %v9512_v61 = vpop.f32.mrb[111].mxu1 }
 0xaab   : > { %v9516_v0 = vpop.f32.mrb[128].mxu0 }
 0xaac   : > { %10538 = vst [vmem:[#allocation45_spill] sm:$0xff] %v9516_v0  ;;  %v9518_v17 = vpop.f32.mrb[129].mxu0 }
 0xaad   : > { %10539 = vst [vmem:[#allocation68_spill] sm:$0xff] %v9518_v17  ;;  %v9520_v53 = vpop.f32.mrb[130].mxu0  ;;  %v6822_v17 = vld [vmem:[%s10481_s27 + $0x48] sm:$0xff] }
 0xaae   : > { %10540 = vst [vmem:[#allocation69_spill] sm:$0xff] %v9520_v53  ;;  %v9524_v59 = vpop.f32.mrb[131].mxu0 }
 0xaaf   : > { %10541 = vst [vmem:[#allocation70_spill] sm:$0xff] %v9524_v59 }
 0xab3   : > { %v9528_v22 = vpop.f32.mrb[132].mxu0 }
 0xab4   : > { %10542 = vst [vmem:[#allocation71_spill] sm:$0xff] %v9528_v22  ;;  %v9530_v54 = vpop.f32.mrb[133].mxu0 }
 0xab5   : > { %10543 = vst [vmem:[#allocation72_spill] sm:$0xff] %v9530_v54  ;;  %v9532_v7 = vpop.f32.mrb[134].mxu0 }
 0xab6   : > { %10544 = vst [vmem:[#allocation73_spill] sm:$0xff] %v9532_v7  ;;  %v9536_v12 = vpop.f32.mrb[135].mxu0 }
 0xab7   : > { %10545 = vst [vmem:[#allocation74_spill] sm:$0xff] %v9536_v12  ;;  %v6820_v12 = vld [vmem:[%s10481_s27 + $0x30] sm:$0xff] }
 0xb1d   : > { %v9540_v31 = vpop.f32.mrb[112].mxu1 }
 0xb1e   : > { %10546 = vst [vmem:[#allocation75_spill] sm:$0xff] %v9540_v31  ;;  %v9542_v10 = vpop.f32.mrb[113].mxu1 }
 0xb1f   : > { %10547 = vst [vmem:[#allocation76_spill] sm:$0xff] %v9542_v10  ;;  %v9544_v34 = vpop.f32.mrb[114].mxu1 }
 0xb20   : > { %10548 = vst [vmem:[#allocation77_spill] sm:$0xff] %v9544_v34  ;;  %v9548_v41 = vpop.f32.mrb[115].mxu1 }
 0xb21   : > { %10549 = vst [vmem:[#allocation78_spill] sm:$0xff] %v9548_v41 }
 0xb25   : > { %v5970_v63 = vpop.f32.mrb[116].mxu1 }
 0xb26   : > { %v4035_v26 = vpop.f32.mrb[117].mxu1 }
 0xb27   : > { %v9552_v3 = vpop.f32.mrb[118].mxu1 }
 0xb28   : > { %v4038_v29 = vpop.f32.mrb[119].mxu1 }
 0xb46   : > { %v9554_v14 = vpop.f32.mrb[120].mxu1 }
 0xb47   : > { %v9556_v50 = vpop.f32.mrb[121].mxu1 }
 0xb48   : > { %v5975_v57 = vpop.f32.mrb[122].mxu1 }
 0xb49   : > { %v9558_v52 = vpop.f32.mrb[123].mxu1 }
 0xb4e   : > { %v9560_v33 = vpop.f32.mrb[124].mxu1 }
 0xb4f   : > { %v9562_v9 = vpop.f32.mrb[125].mxu1 }
 0xb50   : > { %v9564_v45 = vpop.f32.mrb[126].mxu1 }
 0xb51   : > { %v9566_v18 = vpop.f32.mrb[136].mxu0  ;;  %v9568_v55 = vpop.f32.mrb[127].mxu1 }
 0xb52   : > { %10550 = vst [vmem:[#allocation79_spill] sm:$0xff] %v9566_v18  ;;  %v9570_v60 = vpop.f32.mrb[137].mxu0 }
 0xb53   : > { %10551 = vst [vmem:[#allocation80_spill] sm:$0xff] %v9570_v60  ;;  %v9572_v6 = vpop.f32.mrb[138].mxu0 }
 0xb54   : > { %10552 = vst [vmem:[#allocation81_spill] sm:$0xff] %v9572_v6  ;;  %v9576_v39 = vpop.f32.mrb[139].mxu0 }
 0xb55   : > { %10553 = vst [vmem:[#allocation82_spill] sm:$0xff] %v9576_v39  ;;  %v6818_v39 = vld [vmem:[%s10481_s27 + $0x28] sm:$0xff] }
 0xb56   : > { %v9580_v19 = vpop.f32.mrb[128].mxu1  ;;  %v9657_v54 = vadd.f32 %v6818_v39, %v9558_v52  ;;  %v6821_v52 = vld [vmem:[%s10481_s27 + $0x58] sm:$0xff] }
 0xb57   : > { %v9582_v37 = vpop.f32.mrb[129].mxu1 }
 0xb58   : > { %v9584_v40 = vpop.f32.mrb[130].mxu1  ;;  %v4255_v22 = vsel %vm1291_vm1, %v9657_v54, -inf }
 0xb59   : > { %v9586_v25 = vpop.f32.mrb[131].mxu1  ;;  %v5988_v13 = vpop.f32.mrb[140].mxu0 }
 0xb5a   : > { %v4177_v44 = vpop.f32.mrb[141].mxu0  ;;  %v9596_v30 = vadd.f32 %v6814_v46, %v5988_v13 }
 0xb5b   : > { %v9591_v56 = vadd.f32 %v6813_v20, %v4177_v44  ;;  %v5989_v4 = vpop.f32.mrb[142].mxu0  ;;  %v6816_v44 = vld [vmem:[%s10481_s27 + $0x18] sm:$0xff] }
 0xb5c   : > { %v4180_v35 = vpop.f32.mrb[143].mxu0  ;;  %v9608_v23 = vadd.f32 %v6816_v44, %v5989_v4 }
 0xb5d   : > { %v9601_v11 = vadd.f32 %v6815_v5, %v4180_v35  ;;  %v4288_v24 = vsel %vm1291_vm1, %v9591_v56, -inf  ;;  %v4294_v35 = vsel %vm1291_vm1, %v9596_v30, -inf }
 0xb5e   : > { %4289 = vmax.xlane.f32.xlu0 %v4288_v24  ;;  %v6817_v24 = vld [vmem:[%s10481_s27 + $0x20] sm:$0xff]  ;;  %v4297_v4 = vsel %vm1291_vm1, %v9608_v23, -inf }
 0xb5f   : > { %v4291_v13 = vsel %vm1291_vm1, %v9601_v11, -inf  ;;  %v9680_v7 = vadd.f32 %v6817_v24, %v9556_v50 }
 0xb60   : > { %4292 = vmax.xlane.f32.xlu1 %v4291_v13  ;;  %v9623_v13 = vadd.f32 %v6814_v46, %v5970_v63 }
 0xb61   : > { %v9612_v16 = vpop.f32.mrb[144].mxu0 }
 0xb62   : > { %4295 = vmax.xlane.f32.xlu0 %v4294_v35  ;;  %v4193_v49 = vpop.f32.mrb[145].mxu0  ;;  %v4246_v46 = vsel %vm1291_vm1, %v9623_v13, -inf }
 0xb63   : > { %v9619_v36 = vadd.f32 %v6817_v24, %v4193_v49  ;;  %v5993_v32 = vpop.f32.mrb[146].mxu0  ;;  %v9632_v49 = vadd.f32 %v6815_v5, %v4038_v29  ;;  %v4252_v24 = vsel %vm1291_vm1, %v9680_v7, -inf }
 0xb64   : > { %4298 = vmax.xlane.f32.xlu1 %v4297_v4  ;;  %v4196_v60 = vpop.f32.mrb[147].mxu0  ;;  %v9636_v4 = vadd.f32 %v6813_v20, %v4035_v26  ;;  %v9652_v26 = vadd.f32 %v6816_v44, %v9552_v3 }
 0xb65   : > { %v9628_v35 = vadd.f32 %v6818_v39, %v4196_v60  ;;  %v4300_v18 = vsel %vm1291_vm1, %v9619_v36, -inf  ;;  %v9675_v39 = vadd.f32 %v6821_v52, %v9564_v45  ;;  %v9688_v45 = vadd.f32 %v6822_v17, %v9568_v55 }
 0xb66   : > { %4301 = vmax.xlane.f32.xlu0 %v4300_v18  ;;  %v6819_v18 = vld [vmem:[%s10481_s27 + $0x38] sm:$0xff]  ;;  %v4249_v44 = vsel %vm1291_vm1, %v9652_v26, -inf }
 0xb67   : > { %v4303_v6 = vsel %vm1291_vm1, %v9628_v35, -inf  ;;  %v9647_v5 = vadd.f32 %v6819_v18, %v5975_v57  ;;  %v4273_v59 = vsel %vm1291_vm1, %v9675_v39, -inf  ;;  %v4267_v55 = vsel %vm1291_vm1, %v9688_v45, -inf }
 0xb68   : > { %4304 = vmax.xlane.f32.xlu1 %v4303_v6  ;;  %v4243_v6 = vsel %vm1291_vm1, %v9632_v49, -inf }
 0xb69   : > { %v9638_v63 = vpop.f32.mrb[148].mxu0  ;;  %v4261_v57 = vsel %vm1291_vm1, %v9647_v5, -inf }
 0xb6a   : > { %4247 = vmax.xlane.f32.xlu0 %v4246_v46  ;;  %v9642_v60 = vpop.f32.mrb[149].mxu0  ;;  %v4240_v46 = vsel %vm1291_vm1, %v9636_v4, -inf }
 0xb6b   : > { %v5997_v29 = vpop.f32.mrb[150].mxu0 }
 0xb6c   : > { %4244 = vmax.xlane.f32.xlu1 %v4243_v6  ;;  %v4212_v20 = vpop.f32.mrb[151].mxu0  ;;  %v9665_v6 = vadd.f32 %v6820_v12, %v9554_v14 }
 0xb6d   : > { %v9712_v53 = vadd.f32 %v6822_v17, %v4212_v20  ;;  %v6826_v20 = vld [vmem:[%s10481_s27 + $0x60] sm:$0xff] }
 0xb6e   : > { %4241 = vmax.xlane.f32.xlu0 %v4240_v46 }
 0xb6f   : > { %v4315_v17 = vsel %vm1291_vm1, %v9712_v53, -inf }
 0xb70   : > { %4262 = vmax.xlane.f32.xlu1 %v4261_v57 }
 0xb71   : > { %v9667_v3 = vpop.f32.mrb[152].mxu0 }
 0xb72   : > { %4250 = vmax.xlane.f32.xlu0 %v4249_v44  ;;  %v4225_v46 = vpop.f32.mrb[153].mxu0  ;;  %v4258_v44 = vsel %vm1291_vm1, %v9665_v6, -inf }
 0xb73   : > { %v6001_v57 = vpop.f32.mrb[154].mxu0 }
 0xb74   : > { %4256 = vmax.xlane.f32.xlu1 %v4255_v22  ;;  %v4228_v14 = vpop.f32.mrb[155].mxu0  ;;  %v6823_v22 = vld [vmem:[%s10481_s27 + $0x50] sm:$0xff] }
 0xb75   : > { %v9696_v50 = vadd.f32 %v6823_v22, %v9560_v33 }
 0xb76   : > { %4259 = vmax.xlane.f32.xlu0 %v4258_v44  ;;  %v9700_v44 = vadd.f32 %v6819_v18, %v5993_v32  ;;  %v6825_v18 = vld [vmem:[%s10481_s27 + $0x70] sm:$0xff] }
 0xb77   : > { %v4270_v33 = vsel %vm1291_vm1, %v9696_v50, -inf }
 0xb78   : > { %4274 = vmax.xlane.f32.xlu1 %v4273_v59  ;;  %v6824_v59 = vld [vmem:[%s10481_s27 + $0x40] sm:$0xff]  ;;  %v4309_v32 = vsel %vm1291_vm1, %v9700_v44, -inf }
 0xb79   : > { %v9708_v0 = vadd.f32 %v6824_v59, %v9562_v9  ;;  %v9756_v43 = vadd.f32 %v6824_v59, %v9642_v60 }
 0xb7a   : > { %4253 = vmax.xlane.f32.xlu0 %v4252_v24  ;;  %v9720_v24 = vadd.f32 %v6825_v18, %v9580_v19 }
 0xb7b   : > { %v4264_v9 = vsel %vm1291_vm1, %v9708_v0, -inf }
 0xb7c   : > { %4268 = vmax.xlane.f32.xlu1 %v4267_v55  ;;  %v9724_v55 = vadd.f32 %v6821_v52, %v5997_v29  ;;  %v4282_v19 = vsel %vm1291_vm1, %v9720_v24, -inf  ;;  %v6827_v29 = vld [vmem:[%s10481_s27 + $0x68] sm:$0xff] }
 0xb7d   : > { %v9739_v52 = vadd.f32 %v6827_v29, %v4228_v14  ;;  %v9771_v60 = vadd.f32 %v6827_v29, %v9586_v25 }
 0xb7e   : > { %4271 = vmax.xlane.f32.xlu0 %v4270_v33  ;;  %v9732_v33 = vadd.f32 %v6826_v20, %v9582_v37 }
 0xb7f   : > { %v4327_v14 = vsel %vm1291_vm1, %v9739_v52, -inf }
 0xb80   : > { %4310 = vmax.xlane.f32.xlu1 %v4309_v32  ;;  %v4321_v32 = vsel %vm1291_vm1, %v9724_v55, -inf  ;;  %v4276_v37 = vsel %vm1291_vm1, %v9732_v33, -inf }
 0xb82   : > { %4265 = vmax.xlane.f32.xlu0 %v4264_v9  ;;  %v9744_v9 = vadd.f32 %v6820_v12, %v9612_v16 }
 0xb84   : > { %4316 = vmax.xlane.f32.xlu1 %v4315_v17  ;;  %v6828_v17 = vld [vmem:[%s10481_s27 + $0x78] sm:$0xff]  ;;  %v4306_v16 = vsel %vm1291_vm1, %v9744_v9, -inf }
 0xb85   : > { %v9761_v12 = vadd.f32 %v6828_v17, %v9584_v40  ;;  %v9775_v40 = vadd.f32 %v6826_v20, %v4225_v46 }
 0xb86   : > { %4283 = vmax.xlane.f32.xlu0 %v4282_v19  ;;  %v9751_v19 = vadd.f32 %v6828_v17, %v6001_v57  ;;  %v9766_v57 = vadd.f32 %v6823_v22, %v9638_v63  ;;  %v4279_v63 = vsel %vm1291_vm1, %v9771_v60, -inf  ;;  %v9782_v22 = vadd.f32 %v6825_v18, %v9667_v3 }
 0xb87   : > { %v4285_v59 = vsel %vm1291_vm1, %v9761_v12, -inf  ;;  %v4324_v25 = vsel %vm1291_vm1, %v9775_v40, -inf }
 0xb88   : > { %4322 = vmax.xlane.f32.xlu1 %v4321_v32  ;;  %v4333_v32 = vsel %vm1291_vm1, %v9751_v19, -inf  ;;  %v4318_v17 = vsel %vm1291_vm1, %v9766_v57, -inf  ;;  %v4330_v29 = vsel %vm1291_vm1, %v9782_v22, -inf }
 0xb8a   : > { %4277 = vmax.xlane.f32.xlu0 %v4276_v37  ;;  %v4312_v37 = vsel %vm1291_vm1, %v9756_v43, -inf }
 0xb8c   : > { %4328 = vmax.xlane.f32.xlu1 %v4327_v14 }
 0xb8e   : > { %4307 = vmax.xlane.f32.xlu0 %v4306_v16 }
 0xb90   : > { %4334 = vmax.xlane.f32.xlu1 %v4333_v32 }
 0xb92   : > { %4313 = vmax.xlane.f32.xlu0 %v4312_v37 }
 0xb94   : > { %4286 = vmax.xlane.f32.xlu1 %v4285_v59 }
 0xb96   : > { %4319 = vmax.xlane.f32.xlu0 %v4318_v17 }
 0xb98   : > { %4280 = vmax.xlane.f32.xlu1 %v4279_v63 }
 0xb9a   : > { %4325 = vmax.xlane.f32.xlu0 %v4324_v25 }
 0xb9e   : > { %4331 = vmax.xlane.f32.xlu0 %v4330_v29 }
 0xbeb   : > { %v9788_v46 = vpop.xlane.xlu0 %4289 }
 0xbed   : > { %v9790_v20 = vpop.xlane.xlu1 %4292 }
 0xbef   : > { %v9792_v14 = vpop.xlane.xlu0 %4295 }
 0xbf1   : > { %v9794_v16 = vpop.xlane.xlu1 %4298 }
 0xbf3   : > { %v9796_v32 = vpop.xlane.xlu0 %4301 }
 0xbf5   : > { %v9798_v3 = vpop.xlane.xlu1 %4304 }
 0xbf7   : > { %v4248_v18 = vpop.xlane.xlu0 %4247 }
 0xbf8   : > { %v4338_v37 = vsub.f32 %v9623_v13, %v4248_v18 }
 0xbf9   : > { %v4245_v59 = vpop.xlane.xlu1 %4244 }
 0xbfa   : > { %v4372_v17 = vmul.f32 1.442695, %v4338_v37  ;;  %v4337_v27 = vsub.f32 %v9632_v49, %v4245_v59 }
 0xbfb   : > { %v4242_v63 = vpop.xlane.xlu0 %4241 }
 0xbfc   : > { %6643 = vpow2.f32 %v4372_v17  ;;  %v4336_v25 = vsub.f32 %v9636_v4, %v4242_v63  ;;  %v4370_v31 = vmul.f32 1.442695, %v4337_v27 }
 0xbfd   : > { %v4263_v29 = vpop.xlane.xlu1 %4262 }
 0xbfe   : > { %v4368_v28 = vmul.f32 1.442695, %v4336_v25  ;;  %v4343_v34 = vsub.f32 %v9647_v5, %v4263_v29 }
 0xbff   : > { %v4251_v62 = vpop.xlane.xlu0 %4250 }
 0xc00   : > { %6645 = vpow2.f32 %v4368_v28  ;;  %v4339_v10 = vsub.f32 %v9652_v26, %v4251_v62  ;;  %v4382_v4 = vmul.f32 1.442695, %v4343_v34 }
 0xc01   : > { %v4257_v41 = vpop.xlane.xlu1 %4256 }
 0xc02   : > { %v4374_v21 = vmul.f32 1.442695, %v4339_v10  ;;  %v4341_v49 = vsub.f32 %v9657_v54, %v4257_v41 }
 0xc03   : > { %v4260_v13 = vpop.xlane.xlu0 %4259 }
 0xc04   : > { %6647 = vpow2.f32 %v4374_v21  ;;  %v4342_v18 = vsub.f32 %v9665_v6, %v4260_v13  ;;  %v4378_v21 = vmul.f32 1.442695, %v4341_v49 }
 0xc05   : > { %v4275_v37 = vpop.xlane.xlu1 %4274  ;;  %6649 = vpow2.f32 %v4370_v31 }
 0xc06   : > { %v9806_v17 = vpop.eup %6643  ;;  %v4380_v59 = vmul.f32 1.442695, %v4342_v18  ;;  %v4347_v5 = vsub.f32 %v9675_v39, %v4275_v37 }
 0xc07   : > { %v4254_v28 = vpop.xlane.xlu0 %4253  ;;  %v4438_v62 = vsel %vm1291_vm1, %v9806_v17, 0.0 }
 0xc08   : > { %6651 = vpow2.f32 %v4380_v59  ;;  %v4340_v27 = vsub.f32 %v9680_v7, %v4254_v28  ;;  %4439 = vadd.xlane.f32.xlu0 %v4438_v62  ;;  %v4390_v7 = vmul.f32 1.442695, %v4347_v5 }
 0xc09   : > { %6653 = vpow2.f32 %v4382_v4  ;;  %v4269_v31 = vpop.xlane.xlu1 %4268 }
 0xc0a   : > { %v9812_v10 = vpop.eup %6645  ;;  %v4376_v26 = vmul.f32 1.442695, %v4340_v27  ;;  %v4345_v63 = vsub.f32 %v9688_v45, %v4269_v31 }
 0xc0b   : > { %v4272_v34 = vpop.xlane.xlu0 %4271  ;;  %v4432_v54 = vsel %vm1291_vm1, %v9812_v10, 0.0 }
 0xc0c   : > { %6655 = vpow2.f32 %v4376_v26  ;;  %v4346_v41 = vsub.f32 %v9696_v50, %v4272_v34  ;;  %4433 = vadd.xlane.f32.xlu0 %v4432_v54  ;;  %v4352_v50 = vsub.f32 %v9591_v56, %v9788_v46  ;;  %v4386_v4 = vmul.f32 1.442695, %v4345_v63 }
 0xc0d   : > { %6657 = vpow2.f32 %v4378_v21  ;;  %v4353_v46 = vsub.f32 %v9601_v11, %v9790_v20  ;;  %v4354_v20 = vsub.f32 %v9596_v30, %v9792_v14 }
 0xc0e   : > { %v9818_v6 = vpop.eup %6647  ;;  %v4388_v25 = vmul.f32 1.442695, %v4346_v41  ;;  %v4400_v56 = vmul.f32 1.442695, %v4352_v50 }
 0xc0f   : > { %v4266_v29 = vpop.xlane.xlu0 %4265  ;;  %v4441_v39 = vsel %vm1291_vm1, %v9818_v6, 0.0  ;;  %v9823_v13 = vpop.eup %6649  ;;  %v4402_v11 = vmul.f32 1.442695, %v4353_v46 }
 0xc10   : > { %6659 = vpow2.f32 %v4388_v25  ;;  %v4344_v18 = vsub.f32 %v9708_v0, %v4266_v29  ;;  %4442 = vadd.xlane.f32.xlu1 %v4441_v39  ;;  %v4435_v59 = vsel %vm1291_vm1, %v9823_v13, 0.0  ;;  %v4404_v29 = vmul.f32 1.442695, %v4354_v20 }
 0xc11   : > { %6661 = vpow2.f32 %v4390_v7  ;;  %v4355_v39 = vsub.f32 %v9608_v23, %v9794_v16 }
 0xc12   : > { %v9826_v37 = vpop.eup %6651  ;;  %v4384_v49 = vmul.f32 1.442695, %v4344_v18 }
 0xc13   : > { %v4284_v45 = vpop.xlane.xlu0 %4283  ;;  %v4450_v28 = vsel %vm1291_vm1, %v9826_v37, 0.0  ;;  %v9834_v62 = vpop.eup %6653 }
 0xc14   : > { %6663 = vpow2.f32 %v4384_v49  ;;  %v4350_v0 = vsub.f32 %v9720_v24, %v4284_v45  ;;  %4436 = vadd.xlane.f32.xlu1 %v4435_v59  ;;  %4451 = vadd.xlane.f32.xlu0 %v4450_v28  ;;  %v4453_v26 = vsel %vm1291_vm1, %v9834_v62, 0.0  ;;  %v4356_v49 = vsub.f32 %v9619_v36, %v9796_v32  ;;  %v4311_v36 = vpop.xlane.xlu1 %4310 }
 0xc15   : > { %6665 = vpow2.f32 %v4386_v4  ;;  %v4406_v4 = vmul.f32 1.442695, %v4355_v39 }
 0xc16   : > { %v9837_v27 = vpop.eup %6655  ;;  %v4396_v21 = vmul.f32 1.442695, %v4350_v0  ;;  %v4408_v0 = vmul.f32 1.442695, %v4356_v49 }
 0xc17   : > { %v4278_v5 = vpop.xlane.xlu0 %4277  ;;  %v4444_v31 = vsel %vm1291_vm1, %v9837_v27, 0.0  ;;  %v9845_v34 = vpop.eup %6657 }
 0xc18   : > { %6667 = vpow2.f32 %v4396_v21  ;;  %v4348_v24 = vsub.f32 %v9732_v33, %v4278_v5  ;;  %4454 = vadd.xlane.f32.xlu1 %v4453_v26  ;;  %4445 = vadd.xlane.f32.xlu0 %v4444_v31  ;;  %v4447_v7 = vsel %vm1291_vm1, %v9845_v34, 0.0  ;;  %v4359_v26 = vsub.f32 %v9700_v44, %v4311_v36 }
 0xc19   : > { %6669 = vpow2.f32 %v4400_v56  ;;  %v4357_v56 = vsub.f32 %v9628_v35, %v9798_v3  ;;  %v4317_v3 = vpop.xlane.xlu1 %4316 }
 0xc1a   : > { %v9848_v54 = vpop.eup %6659  ;;  %v4392_v41 = vmul.f32 1.442695, %v4348_v24  ;;  %v4361_v44 = vsub.f32 %v9712_v53, %v4317_v3 }
 0xc1b   : > { %v4462_v63 = vsel %vm1291_vm1, %v9848_v54, 0.0  ;;  %v9856_v25 = vpop.eup %6661  ;;  %v9878_v59 = vpop.xlane.xlu0 %4307  ;;  %v4410_v5 = vmul.f32 1.442695, %v4357_v56 }
 0xc1c   : > { %6671 = vpow2.f32 %v4392_v41  ;;  %4448 = vadd.xlane.f32.xlu1 %v4447_v7  ;;  %4463 = vadd.xlane.f32.xlu0 %v4462_v63  ;;  %v4465_v30 = vsel %vm1291_vm1, %v9856_v25, 0.0 }
 0xc1d   : > { %6673 = vpow2.f32 %v4402_v11  ;;  %v4414_v11 = vmul.f32 1.442695, %v4359_v26 }
 0xc1e   : > { %v9858_v33 = vpop.eup %6663  ;;  %6675 = vpow2.f32 %v4404_v29  ;;  %v4323_v29 = vpop.xlane.xlu1 %4322 }
 0xc1f   : > { %v4456_v14 = vsel %vm1291_vm1, %v9858_v33, 0.0  ;;  %v9866_v18 = vpop.eup %6665  ;;  %6677 = vpow2.f32 %v4406_v4  ;;  %v4314_v31 = vpop.xlane.xlu0 %4313  ;;  %v4418_v4 = vmul.f32 1.442695, %v4361_v44 }
 0xc20   : > { %4466 = vadd.xlane.f32.xlu1 %v4465_v30  ;;  %4457 = vadd.xlane.f32.xlu0 %v4456_v14  ;;  %v4459_v23 = vsel %vm1291_vm1, %v9866_v18, 0.0  ;;  %6679 = vpow2.f32 %v4408_v0  ;;  %v4360_v20 = vsub.f32 %v9756_v43, %v4314_v31 }
 0xc21   : > { %6681 = vpow2.f32 %v4410_v5  ;;  %v6829_v5 = vld [vmem:[#allocation6] sm:$0xff]  }
 0xc22   : > { %v9868_v50 = vpop.eup %6667  ;;  %6683 = vpow2.f32 %v4414_v11  ;;  %v4416_v63 = vmul.f32 1.442695, %v4360_v20  ;;  %v4329_v53 = vpop.xlane.xlu1 %4328 }
 0xc23   : > { %v4474_v16 = vsel %vm1291_vm1, %v9868_v50, 0.0  ;;  %v9876_v45 = vpop.eup %6669  ;;  %v4320_v39 = vpop.xlane.xlu0 %4319 }
 0xc24   : > { %4460 = vadd.xlane.f32.xlu1 %v4459_v23  ;;  %4475 = vadd.xlane.f32.xlu0 %v4474_v16  ;;  %v4480_v32 = vsel %vm1291_vm1, %v9876_v45, 0.0  ;;  %6685 = vpow2.f32 %v4416_v63  ;;  %v4362_v43 = vsub.f32 %v9766_v57, %v4320_v39  ;;  %v4363_v16 = vsub.f32 %v9724_v55, %v4323_v29 }
 0xc25   : > { %6687 = vpow2.f32 %v4418_v4  ;;  %v4358_v29 = vsub.f32 %v9744_v9, %v9878_v59 }
 0xc26   : > { %v9880_v28 = vpop.eup %6671  ;;  %v4420_v0 = vmul.f32 1.442695, %v4362_v43  ;;  %v4335_v26 = vpop.xlane.xlu1 %4334 }
 0xc27   : > { %v4468_v46 = vsel %vm1291_vm1, %v9880_v28, 0.0  ;;  %v9888_v21 = vpop.eup %6673  ;;  %v4326_v56 = vpop.xlane.xlu0 %4325  ;;  %v4412_v43 = vmul.f32 1.442695, %v4358_v29  ;;  %v10554_v29 = vld [vmem:[#allocation35_spill] sm:$0xff] }
 0xc28   : > { %4481 = vadd.xlane.f32.xlu1 %v4480_v32  ;;  %4469 = vadd.xlane.f32.xlu0 %v4468_v46  ;;  %v4483_v24 = vsel %vm1291_vm1, %v9888_v21, 0.0  ;;  %v9893_v35 = vpop.eup %6675  ;;  %v4422_v46 = vmul.f32 1.442695, %v4363_v16  ;;  %6689 = vpow2.f32 %v4420_v0  ;;  %v4364_v57 = vsub.f32 %v9775_v40, %v4326_v56 }
 0xc29   : > { %v4486_v41 = vsel %vm1291_vm1, %v9893_v35, 0.0  ;;  %v9898_v7 = vpop.eup %6677 }
 0xc2a   : > { %v4489_v30 = vsel %vm1291_vm1, %v9898_v7, 0.0  ;;  %v9903_v14 = vpop.eup %6679  ;;  %6691 = vpow2.f32 %v4422_v46  ;;  %v4424_v3 = vmul.f32 1.442695, %v4364_v57  ;;  %v4287_v40 = vpop.xlane.xlu1 %4286 }
 0xc2b   : > { %v4492_v49 = vsel %vm1291_vm1, %v9903_v14, 0.0  ;;  %v9908_v23 = vpop.eup %6681  ;;  %v4332_v11 = vpop.xlane.xlu0 %4331 }
 0xc2c   : > { %4484 = vadd.xlane.f32.xlu1 %v4483_v24  ;;  %v4495_v36 = vsel %vm1291_vm1, %v9908_v23, 0.0  ;;  %v9913_v32 = vpop.eup %6683  ;;  %v4365_v24 = vsub.f32 %v9739_v52, %v4329_v53  ;;  %6693 = vpow2.f32 %v4424_v3  ;;  %v4366_v63 = vsub.f32 %v9782_v22, %v4332_v11 }
 0xc2d   : > { %v4501_v31 = vsel %vm1291_vm1, %v9913_v32, 0.0 }
 0xc2e   : > { %v9919_v55 = vpop.eup %6685  ;;  %v4426_v44 = vmul.f32 1.442695, %v4365_v24  ;;  %v4428_v4 = vmul.f32 1.442695, %v4366_v63  ;;  %v4281_v53 = vpop.xlane.xlu1 %4280  ;;  %v6830_v63 = vld [vmem:[#allocation6 + $0x8] sm:$0xff]  }
 0xc2f   : > { %v4504_v20 = vsel %vm1291_vm1, %v9919_v55, 0.0  ;;  %v4349_v59 = vsub.f32 %v9771_v60, %v4281_v53  ;;  %v10560_v53 = vpack.c.bf16 %v9471_v47, %v9466_v15  ;;  %v10568_v15 = vpack.c.bf16 %v9484_v2, %v9480_v48  ;;  %v10570_v47 = vld [vmem:[#allocation50_spill] sm:$0xff]  ;;  %v10577_v2 = vld [vmem:[#allocation44_spill] sm:$0xff] }
 0xc30   : > { %4487 = vadd.xlane.f32.xlu1 %v4486_v41  ;;  %v9924_v41 = vpop.eup %6687  ;;  %6695 = vpow2.f32 %v4426_v44  ;;  %v10576_v48 = vpack.c.bf16 %v9508_v38, %v9504_v51  ;;  %v10588_v38 = vld [vmem:[#allocation78_spill] sm:$0xff] }
 0xc31   : > { %v4507_v39 = vsel %vm1291_vm1, %v9924_v41, 0.0  ;;  %6697 = vpow2.f32 %v4428_v4  ;;  %v10557_v4 = vld [vmem:[#allocation32_spill] sm:$0xff] }
 0xc32   : > { %v9931_v52 = vpop.eup %6689  ;;  %6699 = vpow2.f32 %v4412_v43  ;;  %v10558_v43 = vld [vmem:[#allocation30_spill] sm:$0xff] }
 0xc33   : > { %v4510_v22 = vsel %vm1291_vm1, %v9931_v52, 0.0 }
 0xc34   : > { %4490 = vadd.xlane.f32.xlu1 %v4489_v30  ;;  %v4351_v30 = vsub.f32 %v9761_v12, %v4287_v40  ;;  %v9937_v16 = vpop.eup %6691 }
 0xc35   : > { %v4513_v12 = vsel %vm1291_vm1, %v9937_v16, 0.0 }
 0xc36   : > { %v4398_v9 = vmul.f32 1.442695, %v4351_v30  ;;  %v9942_v56 = vpop.eup %6693 }
 0xc38   : > { %4493 = vadd.xlane.f32.xlu1 %v4492_v49  ;;  %v4367_v49 = vsub.f32 %v9751_v19, %v4335_v26  ;;  %6701 = vpow2.f32 %v4398_v9  ;;  %v4394_v19 = vmul.f32 1.442695, %v4349_v59  ;;  %v10562_v9 = vld [vmem:[#allocation33_spill] sm:$0xff]  ;;  %v10563_v59 = vld [vmem:[#allocation34_spill] sm:$0xff] }
 0xc3a   : > { %v4430_v0 = vmul.f32 1.442695, %v4367_v49  ;;  %v9946_v46 = vpop.eup %6695  ;;  %v10559_v49 = vpack.c.bf16 %v10557_v4, %v10558_v43  ;;  %v10586_v4 = vld [vmem:[#allocation75_spill] sm:$0xff]  ;;  %v10589_v43 = vld [vmem:[#allocation76_spill] sm:$0xff] }
 0xc3b   : > { %v4519_v60 = vsel %vm1291_vm1, %v9946_v46, 0.0  ;;  %v9950_v57 = vpop.eup %6697 }
 0xc3c   : > { %4496 = vadd.xlane.f32.xlu1 %v4495_v36  ;;  %6703 = vpow2.f32 %v4430_v0  ;;  %v4516_v36 = vsel %vm1291_vm1, %v9942_v56, 0.0  ;;  %v4522_v26 = vsel %vm1291_vm1, %v9950_v57, 0.0  ;;  %v10564_v0 = vpack.c.bf16 %v10562_v9, %v10563_v59  ;;  %v10594_v59 = vld [vmem:[#allocation47_spill] sm:$0xff] }
 0xc3d   : > { %6705 = vpow2.f32 %v4394_v19  ;;  %v10566_v19 = vld [vmem:[#allocation36_spill] sm:$0xff] }
 0xc3e   : > { %4608 = vrot.lane.b32.xlu0 %v6829_v5, %s7041_s21  ;;  %v9952_v5 = vpop.eup %6699 }
 0xc3f   : > { %v4498_v24 = vsel %vm1291_vm1, %v9952_v5, 0.0 }
 0xc40   : > { %4502 = vadd.xlane.f32.xlu1 %v4501_v31 }
 0xc42   : > { %v9956_v31 = vpop.eup %6701 }
 0xc43   : > { %v4477_v11 = vsel %vm1291_vm1, %v9956_v31, 0.0 }
 0xc44   : > { %4505 = vadd.xlane.f32.xlu1 %v4504_v20 }
 0xc46   : > { %v9960_v3 = vpop.eup %6703 }
 0xc47   : > { %v9964_v20 = vpop.eup %6705  ;;  %v4525_v40 = vsel %vm1291_vm1, %v9960_v3, 0.0 }
 0xc48   : > { %4508 = vadd.xlane.f32.xlu1 %v4507_v39  ;;  %v4471_v44 = vsel %vm1291_vm1, %v9964_v20, 0.0  ;;  %v10555_v39 = vld [vmem:[#allocation31_spill] sm:$0xff] }
 0xc49   : > { %v10556_v30 = vpack.c.bf16 %v10554_v29, %v10555_v39  ;;  %v10583_v29 = vld [vmem:[#allocation61_spill] sm:$0xff] }
 0xc4c   : > { %4511 = vadd.xlane.f32.xlu1 %v4510_v22  ;;  %v10561_v22 = vpack.c.bf16 %v9475_v42, %v9469_v58  ;;  %v10569_v58 = vpack.c.bf16 %v9488_v1, %v9482_v8  ;;  %v10571_v42 = vld [vmem:[#allocation48_spill] sm:$0xff]  ;;  %v10578_v8 = vpack.c.bf16 %v9512_v61, %v10577_v2  ;;  %v10579_v1 = vld [vmem:[#allocation62_spill] sm:$0xff]  ;;  %v10590_v61 = vpack.c.bf16 %v10588_v38, %v10589_v43 }
 0xc50   : > { %4514 = vadd.xlane.f32.xlu1 %v4513_v12  ;;  %v10565_v12 = vld [vmem:[#allocation39_spill] sm:$0xff] }
 0xc54   : > { %4517 = vadd.xlane.f32.xlu1 %v4516_v36  ;;  %v10567_v36 = vpack.c.bf16 %v10565_v12, %v10566_v19 }
 0xc58   : > { %4520 = vadd.xlane.f32.xlu1 %v4519_v60  ;;  %v10572_v60 = vpack.c.bf16 %v10570_v47, %v10571_v42 }
 0xc5c   : > { %4523 = vadd.xlane.f32.xlu1 %v4522_v26  ;;  %v10573_v26 = vld [vmem:[#allocation51_spill] sm:$0xff] }
 0xc5d   : > { %4499 = vadd.xlane.f32.xlu0 %v4498_v24  ;;  %v10574_v24 = vld [vmem:[#allocation49_spill] sm:$0xff] }
 0xc60   : > { %4478 = vadd.xlane.f32.xlu1 %v4477_v11  ;;  %v10575_v11 = vpack.c.bf16 %v10573_v26, %v10574_v24 }
 0xc61   : > { %4526 = vadd.xlane.f32.xlu0 %v4525_v40  ;;  %v10580_v40 = vld [vmem:[#allocation60_spill] sm:$0xff] }
 0xc64   : > { %4472 = vadd.xlane.f32.xlu1 %v4471_v44  ;;  %v10581_v44 = vpack.c.bf16 %v10579_v1, %v10580_v40 }
 0xc75   : > { %4732 = vrot.lane.b32.xlu1 %v6830_v63, %s7041_s21  ;;  %v10582_v63 = vld [vmem:[#allocation63_spill] sm:$0xff] }
 0xc76   : > { %v10584_v39 = vpack.c.bf16 %v10582_v63, %v10583_v29 }
 0xc77   : > { %2894 = vrot.lane.b32.xlu0 %v10556_v30, %s7041_s21  ;;  %v10585_v30 = vld [vmem:[#allocation77_spill] sm:$0xff] }
 0xc78   : > { %v10587_v51 = vpack.c.bf16 %v10585_v30, %v10586_v4 }
 0xc79   : > { %2896 = vrot.lane.b32.xlu1 %v10559_v49, %s7041_s21 }
 0xc7b   : > { %3893 = vrot.lane.b32.xlu0 %v10560_v53, %s7040_s10  ;;  %v10591_v53 = vld [vmem:[#allocation46_spill] sm:$0xff] }
 0xc7d   : > { %3891 = vrot.lane.b32.xlu1 %v10561_v22, %s7040_s10  ;;  %v10592_v22 = vld [vmem:[#allocation41_spill] sm:$0xff] }
 0xc7e   : > { %v10593_v9 = vpack.c.bf16 %v10591_v53, %v10592_v22 }
 0xc7f   : > { %2900 = vrot.lane.b32.xlu0 %v10564_v0, %s7041_s21  ;;  %v10595_v0 = vld [vmem:[#allocation43_spill] sm:$0xff] }
 0xc80   : > { %v10596_v12 = vpack.c.bf16 %v10594_v59, %v10595_v0 }
 0xc81   : > { %2898 = vrot.lane.b32.xlu1 %v10567_v36, %s7041_s21 }
 0xc83   : > { %3897 = vrot.lane.b32.xlu0 %v10568_v15, %s7040_s10 }
 0xc85   : > { %3895 = vrot.lane.b32.xlu1 %v10569_v58, %s7040_s10 }
 0xc87   : > { %2904 = vrot.lane.b32.xlu0 %v10572_v60, %s7041_s21 }
 0xc89   : > { %2902 = vrot.lane.b32.xlu1 %v10575_v11, %s7041_s21 }
 0xc8b   : > { %3901 = vrot.lane.b32.xlu0 %v10576_v48, %s7040_s10 }
 0xc8d   : > { %3899 = vrot.lane.b32.xlu1 %v10578_v8, %s7040_s10 }
 0xc8f   : > { %2908 = vrot.lane.b32.xlu0 %v10581_v44, %s7041_s21 }
 0xc91   : > { %2906 = vrot.lane.b32.xlu1 %v10584_v39, %s7041_s21 }
 0xc93   : > { %3905 = vrot.lane.b32.xlu0 %v10587_v51, %s7040_s10 }
 0xc95   : > { %3903 = vrot.lane.b32.xlu1 %v10590_v61, %s7040_s10  ;;  %v4440_v49 = vpop.xlane.xlu0 %4439 }
 0xc97   : > { %2912 = vrot.lane.b32.xlu0 %v10593_v9, %s7041_s21 }
 0xc99   : > { %2910 = vrot.lane.b32.xlu1 %v10596_v12, %s7041_s21  ;;  %v4434_v19 = vpop.xlane.xlu0 %4433 }
 0xc9a   : > { %6707 = vrcp.f32 %v4434_v19 }
 0xc9d   : > { %v4443_v36 = vpop.xlane.xlu1 %4442 }
 0xca1   : > { %v4437_v15 = vpop.xlane.xlu1 %4436  ;;  %v4452_v58 = vpop.xlane.xlu0 %4451 }
 0xca2   : > { %6709 = vrcp.f32 %v4437_v15 }
 0xca3   : > { %6711 = vrcp.f32 %v4443_v36 }
 0xca4   : > { %v6708_v24 = vpop.eup %6707 }
 0xca5   : > { %v4455_v47 = vpop.xlane.xlu1 %4454  ;;  %v4446_v42 = vpop.xlane.xlu0 %4445  ;;  %v4560_v8 = vmul.f32 %v6708_v24, %v9812_v10 }
 0xca9   : > { %v4449_v60 = vpop.xlane.xlu1 %4448  ;;  %v4464_v26 = vpop.xlane.xlu0 %4463 }
 0xcaa   : > { %6713 = vrcp.f32 %v4449_v60 }
 0xcab   : > { %6715 = vrcp.f32 %v4440_v49 }
 0xcac   : > { %v6710_v11 = vpop.eup %6709  ;;  %6717 = vrcp.f32 %v4446_v42 }
 0xcad   : > { %v4467_v48 = vpop.xlane.xlu1 %4466  ;;  %v4458_v2 = vpop.xlane.xlu0 %4457  ;;  %v4561_v1 = vmul.f32 %v6710_v11, %v9823_v13  ;;  %6719 = vrcp.f32 %v4455_v47 }
 0xcae   : > { %v6712_v29 = vpop.eup %6711 }
 0xcaf   : > { %v4592_v40 = vpack.c.bf16 %v4561_v1, %v4560_v8  ;;  %v4563_v10 = vmul.f32 %v6712_v29, %v9818_v6 }
 0xcb1   : > { %v4461_v44 = vpop.xlane.xlu1 %4460  ;;  %6004 = vmatprep.mubr.msk.bf16.mxu1 %vm1291_vm1, %v4592_v40  ;;  %v10046_v63 = vpop.xlane.xlu0 %4475 }
 0xcb2   : > { %6721 = vrcp.f32 %v4461_v44 }
 0xcb3   : > { %6723 = vrcp.f32 %v4452_v58 }
 0xcb4   : > { %v6714_v4 = vpop.eup %6713  ;;  %6725 = vrcp.f32 %v4458_v2 }
 0xcb5   : > { %v4482_v39 = vpop.xlane.xlu1 %4481  ;;  %v4470_v30 = vpop.xlane.xlu0 %4469  ;;  %v4565_v61 = vmul.f32 %v6714_v4, %v9845_v34 }
 0xcb6   : > { %v6716_v51 = vpop.eup %6715  ;;  %6727 = vrcp.f32 %v4482_v39 }
 0xcb7   : > { %v6718_v38 = vpop.eup %6717  ;;  %v4562_v49 = vmul.f32 %v6716_v51, %v9806_v17 }
 0xcb8   : > { %v4564_v53 = vmul.f32 %v6718_v38, %v9837_v27  ;;  %v6720_v9 = vpop.eup %6719 }
 0xcb9   : > { %v4485_v13 = vpop.xlane.xlu1 %4484  ;;  %v4609_v43 = vpop.permute.xlu0 %4608  ;;  %v4593_v22 = vpack.c.bf16 %v4563_v10, %v4562_v49  ;;  %v4567_v17 = vmul.f32 %v6720_v9, %v9834_v62 }
 0xcba   : > { %6729 = vrcp.f32 %v4485_v13  ;;  %6002 = vmatprep.subr.bf16.mxu1 %v4609_v43  ;;  %v4594_v0 = vpack.c.bf16 %v4565_v61, %v4564_v53 }
 0xcbb   : > { %6731 = vrcp.f32 %v4467_v48  ;;  %6003 = vmatpush3.bf16.msra.mxu1 %v4609_v43 }
 0xcbc   : > { %6733 = vrcp.f32 %v4464_v26  ;;  %v6722_v12 = vpop.eup %6721 }
 0xcbd   : > { %v4488_v59 = vpop.xlane.xlu1 %4487  ;;  %v6724_v6 = vpop.eup %6723  ;;  %v4569_v36 = vmul.f32 %v6722_v12, %v9866_v18 }
 0xcbe   : > { %6005 = vmatmul.mubr.msk.bf16.vlgmr.msra.gmra.mrb[132].mxu1 %vm1291_vm1, %v4593_v22  ;;  %v6726_v34 = vpop.eup %6725  ;;  %v4566_v27 = vmul.f32 %v6724_v6, %v9826_v37 }
 0xcbf   : > { %6008 = vmatprep.mubr.msk.bf16.mxu1 %vm1291_vm1, %v4594_v0  ;;  %v4568_v58 = vmul.f32 %v6726_v34, %v9858_v33 }
 0xcc0   : > { %v6728_v15 = vpop.eup %6727  ;;  %v4595_v42 = vpack.c.bf16 %v4567_v17, %v4566_v27 }
 0xcc1   : > { %v4491_v19 = vpop.xlane.xlu1 %4490  ;;  %v4596_v24 = vpack.c.bf16 %v4569_v36, %v4568_v58  ;;  %v4576_v11 = vmul.f32 %v6728_v15, %v9876_v45 }
 0xcc2   : > { %6735 = vrcp.f32 %v4491_v19 }
 0xcc4   : > { %v6730_v47 = vpop.eup %6729 }
 0xcc5   : > { %v6732_v60 = vpop.eup %6731  ;;  %v4494_v26 = vpop.xlane.xlu1 %4493  ;;  %v4577_v48 = vmul.f32 %v6730_v47, %v9888_v21 }
 0xcc6   : > { %6009 = vmatmul.mubr.msk.bf16.gmra.mrb[136].mxu1 %vm1291_vm1, %v4595_v42  ;;  %v6734_v62 = vpop.eup %6733  ;;  %v4571_v2 = vmul.f32 %v6732_v60, %v9856_v25 }
 0xcc7   : > { %6012 = vmatprep.mubr.msk.bf16.mxu1 %vm1291_vm1, %v4596_v24  ;;  %v4600_v18 = vpack.c.bf16 %v4577_v48, %v4576_v11  ;;  %v4570_v33 = vmul.f32 %v6734_v62, %v9848_v54 }
 0xcc9   : > { %6022 = vmatprep.mubr.msk.bf16.mxu0 %vm1291_vm1, %v4600_v18  ;;  %v4497_v37 = vpop.xlane.xlu1 %4496  ;;  %v4597_v8 = vpack.c.bf16 %v4571_v2, %v4570_v33 }
 0xcca   : > { %6737 = vrcp.f32 %v4497_v37 }
 0xccb   : > { %6739 = vrcp.f32 %v4488_v59 }
 0xccc   : > { %6741 = vrcp.f32 %v4494_v26  ;;  %v6736_v38 = vpop.eup %6735 }
 0xccd   : > { %v4503_v1 = vpop.xlane.xlu1 %4502  ;;  %6743 = vrcp.f32 %v10046_v63  ;;  %v4579_v63 = vmul.f32 %v6736_v38, %v9898_v7 }
 0xcce   : > { %6013 = vmatmul.mubr.msk.bf16.gmra.mrb[140].mxu1 %vm1291_vm1, %v4597_v8  ;;  %6745 = vrcp.f32 %v4470_v30 }
 0xccf   : > { %6747 = vrcp.f32 %v4503_v1 }
 0xcd1   : > { %v4506_v45 = vpop.xlane.xlu1 %4505 }
 0xcd4   : > { %v6738_v13 = vpop.eup %6737 }
 0xcd5   : > { %v4509_v40 = vpop.xlane.xlu1 %4508  ;;  %v6740_v61 = vpop.eup %6739  ;;  %v4581_v22 = vmul.f32 %v6738_v13, %v9908_v23  ;;  %v6251_v13 = vld [vmem:[#allocation8] sm:$0xff]  }
 0xcd6   : > { %v6742_v49 = vpop.eup %6741  ;;  %v4578_v59 = vmul.f32 %v6740_v61, %v9893_v35  ;;  %6038 = vmatprep.subr.bf16.mxu1 %v6251_v13  ;;  %v6254_v61 = vld [vmem:[#allocation8 + $0x18] sm:$0xff]  }
 0xcd7   : > { %v6744_v30 = vpop.eup %6743  ;;  %v4580_v6 = vmul.f32 %v6742_v49, %v9903_v14  ;;  %6039 = vmatpush3.bf16.msra.mxu1 %v6251_v13  ;;  %v6255_v49 = vld [vmem:[#allocation8 + $0x20] sm:$0xff]  }
 0xcd8   : > { %v6746_v9 = vpop.eup %6745  ;;  %v4601_v17 = vpack.c.bf16 %v4579_v63, %v4578_v59  ;;  %v4574_v11 = vmul.f32 %v6744_v30, %v9868_v50  ;;  %v6256_v63 = vld [vmem:[#allocation8 + $0x28] sm:$0xff]   ;;  %v6257_v30 = vld [vmem:[#allocation8 + $0x30] sm:$0xff]  }
 0xcd9   : > { %v4512_v21 = vpop.xlane.xlu1 %4511  ;;  %v6748_v12 = vpop.eup %6747  ;;  %v4602_v36 = vpack.c.bf16 %v4581_v22, %v4580_v6  ;;  %v4572_v42 = vmul.f32 %v6746_v9, %v9880_v28 }
 0xcda   : > { %v4583_v48 = vmul.f32 %v6748_v12, %v9913_v32 }
 0xcdd   : > { %v4515_v44 = vpop.xlane.xlu1 %4514 }
 0xce1   : > { %v4518_v29 = vpop.xlane.xlu1 %4517 }
 0xce5   : > { %v4521_v39 = vpop.xlane.xlu1 %4520 }
 0xce9   : > { %v10066_v4 = vpop.xlane.xlu1 %4523 }
 0xcea   : > { %v4500_v25 = vpop.xlane.xlu0 %4499 }
 0xceb   : > { %6749 = vrcp.f32 %v4500_v25 }
 0xced   : > { %v4479_v54 = vpop.xlane.xlu1 %4478 }
 0xcee   : > { %v4527_v51 = vpop.xlane.xlu0 %4526  ;;  %6751 = vrcp.f32 %v4479_v54 }
 0xcef   : > { %6753 = vrcp.f32 %v4509_v40 }
 0xcf0   : > { %6755 = vrcp.f32 %v4506_v45 }
 0xcf1   : > { %v4473_v10 = vpop.xlane.xlu1 %4472 }
 0xcf2   : > { %6757 = vrcp.f32 %v4473_v10  ;;  %v2895_v43 = vpop.permute.xlu0 %2894 }
 0xcf3   : > { %2943 = vst.msk [vmem:[#allocation2] sm:$0xff] %vm2942_vm2, %v2895_v43  ;;  %6759 = vrcp.f32 %v4515_v44  ;;  %v6253_v43 = vld [vmem:[#allocation8 + $0x10] sm:$0xff]  }
 0xcf4   : > { %6761 = vrcp.f32 %v4521_v39 }
 0xcf5   : > { %v4733_v53 = vpop.permute.xlu1 %4732  ;;  %v6750_v34 = vpop.eup %6749  ;;  %6763 = vrcp.f32 %v4512_v21 }
 0xcf6   : > { %6020 = vmatprep.subr.bf16.mxu0 %v4733_v53  ;;  %v3894_v0 = vpop.permute.xlu0 %3893  ;;  %6765 = vrcp.f32 %v4518_v29  ;;  %v4582_v58 = vmul.f32 %v6750_v34, %v9952_v5 }
 0xcf7   : > { %6021 = vmatpush3.bf16.msra.mxu0 %v4733_v53  ;;  %6767 = vrcp.f32 %v4527_v51  ;;  %v6258_v53 = vld [vmem:[#allocation8 + $0x38] sm:$0xff]  }
 0xcf8   : > { %v6752_v19 = vpop.eup %6751  ;;  %v4603_v18 = vpack.c.bf16 %v4583_v48, %v4582_v58  ;;  %6769 = vrcp.f32 %v10066_v4 }
 0xcf9   : > { %v2897_v7 = vpop.permute.xlu1 %2896  ;;  %v6754_v15 = vpop.eup %6753  ;;  %v4575_v27 = vmul.f32 %v6752_v19, %v9956_v31  ;;  %v10598_v19 = vld [vmem:[#allocation37_spill] sm:$0xff] }
 0xcfa   : > { %2944 = vst.msk [vmem:[#allocation2 + $0x8] sm:$0xff] %vm2942_vm2, %v2897_v7  ;;  %6023 = vmatmul.mubr.msk.bf16.vlgmr.msra.gmra.mrb[156].mxu0 %vm1291_vm1, %v4601_v17  ;;  %v2901_v35 = vpop.permute.xlu0 %2900  ;;  %v6756_v23 = vpop.eup %6755  ;;  %v4585_v26 = vmul.f32 %v6754_v15, %v9924_v41  ;;  %v10597_v17 = vld [vmem:[#allocation40_spill] sm:$0xff]  ;;  %v10600_v15 = vld [vmem:[#allocation42_spill] sm:$0xff] }
 0xcfb   : > { %2946 = vst.msk [vmem:[#allocation2 + $0x18] sm:$0xff] %vm2942_vm2, %v2901_v35  ;;  %6026 = vmatprep.mubr.msk.bf16.mxu0 %vm1291_vm1, %v4602_v36  ;;  %v4584_v5 = vmul.f32 %v6756_v23, %v9919_v55  ;;  %v4599_v62 = vpack.c.bf16 %v4575_v27, %v4574_v11  ;;  %v10599_v7 = vpack.c.bf16 %v10597_v17, %v10598_v19  ;;  %v10601_v35 = vld [vmem:[#allocation38_spill] sm:$0xff]  ;;  %v10621_v19 = vld [vmem:[#allocation73_spill] sm:$0xff] }
 0xcfc   : > { %3941 = vst.msk [vmem:[#allocation2 + $0x8] sm:$0xff] %vm3939_vm3, %v3894_v0  ;;  %v6758_v14 = vpop.eup %6757  ;;  %v10602_v23 = vpack.c.bf16 %v10600_v15, %v10601_v35  ;;  %v10624_v15 = vld [vmem:[#allocation74_spill] sm:$0xff]  ;;  %v10625_v35 = vld [vmem:[#allocation72_spill] sm:$0xff] }
 0xcfd   : > { %v3892_v47 = vpop.permute.xlu1 %3891  ;;  %v4573_v60 = vmul.f32 %v6758_v14, %v9964_v20  ;;  %v6760_v28 = vpop.eup %6759  ;;  %v4604_v41 = vpack.c.bf16 %v4585_v26, %v4584_v5 }
 0xcfe   : > { %3940 = vst.msk [vmem:[#allocation2] sm:$0xff] %vm3939_vm3, %v3892_v47  ;;  %v3898_v24 = vpop.permute.xlu0 %3897  ;;  %v6762_v2 = vpop.eup %6761  ;;  %v4587_v37 = vmul.f32 %v6760_v28, %v9937_v16 }
 0xcff   : > { %3943 = vst.msk [vmem:[#allocation2 + $0x18] sm:$0xff] %vm3939_vm3, %v3898_v24  ;;  %v4598_v31 = vpack.c.bf16 %v4573_v60, %v4572_v42  ;;  %v6764_v32 = vpop.eup %6763  ;;  %v4589_v8 = vmul.f32 %v6762_v2, %v9946_v46 }
 0xd00   : > { %v6766_v55 = vpop.eup %6765  ;;  %v4586_v45 = vmul.f32 %v6764_v32, %v9931_v52 }
 0xd01   : > { %v2899_v20 = vpop.permute.xlu1 %2898  ;;  %6016 = vmatprep.mubr.msk.bf16.mxu1 %vm1291_vm1, %v4598_v31  ;;  %v4588_v40 = vmul.f32 %v6766_v55, %v9942_v56  ;;  %v6768_v44 = vpop.eup %6767 }
 0xd02   : > { %2945 = vst.msk [vmem:[#allocation2 + $0x10] sm:$0xff] %vm2942_vm2, %v2899_v20  ;;  %6017 = vmatmul.mubr.msk.bf16.gmra.mrb[144].mxu1 %vm1291_vm1, %v4599_v62  ;;  %6027 = vmatmul.mubr.msk.bf16.gmra.mrb[160].mxu0 %vm1291_vm1, %v4603_v18  ;;  %v2905_v50 = vpop.permute.xlu0 %2904  ;;  %v4605_v21 = vpack.c.bf16 %v4587_v37, %v4586_v45  ;;  %v6770_v4 = vpop.eup %6769  ;;  %v4591_v52 = vmul.f32 %v6768_v44, %v9960_v3  ;;  %v10603_v44 = vld [vmem:[#allocation54_spill] sm:$0xff] }
 0xd03   : > { %2948 = vst.msk [vmem:[#allocation2 + $0x28] sm:$0xff] %vm2942_vm2, %v2905_v50  ;;  %6030 = vmatprep.mubr.msk.bf16.mxu0 %vm1291_vm1, %v4604_v41  ;;  %v4606_v39 = vpack.c.bf16 %v4589_v8, %v4588_v40  ;;  %v4590_v25 = vmul.f32 %v6770_v4, %v9950_v57  ;;  %v6252_v57 = vld [vmem:[#allocation8 + $0x8] sm:$0xff]   ;;  %v10607_v4 = vld [vmem:[#allocation53_spill] sm:$0xff] }
 0xd04   : > { %6040 = vmatprep.subr.bf16.mxu1 %v6252_v57 }
 0xd05   : > { %v3896_v33 = vpop.permute.xlu1 %3895  ;;  %v4607_v54 = vpack.c.bf16 %v4591_v52, %v4590_v25  ;;  %6041 = vmatpush3.bf16.msra.mxu1 %v6252_v57  ;;  %v10612_v57 = vld [vmem:[#allocation70_spill] sm:$0xff] }
 0xd06   : > { %3942 = vst.msk [vmem:[#allocation2 + $0x10] sm:$0xff] %vm3939_vm3, %v3896_v33  ;;  %v3902_v1 = vpop.permute.xlu0 %3901  ;;  %6042 = vmatprep.subr.bf16.mxu1 %v6253_v43 }
 0xd07   : > { %3945 = vst.msk [vmem:[#allocation2 + $0x28] sm:$0xff] %vm3939_vm3, %v3902_v1 }
 0xd09   : > { %v2903_v29 = vpop.permute.xlu1 %2902  ;;  %6043 = vmatpush3.bf16.msra.mxu1 %v6253_v43  ;;  %v10613_v43 = vld [vmem:[#allocation68_spill] sm:$0xff] }
 0xd0a   : > { %2947 = vst.msk [vmem:[#allocation2 + $0x20] sm:$0xff] %vm2942_vm2, %v2903_v29  ;;  %6031 = vmatmul.mubr.msk.bf16.gmra.mrb[164].mxu0 %vm1291_vm1, %v4605_v21  ;;  %v2909_v16 = vpop.permute.xlu0 %2908  ;;  %6044 = vmatprep.subr.bf16.mxu1 %v6254_v61  ;;  %v10604_v29 = vld [vmem:[#allocation52_spill] sm:$0xff] }
 0xd0b   : > { %2950 = vst.msk [vmem:[#allocation2 + $0x38] sm:$0xff] %vm2942_vm2, %v2909_v16  ;;  %6034 = vmatprep.mubr.msk.bf16.mxu0 %vm1291_vm1, %v4606_v39  ;;  %v10605_v39 = vpack.c.bf16 %v10603_v44, %v10604_v29  ;;  %v10606_v16 = vld [vmem:[#allocation55_spill] sm:$0xff] }
 0xd0c   : > { %v10608_v52 = vpack.c.bf16 %v10606_v16, %v10607_v4 }
 0xd0d   : > { %v3900_v46 = vpop.permute.xlu1 %3899  ;;  %6045 = vmatpush3.bf16.msra.mxu1 %v6254_v61  ;;  %v10614_v61 = vpack.c.bf16 %v10612_v57, %v10613_v43 }
 0xd0e   : > { %3944 = vst.msk [vmem:[#allocation2 + $0x20] sm:$0xff] %vm3939_vm3, %v3900_v46  ;;  %v3906_v56 = vpop.permute.xlu0 %3905  ;;  %6046 = vmatprep.subr.bf16.mxu1 %v6255_v49 }
 0xd0f   : > { %3947 = vst.msk [vmem:[#allocation2 + $0x38] sm:$0xff] %vm3939_vm3, %v3906_v56 }
 0xd11   : > { %v2907_v51 = vpop.permute.xlu1 %2906  ;;  %6047 = vmatpush3.bf16.msra.mxu1 %v6255_v49 }
 0xd12   : > { %2949 = vst.msk [vmem:[#allocation2 + $0x30] sm:$0xff] %vm2942_vm2, %v2907_v51  ;;  %6035 = vmatmul.mubr.msk.bf16.gmra.mrb[168].mxu0 %vm1291_vm1, %v4607_v54  ;;  %v2913_v38 = vpop.permute.xlu0 %2912  ;;  %6048 = vmatprep.subr.bf16.mxu1 %v6256_v63 }
 0xd13   : > { %2952 = vst.msk [vmem:[#allocation2 + $0x48] sm:$0xff] %vm2942_vm2, %v2913_v38 }
 0xd15   : > { %v3904_v10 = vpop.permute.xlu1 %3903  ;;  %6049 = vmatpush3.bf16.msra.mxu1 %v6256_v63 }
 0xd16   : > { %3946 = vst.msk [vmem:[#allocation2 + $0x30] sm:$0xff] %vm3939_vm3, %v3904_v10  ;;  %6050 = vmatprep.subr.bf16.mxu1 %v6257_v30  ;;  %v10609_v10 = vld [vmem:[#allocation69_spill] sm:$0xff] }
 0xd19   : > { %v2911_v3 = vpop.permute.xlu1 %2910  ;;  %6051 = vmatpush3.bf16.msra.mxu1 %v6257_v30 }
 0xd1a   : > { %2951 = vst.msk [vmem:[#allocation2 + $0x40] sm:$0xff] %vm2942_vm2, %v2911_v3  ;;  %6052 = vmatprep.subr.bf16.mxu1 %v6258_v53  ;;  %v10610_v3 = vld [vmem:[#allocation45_spill] sm:$0xff] }
 0xd1b   : > { %v10611_v13 = vpack.c.bf16 %v10609_v10, %v10610_v3 }
 0xd1d   : > { %6053 = vmatpush3.bf16.msra.mxu1 %v6258_v53 }
 0xd91   : > { %v6006_v22 = vpop.f32.mrb[132].mxu1 }
 0xd92   : > { %v4669_v9 = vpop.f32.mrb[133].mxu1 }
 0xd93   : > { %v6007_v59 = vpop.f32.mrb[134].mxu1 }
 0xd94   : > { %v4857_v0 = vpack.c.bf16 %v6007_v59, %v6006_v22  ;;  %v4672_v12 = vpop.f32.mrb[135].mxu1  ;;  %v10615_v59 = vld [vmem:[#allocation58_spill] sm:$0xff] }
 0xd95   : > { %v4856_v6 = vpack.c.bf16 %v4672_v12, %v4669_v9 }
 0xd96   : > { %4890 = vrot.lane.b32.xlu0 %v4857_v0, %s7039_s22  ;;  %v10616_v0 = vld [vmem:[#allocation56_spill] sm:$0xff] }
 0xd97   : > { %4888 = vrot.lane.b32.xlu1 %v4856_v6, %s7039_s22  ;;  %v10617_v12 = vpack.c.bf16 %v10615_v59, %v10616_v0  ;;  %v10618_v6 = vld [vmem:[#allocation59_spill] sm:$0xff] }
 0xd99   : > { %v6010_v34 = vpop.f32.mrb[136].mxu1 }
 0xd9a   : > { %3909 = vrot.lane.b32.xlu0 %v10599_v7, %s7040_s10  ;;  %v4685_v36 = vpop.f32.mrb[137].mxu1  ;;  %v10622_v7 = vld [vmem:[#allocation71_spill] sm:$0xff] }
 0xd9b   : > { %3907 = vrot.lane.b32.xlu1 %v10602_v23, %s7040_s10  ;;  %v6011_v14 = vpop.f32.mrb[138].mxu1  ;;  %v10626_v23 = vpack.c.bf16 %v10624_v15, %v10625_v35 }
 0xd9c   : > { %v4859_v27 = vpack.c.bf16 %v6011_v14, %v6010_v34  ;;  %v4688_v58 = vpop.f32.mrb[139].mxu1  ;;  %v10619_v34 = vld [vmem:[#allocation57_spill] sm:$0xff]  ;;  %v10627_v14 = vld [vmem:[#allocation66_spill] sm:$0xff] }
 0xd9d   : > { %v4858_v47 = vpack.c.bf16 %v4688_v58, %v4685_v36  ;;  %v10620_v17 = vpack.c.bf16 %v10618_v6, %v10619_v34  ;;  %v10623_v36 = vpack.c.bf16 %v10621_v19, %v10622_v7 }
 0xd9e   : > { %4894 = vrot.lane.b32.xlu0 %v4859_v27, %s7039_s22  ;;  %v10628_v27 = vld [vmem:[#allocation64_spill] sm:$0xff] }
 0xd9f   : > { %4892 = vrot.lane.b32.xlu1 %v4858_v47, %s7039_s22  ;;  %v10629_v58 = vpack.c.bf16 %v10627_v14, %v10628_v27  ;;  %v10630_v47 = vld [vmem:[#allocation67_spill] sm:$0xff] }
 0xda1   : > { %v6014_v42 = vpop.f32.mrb[140].mxu1 }
 0xda2   : > { %v4701_v60 = vpop.f32.mrb[141].mxu1 }
 0xda3   : > { %v6015_v26 = vpop.f32.mrb[142].mxu1 }
 0xda4   : > { %v4861_v24 = vpack.c.bf16 %v6015_v26, %v6014_v42  ;;  %v4704_v11 = vpop.f32.mrb[143].mxu1  ;;  %v10631_v42 = vld [vmem:[#allocation65_spill] sm:$0xff] }
 0xda5   : > { %v4860_v48 = vpack.c.bf16 %v4704_v11, %v4701_v60  ;;  %v10632_v60 = vpack.c.bf16 %v10630_v47, %v10631_v42  ;;  %v10633_v26 = vld [vmem:[#allocation81_spill] sm:$0xff] }
 0xdcd   : > { %v6024_v31 = vpop.f32.mrb[156].mxu0 }
 0xdce   : > { %v4793_v5 = vpop.f32.mrb[157].mxu0 }
 0xdcf   : > { %v6025_v62 = vpop.f32.mrb[158].mxu0 }
 0xdd0   : > { %v4865_v18 = vpack.c.bf16 %v6025_v62, %v6024_v31  ;;  %v4796_v28 = vpop.f32.mrb[159].mxu0  ;;  %v10637_v31 = vld [vmem:[#allocation80_spill] sm:$0xff] }
 0xdd1   : > { %v4864_v20 = vpack.c.bf16 %v4796_v28, %v4793_v5 }
 0xdd2   : > { %4906 = vrot.lane.b32.xlu0 %v4865_v18, %s7039_s22 }
 0xdd3   : > { %4904 = vrot.lane.b32.xlu1 %v4864_v20, %s7039_s22 }
 0xdd5   : > { %v6018_v41 = vpop.f32.mrb[144].mxu1  ;;  %v6028_v2 = vpop.f32.mrb[160].mxu0 }
 0xdd6   : > { %4898 = vrot.lane.b32.xlu0 %v4861_v24, %s7039_s22  ;;  %v4717_v50 = vpop.f32.mrb[145].mxu1  ;;  %v4809_v32 = vpop.f32.mrb[161].mxu0  ;;  %v10634_v24 = vld [vmem:[#allocation79_spill] sm:$0xff] }
 0xdd7   : > { %4896 = vrot.lane.b32.xlu1 %v4860_v48, %s7039_s22  ;;  %v6019_v55 = vpop.f32.mrb[146].mxu1  ;;  %v6029_v37 = vpop.f32.mrb[162].mxu0  ;;  %v10635_v11 = vpack.c.bf16 %v10633_v26, %v10634_v24  ;;  %v10636_v48 = vld [vmem:[#allocation82_spill] sm:$0xff] }
 0xdd8   : > { %v4863_v33 = vpack.c.bf16 %v6019_v55, %v6018_v41  ;;  %v4867_v8 = vpack.c.bf16 %v6029_v37, %v6028_v2  ;;  %v4720_v1 = vpop.f32.mrb[147].mxu1  ;;  %v4812_v45 = vpop.f32.mrb[163].mxu0  ;;  %v10638_v5 = vpack.c.bf16 %v10636_v48, %v10637_v31 }
 0xdd9   : > { %v4862_v40 = vpack.c.bf16 %v4720_v1, %v4717_v50  ;;  %v4866_v21 = vpack.c.bf16 %v4812_v45, %v4809_v32 }
 0xdda   : > { %2916 = vrot.lane.b32.xlu0 %v10605_v39, %s7041_s21 }
 0xddb   : > { %2914 = vrot.lane.b32.xlu1 %v10608_v52, %s7041_s21 }
 0xddd   : > { %v6032_v46 = vpop.f32.mrb[164].mxu0 }
 0xdde   : > { %4902 = vrot.lane.b32.xlu0 %v4863_v33, %s7039_s22  ;;  %v4825_v56 = vpop.f32.mrb[165].mxu0 }
 0xddf   : > { %4900 = vrot.lane.b32.xlu1 %v4862_v40, %s7039_s22  ;;  %v6033_v25 = vpop.f32.mrb[166].mxu0 }
 0xde0   : > { %v4869_v54 = vpack.c.bf16 %v6033_v25, %v6032_v46  ;;  %v4828_v51 = vpop.f32.mrb[167].mxu0 }
 0xde1   : > { %v4868_v38 = vpack.c.bf16 %v4828_v51, %v4825_v56 }
 0xde2   : > { %3913 = vrot.lane.b32.xlu0 %v10611_v13, %s7040_s10 }
 0xde3   : > { %3911 = vrot.lane.b32.xlu1 %v10614_v61, %s7040_s10 }
 0xde5   : > { %v6036_v49 = vpop.f32.mrb[168].mxu0 }
 0xde6   : > { %4910 = vrot.lane.b32.xlu0 %v4867_v8, %s7039_s22  ;;  %v4841_v63 = vpop.f32.mrb[169].mxu0 }
 0xde7   : > { %4908 = vrot.lane.b32.xlu1 %v4866_v21, %s7039_s22  ;;  %v6037_v30 = vpop.f32.mrb[170].mxu0 }
 0xde8   : > { %v4871_v53 = vpack.c.bf16 %v6037_v30, %v6036_v49  ;;  %v4844_v22 = vpop.f32.mrb[171].mxu0 }
 0xde9   : > { %v4870_v9 = vpack.c.bf16 %v4844_v22, %v4841_v63 }
 0xdea   : > { %2920 = vrot.lane.b32.xlu0 %v10617_v12, %s7041_s21 }
 0xdeb   : > { %2918 = vrot.lane.b32.xlu1 %v10620_v17, %s7041_s21 }
 0xdee   : > { %3917 = vrot.lane.b32.xlu0 %v10623_v36, %s7040_s10 }
 0xdef   : > { %3915 = vrot.lane.b32.xlu1 %v10626_v23, %s7040_s10 }
 0xdf2   : > { %4914 = vrot.lane.b32.xlu0 %v4869_v54, %s7039_s22 }
 0xdf3   : > { %4912 = vrot.lane.b32.xlu1 %v4868_v38, %s7039_s22 }
 0xdf6   : > { %2924 = vrot.lane.b32.xlu0 %v10629_v58, %s7041_s21 }
 0xdf7   : > { %2922 = vrot.lane.b32.xlu1 %v10632_v60, %s7041_s21  ;;  %s10639_s21 = sld [smem:[#allocation86_spill]] }
 0xdfa   : > { %3921 = vrot.lane.b32.xlu0 %v10635_v11, %s7040_s10 }
 0xdfb   : > { %3919 = vrot.lane.b32.xlu1 %v10638_v5, %s7040_s10 }
 0xdfd   : > { %v10220_v19 = vld [vmem:[%s10639_s21] ss:$0 sm:$0xff] }
 0xdfe   : > { %4918 = vrot.lane.b32.xlu0 %v4871_v53, %s7039_s22 }
 0xdff   : > { %4916 = vrot.lane.b32.xlu1 %v4870_v9, %s7039_s22 }
 0xe08   : > { %v4891_v62 = vpop.permute.xlu0 %4890 }
 0xe09   : > { %4938 = vst.msk [vmem:[#allocation2 + $0x8] sm:$0xff] %vm4936_vm4, %v4891_v62  ;;  %v4889_v18 = vpop.permute.xlu1 %4888 }
 0xe0a   : > { %4937 = vst.msk [vmem:[#allocation2] sm:$0xff] %vm4936_vm4, %v4889_v18 }
 0xe0c   : > { %v3910_v28 = vpop.permute.xlu0 %3909 }
 0xe0d   : > { %3949 = vst.msk [vmem:[#allocation2 + $0x48] sm:$0xff] %vm3939_vm3, %v3910_v28  ;;  %v3908_v20 = vpop.permute.xlu1 %3907 }
 0xe0e   : > { %3948 = vst.msk [vmem:[#allocation2 + $0x40] sm:$0xff] %vm3939_vm3, %v3908_v20 }
 0xe10   : > { %v4895_v41 = vpop.permute.xlu0 %4894  ;;  %v4954_v32 = vld [vmem:[#allocation2 + $0x8] sm:$0xff] }
 0xe11   : > { %4940 = vst.msk [vmem:[#allocation2 + $0x18] sm:$0xff] %vm4936_vm4, %v4895_v41  ;;  %v4893_v2 = vpop.permute.xlu1 %4892  ;;  %v4953_v50 = vld [vmem:[#allocation2] sm:$0xff] }
 0xe12   : > { %4939 = vst.msk [vmem:[#allocation2 + $0x10] sm:$0xff] %vm4936_vm4, %v4893_v2  ;;  %6054 = vmatprep.mubr.bf16.mxu1 %v4953_v50 }
 0xe13   : > { %6055 = vmatmul.mubr.bf16.vlgmr.msra.gmra.mrb[148].mxu1 %v4954_v32 }
 0xe18   : > { %v4956_v37 = vld [vmem:[#allocation2 + $0x18] sm:$0xff] }
 0xe19   : > { %v4955_v55 = vld [vmem:[#allocation2 + $0x10] sm:$0xff] }
 0xe1a   : > { %6058 = vmatprep.mubr.bf16.mxu1 %v4955_v55 }
 0xe1b   : > { %6059 = vmatmul.mubr.bf16.gmra.mrb[152].mxu1 %v4956_v37 }
 0xe44   : > { %v4907_v33 = vpop.permute.xlu0 %4906 }
 0xe45   : > { %4946 = vst.msk [vmem:[#allocation2 + $0x48] sm:$0xff] %vm4936_vm4, %v4907_v33  ;;  %v4905_v8 = vpop.permute.xlu1 %4904 }
 0xe46   : > { %4945 = vst.msk [vmem:[#allocation2 + $0x40] sm:$0xff] %vm4936_vm4, %v4905_v8 }
 0xe48   : > { %v4899_v1 = vpop.permute.xlu0 %4898 }
 0xe49   : > { %4942 = vst.msk [vmem:[#allocation2 + $0x28] sm:$0xff] %vm4936_vm4, %v4899_v1  ;;  %v4897_v45 = vpop.permute.xlu1 %4896 }
 0xe4a   : > { %4941 = vst.msk [vmem:[#allocation2 + $0x20] sm:$0xff] %vm4936_vm4, %v4897_v45 }
 0xe4c   : > { %v2917_v40 = vpop.permute.xlu0 %2916  ;;  %v4962_v57 = vld [vmem:[#allocation2 + $0x48] sm:$0xff] }
 0xe4d   : > { %2954 = vst.msk [vmem:[#allocation2 + $0x58] sm:$0xff] %vm2942_vm2, %v2917_v40  ;;  %v2915_v21 = vpop.permute.xlu1 %2914  ;;  %v4961_v51 = vld [vmem:[#allocation2 + $0x40] sm:$0xff] }
 0xe4e   : > { %2953 = vst.msk [vmem:[#allocation2 + $0x50] sm:$0xff] %vm2942_vm2, %v2915_v21 }
 0xe50   : > { %v4903_v44 = vpop.permute.xlu0 %4902  ;;  %v4958_v16 = vld [vmem:[#allocation2 + $0x28] sm:$0xff] }
 0xe51   : > { %4944 = vst.msk [vmem:[#allocation2 + $0x38] sm:$0xff] %vm4936_vm4, %v4903_v44  ;;  %v4901_v29 = vpop.permute.xlu1 %4900  ;;  %v4957_v39 = vld [vmem:[#allocation2 + $0x20] sm:$0xff] }
 0xe52   : > { %4943 = vst.msk [vmem:[#allocation2 + $0x30] sm:$0xff] %vm4936_vm4, %v4901_v29  ;;  %6062 = vmatprep.mubr.bf16.mxu1 %v4957_v39 }
 0xe53   : > { %6063 = vmatmul.mubr.bf16.gmra.mrb[156].mxu1 %v4958_v16 }
 0xe54   : > { %v3914_v4 = vpop.permute.xlu0 %3913 }
 0xe55   : > { %3951 = vst.msk [vmem:[#allocation2 + $0x58] sm:$0xff] %vm3939_vm3, %v3914_v4  ;;  %v3912_v52 = vpop.permute.xlu1 %3911 }
 0xe56   : > { %3950 = vst.msk [vmem:[#allocation2 + $0x50] sm:$0xff] %vm3939_vm3, %v3912_v52 }
 0xe58   : > { %v4911_v46 = vpop.permute.xlu0 %4910  ;;  %v4960_v54 = vld [vmem:[#allocation2 + $0x38] sm:$0xff] }
 0xe59   : > { %4948 = vst.msk [vmem:[#allocation2 + $0x58] sm:$0xff] %vm4936_vm4, %v4911_v46  ;;  %v4909_v56 = vpop.permute.xlu1 %4908  ;;  %v4959_v25 = vld [vmem:[#allocation2 + $0x30] sm:$0xff] }
 0xe5a   : > { %4947 = vst.msk [vmem:[#allocation2 + $0x50] sm:$0xff] %vm4936_vm4, %v4909_v56  ;;  %6066 = vmatprep.mubr.bf16.mxu1 %v4959_v25 }
 0xe5b   : > { %6067 = vmatmul.mubr.bf16.gmra.mrb[160].mxu1 %v4960_v54 }
 0xe5c   : > { %6070 = vmatprep.mubr.bf16.mxu1 %v4961_v51  ;;  %v2921_v38 = vpop.permute.xlu0 %2920 }
 0xe5d   : > { %2956 = vst.msk [vmem:[#allocation2 + $0x68] sm:$0xff] %vm2942_vm2, %v2921_v38  ;;  %v2919_v10 = vpop.permute.xlu1 %2918 }
 0xe5e   : > { %2955 = vst.msk [vmem:[#allocation2 + $0x60] sm:$0xff] %vm2942_vm2, %v2919_v10 }
 0xe60   : > { %v3918_v3 = vpop.permute.xlu0 %3917  ;;  %v4964_v53 = vld [vmem:[#allocation2 + $0x58] sm:$0xff] }
 0xe61   : > { %3953 = vst.msk [vmem:[#allocation2 + $0x68] sm:$0xff] %vm3939_vm3, %v3918_v3  ;;  %v3916_v13 = vpop.permute.xlu1 %3915  ;;  %v4963_v43 = vld [vmem:[#allocation2 + $0x50] sm:$0xff] }
 0xe62   : > { %3952 = vst.msk [vmem:[#allocation2 + $0x60] sm:$0xff] %vm3939_vm3, %v3916_v13 }
 0xe63   : > { %6071 = vmatmul.mubr.bf16.gmra.mrb[164].mxu1 %v4962_v57 }
 0xe64   : > { %6074 = vmatprep.mubr.bf16.mxu1 %v4963_v43  ;;  %v4915_v61 = vpop.permute.xlu0 %4914 }
 0xe65   : > { %4950 = vst.msk [vmem:[#allocation2 + $0x68] sm:$0xff] %vm4936_vm4, %v4915_v61  ;;  %v4913_v49 = vpop.permute.xlu1 %4912 }
 0xe66   : > { %4949 = vst.msk [vmem:[#allocation2 + $0x60] sm:$0xff] %vm4936_vm4, %v4913_v49 }
 0xe68   : > { %v2925_v63 = vpop.permute.xlu0 %2924 }
 0xe69   : > { %2958 = vst.msk [vmem:[#allocation2 + $0x78] sm:$0xff] %vm2942_vm2, %v2925_v63  ;;  %v2923_v30 = vpop.permute.xlu1 %2922 }
 0xe6a   : > { %2957 = vst.msk [vmem:[#allocation2 + $0x70] sm:$0xff] %vm2942_vm2, %v2923_v30 }
 0xe6b   : > { %6075 = vmatmul.mubr.bf16.gmra.mrb[168].mxu1 %v4964_v53 }
 0xe6c   : > { %v3922_v22 = vpop.permute.xlu0 %3921  ;;  %v4966_v6 = vld [vmem:[#allocation2 + $0x68] sm:$0xff] }
 0xe6d   : > { %3955 = vst.msk [vmem:[#allocation2 + $0x78] sm:$0xff] %vm3939_vm3, %v3922_v22  ;;  %v3920_v9 = vpop.permute.xlu1 %3919  ;;  %v4965_v59 = vld [vmem:[#allocation2 + $0x60] sm:$0xff] }
 0xe6e   : > { %3954 = vst.msk [vmem:[#allocation2 + $0x70] sm:$0xff] %vm3939_vm3, %v3920_v9  ;;  %6078 = vmatprep.mubr.bf16.mxu1 %v4965_v59 }
 0xe70   : > { %v4919_v0 = vpop.permute.xlu0 %4918 }
 0xe71   : > { %4952 = vst.msk [vmem:[#allocation2 + $0x78] sm:$0xff] %vm4936_vm4, %v4919_v0  ;;  %v4917_v12 = vpop.permute.xlu1 %4916 }
 0xe72   : > { %4951 = vst.msk [vmem:[#allocation2 + $0x70] sm:$0xff] %vm4936_vm4, %v4917_v12 }
 0xe73   : > { %6079 = vmatmul.mubr.bf16.gmra.mrb[172].mxu1 %v4966_v6 }
 0xe78   : > { %v4968_v17 = vld [vmem:[#allocation2 + $0x78] sm:$0xff] }
 0xe79   : > { %v4967_v34 = vld [vmem:[#allocation2 + $0x70] sm:$0xff] }
 0xe7a   : > { %6082 = vmatprep.mubr.bf16.mxu1 %v4967_v34 }
 0xe7b   : > { %6083 = vmatmul.mubr.bf16.gmra.mrb[176].mxu1 %v4968_v17 }
 0xee6   : > { %v6056_v7 = vpop.f32.mrb[148].mxu1 }
 0xee7   : > { %v5083_v36 = vadd.f32 %v6056_v7, %v10220_v19  ;;  %v5074_v15 = vpop.f32.mrb[149].mxu1 }
 0xee8   : > { %v5075_v35 = vadd.f32 %v10220_v19, %v5074_v15  ;;  %v6057_v23 = vpop.f32.mrb[150].mxu1 }
 0xee9   : > { %5203 = vst [vmem:[%s10226_s1 + $0x10] sm:$0xff] %v5083_v36  ;;  %v5086_v14 = vadd.f32 %v6057_v23, %v10220_v19  ;;  %v5077_v27 = vpop.f32.mrb[151].mxu1 }
 0xeea   : > { %5201 = vst [vmem:[%s10226_s1] sm:$0xff] %v5075_v35  ;;  %v5078_v58 = vadd.f32 %v10220_v19, %v5077_v27 }
 0xeeb   : > { %5204 = vst [vmem:[%s10226_s1 + $0x18] sm:$0xff] %v5086_v14 }
 0xeec   : > { %5202 = vst [vmem:[%s10226_s1 + $0x8] sm:$0xff] %v5078_v58 }
 0xeee   : > { %v6060_v47 = vpop.f32.mrb[152].mxu1 }
 0xeef   : > { %v5099_v42 = vadd.f32 %v6060_v47, %v10220_v19  ;;  %v5090_v60 = vpop.f32.mrb[153].mxu1 }
 0xef0   : > { %v5091_v26 = vadd.f32 %v10220_v19, %v5090_v60  ;;  %v6061_v24 = vpop.f32.mrb[154].mxu1 }
 0xef1   : > { %5207 = vst [vmem:[%s10226_s1 + $0x30] sm:$0xff] %v5099_v42  ;;  %v5102_v11 = vadd.f32 %v6061_v24, %v10220_v19  ;;  %v5093_v48 = vpop.f32.mrb[155].mxu1 }
 0xef2   : > { %5205 = vst [vmem:[%s10226_s1 + $0x20] sm:$0xff] %v5091_v26  ;;  %v5094_v31 = vadd.f32 %v10220_v19, %v5093_v48 }
 0xef3   : > { %5208 = vst [vmem:[%s10226_s1 + $0x38] sm:$0xff] %v5102_v11 }
 0xef4   : > { %5206 = vst [vmem:[%s10226_s1 + $0x28] sm:$0xff] %v5094_v31 }
 0xf26   : > { %v6064_v5 = vpop.f32.mrb[156].mxu1 }
 0xf27   : > { %v5115_v62 = vadd.f32 %v6064_v5, %v10220_v19  ;;  %v5106_v18 = vpop.f32.mrb[157].mxu1 }
 0xf28   : > { %v5107_v28 = vadd.f32 %v10220_v19, %v5106_v18  ;;  %v6065_v20 = vpop.f32.mrb[158].mxu1 }
 0xf29   : > { %5211 = vst [vmem:[%s10226_s1 + $0x50] sm:$0xff] %v5115_v62  ;;  %v5118_v41 = vadd.f32 %v6065_v20, %v10220_v19  ;;  %v5109_v2 = vpop.f32.mrb[159].mxu1 }
 0xf2a   : > { %5209 = vst [vmem:[%s10226_s1 + $0x40] sm:$0xff] %v5107_v28  ;;  %v5110_v50 = vadd.f32 %v10220_v19, %v5109_v2 }
 0xf2b   : > { %5212 = vst [vmem:[%s10226_s1 + $0x58] sm:$0xff] %v5118_v41 }
 0xf2c   : > { %5210 = vst [vmem:[%s10226_s1 + $0x48] sm:$0xff] %v5110_v50 }
 0xf2e   : > { %v6068_v32 = vpop.f32.mrb[160].mxu1 }
 0xf2f   : > { %v5131_v55 = vadd.f32 %v6068_v32, %v10220_v19  ;;  %v5122_v37 = vpop.f32.mrb[161].mxu1 }
 0xf30   : > { %v5123_v33 = vadd.f32 %v10220_v19, %v5122_v37  ;;  %v6069_v8 = vpop.f32.mrb[162].mxu1 }
 0xf31   : > { %5215 = vst [vmem:[%s10226_s1 + $0x70] sm:$0xff] %v5131_v55  ;;  %v5134_v1 = vadd.f32 %v6069_v8, %v10220_v19  ;;  %v5125_v45 = vpop.f32.mrb[163].mxu1 }
 0xf32   : > { %5213 = vst [vmem:[%s10226_s1 + $0x60] sm:$0xff] %v5123_v33  ;;  %v5126_v40 = vadd.f32 %v10220_v19, %v5125_v45 }
 0xf33   : > { %5216 = vst [vmem:[%s10226_s1 + $0x78] sm:$0xff] %v5134_v1 }
 0xf34   : > { %5214 = vst [vmem:[%s10226_s1 + $0x68] sm:$0xff] %v5126_v40 }
 0xf36   : > { %v6072_v21 = vpop.f32.mrb[164].mxu1 }
 0xf37   : > { %v5147_v44 = vadd.f32 %v6072_v21, %v10220_v19  ;;  %v5138_v29 = vpop.f32.mrb[165].mxu1 }
 0xf38   : > { %v5139_v39 = vadd.f32 %v10220_v19, %v5138_v29  ;;  %v6073_v16 = vpop.f32.mrb[166].mxu1 }
 0xf39   : > { %5219 = vst [vmem:[%s10226_s1 + $0x90] sm:$0xff] %v5147_v44  ;;  %v5150_v4 = vadd.f32 %v6073_v16, %v10220_v19  ;;  %v5141_v52 = vpop.f32.mrb[167].mxu1 }
 0xf3a   : > { %5217 = vst [vmem:[%s10226_s1 + $0x80] sm:$0xff] %v5139_v39  ;;  %v5142_v46 = vadd.f32 %v10220_v19, %v5141_v52 }
 0xf3b   : > { %5220 = vst [vmem:[%s10226_s1 + $0x98] sm:$0xff] %v5150_v4 }
 0xf3c   : > { %5218 = vst [vmem:[%s10226_s1 + $0x88] sm:$0xff] %v5142_v46 }
 0xf3e   : > { %v6076_v56 = vpop.f32.mrb[168].mxu1 }
 0xf3f   : > { %v5163_v25 = vadd.f32 %v6076_v56, %v10220_v19  ;;  %v5154_v54 = vpop.f32.mrb[169].mxu1 }
 0xf40   : > { %v5155_v51 = vadd.f32 %v10220_v19, %v5154_v54  ;;  %v6077_v38 = vpop.f32.mrb[170].mxu1 }
 0xf41   : > { %5223 = vst [vmem:[%s10226_s1 + $0xb0] sm:$0xff] %v5163_v25  ;;  %v5166_v10 = vadd.f32 %v6077_v38, %v10220_v19  ;;  %v5157_v3 = vpop.f32.mrb[171].mxu1 }
 0xf42   : > { %5221 = vst [vmem:[%s10226_s1 + $0xa0] sm:$0xff] %v5155_v51  ;;  %v5158_v13 = vadd.f32 %v10220_v19, %v5157_v3 }
 0xf43   : > { %5224 = vst [vmem:[%s10226_s1 + $0xb8] sm:$0xff] %v5166_v10 }
 0xf44   : > { %5222 = vst [vmem:[%s10226_s1 + $0xa8] sm:$0xff] %v5158_v13 }
 0xf46   : > { %v6080_v57 = vpop.f32.mrb[172].mxu1 }
 0xf47   : > { %v5179_v43 = vadd.f32 %v6080_v57, %v10220_v19  ;;  %v5170_v61 = vpop.f32.mrb[173].mxu1 }
 0xf48   : > { %v5171_v49 = vadd.f32 %v10220_v19, %v5170_v61  ;;  %v6081_v63 = vpop.f32.mrb[174].mxu1 }
 0xf49   : > { %5227 = vst [vmem:[%s10226_s1 + $0xd0] sm:$0xff] %v5179_v43  ;;  %v5182_v30 = vadd.f32 %v6081_v63, %v10220_v19  ;;  %v5173_v53 = vpop.f32.mrb[175].mxu1 }
 0xf4a   : > { %5225 = vst [vmem:[%s10226_s1 + $0xc0] sm:$0xff] %v5171_v49  ;;  %v5174_v22 = vadd.f32 %v10220_v19, %v5173_v53 }
 0xf4b   : > { %5228 = vst [vmem:[%s10226_s1 + $0xd8] sm:$0xff] %v5182_v30 }
 0xf4c   : > { %5226 = vst [vmem:[%s10226_s1 + $0xc8] sm:$0xff] %v5174_v22 }
 0xf4e   : > { %v6084_v9 = vpop.f32.mrb[176].mxu1 }
 0xf4f   : > { %v5195_v59 = vadd.f32 %v6084_v9, %v10220_v19  ;;  %v5186_v0 = vpop.f32.mrb[177].mxu1 }
 0xf50   : > { %v5187_v12 = vadd.f32 %v10220_v19, %v5186_v0  ;;  %v6085_v6 = vpop.f32.mrb[178].mxu1 }
 0xf51   : > { %5231 = vst [vmem:[%s10226_s1 + $0xf0] sm:$0xff] %v5195_v59  ;;  %v5198_v34 = vadd.f32 %v6085_v6, %v10220_v19  ;;  %v5189_v17 = vpop.f32.mrb[179].mxu1 }
 0xf52   : > { %5229 = vst [vmem:[%s10226_s1 + $0xe0] sm:$0xff] %v5187_v12  ;;  %v5190_v7 = vadd.f32 %v10220_v19, %v5189_v17 }
 0xf53   : > { %5232 = vst [vmem:[%s10226_s1 + $0xf8] sm:$0xff] %v5198_v34 }
 0xf54   : > { %5230 = vst [vmem:[%s10226_s1 + $0xe8] sm:$0xff] %v5190_v7 }
 0xf55   : > { %s10640_s8 = sld [smem:[#allocation28_spill]]  ;;  %s5581_s19 = sshll.u32 %s7125_s17, 11 }
 0xf56   : > { %s5263_s13 = sshll.u32 %s10226_s1, 4  ;;  %s10641_s18 = sld [smem:[#allocation87_spill]]  ;;  %s5264_s13 = int_to_ptr.vmem [resolvable:$true] %s5263_s13 }
 0xf57   : > { %s7042_s29 = smov 2048   ;;  %s7043_s20 = smov 4096  }
 0xf58   : > { %s7044_s12 = smov 16   ;;  %s7045_s23 = smov 128  }
 0xf59   : > { %s7046_s17 = smov 8   ;;  %s7047_s9 = smov [#allocation17]  }
 0xf5a   : > { %s7048_s24 = smov 0  }
 0xf5b   : > { %p10642_p8 = scmp.ne.s32.totalorder %s10640_s8, 0 }
 0xf5c   : > { %s5246_s11 = scalar_lea.hbm %s10641_s18, %s5581_s19 }
 0xf5d   : > { %6126 = sst [smem:[#allocation18]] (%p10642_p8), %s7042_s29 }
 0xf5e   : > { %6127 = sst [smem:[#allocation18 + $0x1]] (%p10642_p8), %s7043_s20 }
 0xf5f   : > { %6128 = sst [smem:[#allocation18 + $0x2]] (%p10642_p8), %s7044_s12 }
 0xf60   : > { %6129 = sst [smem:[#allocation18 + $0x3]] (%p10642_p8), %s7045_s23 }
 0xf61   : > { %6130 = sst [smem:[#allocation18 + $0x4]] (%p10642_p8), %s7045_s23 }
 0xf62   : > { %6131 = sst [smem:[#allocation18 + $0x5]] (%p10642_p8), %s7046_s17 }
 0xf63   : > { %6132 = dma.general (%p10642_p8), %s5264_s13, 4096, %s5246_s11, %s5234_s2, %s7047_s9, [#allocation18], %s7048_s24, 0  }
 0xf64 PF: > { %s10643_s28 = sld [smem:[#allocation25_spill]]  ;;  %s10644_s22 = sld [smem:[#allocation29_spill]] }
 0xf6a   : > { %s5291_s10 = sand.u32 1, %s10643_s28   ;;  %p10645_p9 = scmp.ne.s32.totalorder %s10644_s22, 0 }
 0xf6b   : > { %s5292_s21 = scalar_lea.sflag [#allocation5], %s5291_s10 }
 0xf6c   : > { %p6151_p10 = pnand %p5404_p4, %p10645_p9 }
 0xf6e   : > { %7004 = dma.done.wait (!%p6151_p10), %s5292_s21, 4096  }
 0xf6f   : > { %7006 = vsyncadd (!%p6151_p10), %s5292_s21, 4294963200  ;;  %s10646_s16 = sld [smem:[#allocation26_spill]]  ;;  %s10647_s1 = sld [smem:[#allocation27_spill]] }
 0xf70   : > { %s10648_s13 = smov %s7013_s14  ;;  %s10649_s14 = smov %s7017_s15 }
 0xf75   : > { %p26_p1 = scmp.ge.s32.totalorder %s10646_s16, 4   ;;  %s10650_s15 = smov %s10647_s1 }
 0xf77   :  { %28 = sbr.rel (!%p26_p1) target bundleno = 14 (0xe), region = 135 }
 0xf7e   :  { %5297 = vsyncpa [#allocation4], 1 }
 0xf7f   :  { %5299 = vsyncpa [#allocation4 + $0x1], 1 }
 0xf80   :  { %5300 = vsyncpa [#allocation7], 1 }
 0xf81   :  { %5301 = vsyncpa [#allocation10], 1 }
 0xf82   :  { %5302 = vsyncpa [#allocation13], 1 }
 0xf83   :  { %5303 = vsyncpa [#allocation5], 1 }
 0xf84   :  { %5305 = vsyncpa [#allocation5 + $0x1], 1 }

</bundles_post_ra>
